<compile_context>
chip_gen: v7x
topology: tpu7x:2x2x1
jax: 0.10.0
libtpu: 0.0.40
codegen_flags: <defaults>
</compile_context>

<pallas_src>
import functools

import jax
import jax.numpy as jnp
from jax.experimental import pallas as pl
from jax.experimental.pallas import tpu as pltpu

# ----------------------------- config (small BERT) -----------------------------
BATCH = 2
SEQ = 8
HIDDEN = 128
NUM_HEADS = 4
HEAD_DIM = HIDDEN // NUM_HEADS
INTERMEDIATE = 256
NUM_LAYERS = 2
VOCAB = 64
TYPE_VOCAB = 2
MAX_POS = 32
LN_EPS = 1e-12


# ----------------------------- shared math helpers ------------------------------
def _layernorm(x, g, b):
    # x: (rows, H) f32 ; g, b: (1, H) f32
    mean = jnp.mean(x, axis=-1, keepdims=True)
    xc = x - mean
    var = jnp.mean(xc * xc, axis=-1, keepdims=True)
    return xc * jax.lax.rsqrt(var + LN_EPS) * g + b


def _pooler(params, sequence_output):
    # BertPooler: dense over CLS token + tanh; runs in the wrapper in f32,
    # batched over all CLS rows at once.
    cls = sequence_output[:, 0, :].astype(jnp.float32)               # (B, H)
    return jnp.tanh(jnp.dot(cls, params["pool_w"]) + params["pool_b"])


def _embed(params, input_ids, token_type_ids):
    # Embedding gathers stay in plain-JAX glue; the LayerNorm runs in the kernel.
    B, S = input_ids.shape
    pos_ids = jnp.arange(S, dtype=jnp.int32)
    emb = (
        jnp.take(params["word_emb"], input_ids, axis=0)
        + jnp.take(params["pos_emb"], pos_ids, axis=0)[None, :, :]
        + jnp.take(params["type_emb"], token_type_ids, axis=0)
    )  # (B, S, H)
    return emb.reshape(B * S, HIDDEN)


# ----------------------------- fused Pallas kernel ------------------------------
def _bert_kernel(
    emb_ref, mask_ref, eg_ref, eb_ref,
    qkvw_ref, qkvb_ref, aow_ref, aob_ref, alng_ref, alnb_ref,
    iw_ref, ib_ref, ow_ref, ob_ref, olng_ref, olnb_ref,
    seq_ref, ctx_ref,
    *, batch, seq,
):
    # additive extended attention mask: loaded once, hoisted out of all loops
    bias = mask_ref[...]                                             # (B, 1, S) f32

    # ---- embeddings LayerNorm ----
    x = _layernorm(emb_ref[...].astype(jnp.float32), eg_ref[...], eb_ref[...])  # (B*S, H)

    for l in range(NUM_LAYERS):
        xb = x.astype(jnp.bfloat16)

        # ---- fused Q/K/V projection: one (B*S, H) x (H, 3H) matmul ----
        qkv = jnp.dot(xb, qkvw_ref[l], preferred_element_type=jnp.float32) + qkvb_ref[l]
        qkv16 = qkv.astype(jnp.bfloat16)                  # single bf16 cast before slicing
        q = qkv16[:, 0 * HIDDEN:1 * HIDDEN].reshape(batch, seq, HIDDEN)
        k = qkv16[:, 1 * HIDDEN:2 * HIDDEN].reshape(batch, seq, HIDDEN)
        v = qkv16[:, 2 * HIDDEN:3 * HIDDEN].reshape(batch, seq, HIDDEN)

        # ---- self-attention: static head loop, each head batched over B ----
        # 1/sqrt(head_dim) is pre-folded into the Q weights (see init_params).
        for h in range(NUM_HEADS):
            sl = slice(h * HEAD_DIM, (h + 1) * HEAD_DIM)
            s = jnp.einsum("bqd,bkd->bqk", q[:, :, sl], k[:, :, sl],
                           preferred_element_type=jnp.float32)       # (B, S, S)
            s = s + bias
            s = s - jnp.max(s, axis=-1, keepdims=True)
            p = jnp.exp(s)
            p = p * pl.reciprocal(jnp.sum(p, axis=-1, keepdims=True), approx=True)
            ctx_h = jnp.einsum("bqk,bkd->bqd", p.astype(jnp.bfloat16), v[:, :, sl],
                               preferred_element_type=jnp.float32)   # (B, S, DH)
            # lane-dense reassembly into the (B*S, H) VMEM scratch (no concatenate)
            ctx_ref[:, sl] = ctx_h.reshape(batch * seq, HEAD_DIM).astype(jnp.bfloat16)

        # ---- attention output projection + residual LayerNorm ----
        attn_out = jnp.dot(ctx_ref[...], aow_ref[l],
                           preferred_element_type=jnp.float32) + aob_ref[l]
        x = _layernorm(attn_out + x, alng_ref[l], alnb_ref[l])

        # ---- feed-forward (tanh-approx GELU) + residual LayerNorm ----
        # TODO(synk): HuggingFace BERT default hidden_act='gelu' is erf-based;
        # tanh-approx GELU is used here (small numeric deviation).
        inter = jnp.dot(x.astype(jnp.bfloat16), iw_ref[l],
                        preferred_element_type=jnp.float32) + ib_ref[l]
        inter = jax.nn.gelu(inter, approximate=True)
        ffn = jnp.dot(inter.astype(jnp.bfloat16), ow_ref[l],
                      preferred_element_type=jnp.float32) + ob_ref[l]
        x = _layernorm(ffn + x, olng_ref[l], olnb_ref[l])

    # ---- sequence output (lane-dense, last dim = HIDDEN = 128) ----
    seq_ref[...] = x.astype(seq_ref.dtype)


def bert_encoder_fused(params, emb2d, mask3d, batch, seq):
    # Single-invocation kernel: no grid; every operand is a full VMEM block
    # (total weights ~0.5 MB << default scoped VMEM on v5e/v6e/v7x).
    return pl.pallas_call(
        functools.partial(_bert_kernel, batch=batch, seq=seq),
        out_shape=jax.ShapeDtypeStruct((batch * seq, HIDDEN), jnp.float32),
        scratch_shapes=[pltpu.VMEM((batch * seq, HIDDEN), jnp.bfloat16)],
    )(
        emb2d, mask3d, params["emb_ln_g"], params["emb_ln_b"],
        params["qkv_w"], params["qkv_b"], params["ao_w"], params["ao_b"],
        params["attn_ln_g"], params["attn_ln_b"],
        params["i_w"], params["i_b"], params["o_w"], params["o_b"],
        params["out_ln_g"], params["out_ln_b"],
    )


# ----------------------------- parameter init ----------------------------------
def _normal(key, shape, std=0.02):
    return (std * jax.random.normal(key, shape)).astype(jnp.float32)


def init_params(key):
    keys = iter(jax.random.split(key, 8 + NUM_LAYERS * 8))
    p = {
        "word_emb": _normal(next(keys), (VOCAB, HIDDEN)),
        "pos_emb": _normal(next(keys), (MAX_POS, HIDDEN)),
        "type_emb": _normal(next(keys), (TYPE_VOCAB, HIDDEN)),
        "emb_ln_g": jnp.ones((1, HIDDEN), jnp.float32),
        "emb_ln_b": jnp.zeros((1, HIDDEN), jnp.float32),
        # pooler runs in the wrapper in f32
        "pool_w": _normal(next(keys), (HIDDEN, HIDDEN)),
        "pool_b": jnp.zeros((1, HIDDEN), jnp.float32),
    }
    scale = 1.0 / float(HEAD_DIM) ** 0.5
    qkv_w, ao_w, i_w, o_w = [], [], [], []
    for _ in range(NUM_LAYERS):
        # fold 1/sqrt(head_dim) into the Q columns at init time (one-time host
        # transform; kernel never multiplies scores by the scale)
        qw = _normal(next(keys), (HIDDEN, HIDDEN)) * scale
        kw = _normal(next(keys), (HIDDEN, HIDDEN))
        vw = _normal(next(keys), (HIDDEN, HIDDEN))
        qkv_w.append(jnp.concatenate([qw, kw, vw], axis=1))          # (H, 3H)
        ao_w.append(_normal(next(keys), (HIDDEN, HIDDEN)))
        i_w.append(_normal(next(keys), (HIDDEN, INTERMEDIATE)))
        o_w.append(_normal(next(keys), (INTERMEDIATE, HIDDEN)))
    # stacked MXU-operand weights in bf16; biases / LN params stay f32
    p["qkv_w"] = jnp.stack(qkv_w).astype(jnp.bfloat16)               # (L, H, 3H)
    p["qkv_b"] = jnp.zeros((NUM_LAYERS, 1, 3 * HIDDEN), jnp.float32)  # (Q part would be scaled too)
    p["ao_w"] = jnp.stack(ao_w).astype(jnp.bfloat16)                 # (L, H, H)
    p["ao_b"] = jnp.zeros((NUM_LAYERS, 1, HIDDEN), jnp.float32)
    p["attn_ln_g"] = jnp.ones((NUM_LAYERS, 1, HIDDEN), jnp.float32)
    p["attn_ln_b"] = jnp.zeros((NUM_LAYERS, 1, HIDDEN), jnp.float32)
    p["i_w"] = jnp.stack(i_w).astype(jnp.bfloat16)                   # (L, H, I)
    p["i_b"] = jnp.zeros((NUM_LAYERS, 1, INTERMEDIATE), jnp.float32)
    p["o_w"] = jnp.stack(o_w).astype(jnp.bfloat16)                   # (L, I, H)
    p["o_b"] = jnp.zeros((NUM_LAYERS, 1, HIDDEN), jnp.float32)
    p["out_ln_g"] = jnp.ones((NUM_LAYERS, 1, HIDDEN), jnp.float32)
    p["out_ln_b"] = jnp.zeros((NUM_LAYERS, 1, HIDDEN), jnp.float32)
    return p


# ----------------------------- BertModelWarper.forward -------------------------
def bert_warper_forward(params, input_ids, attention_mask=None, token_type_ids=None):
    B, S = input_ids.shape
    if attention_mask is None:
        attention_mask = jnp.ones((B, S), jnp.float32)
    if token_type_ids is None:
        token_type_ids = jnp.zeros((B, S), jnp.int32)

    # get_extended_attention_mask (non-decoder path): (1 - mask) * -10000
    ext_mask = ((1.0 - attention_mask.astype(jnp.float32)) * -10000.0).reshape(B, 1, S)

    emb2d = _embed(params, input_ids, token_type_ids)                # (B*S, H)
    seq2d = bert_encoder_fused(params, emb2d, ext_mask, B, S)
    sequence_output = seq2d.reshape(B, S, HIDDEN)
    pooled_output = _pooler(params, sequence_output)                 # hoisted out of kernel

    # return_dict=False path of BertModelWarper: (sequence_output, pooled_output)
    # TODO(synk): decoder / cross-attention / past_key_values / head_mask /
    # output_attentions / output_hidden_states branches are not materialized.
    return sequence_output, pooled_output


# ----------------------------- pure-JAX reference -------------------------------
def bert_reference(params, input_ids, attention_mask=None, token_type_ids=None):
    """Mirror of the kernel math in plain JAX (same bf16 matmul operands,
    f32 accumulation, exact softmax)."""
    B, S = input_ids.shape
    if attention_mask is None:
        attention_mask = jnp.ones((B, S), jnp.float32)
    if token_type_ids is None:
        token_type_ids = jnp.zeros((B, S), jnp.int32)
    bias = ((1.0 - attention_mask.astype(jnp.float32)) * -10000.0).reshape(B, 1, S)

    x = _layernorm(_embed(params, input_ids, token_type_ids).astype(jnp.float32),
                   params["emb_ln_g"], params["emb_ln_b"])
    for l in range(NUM_LAYERS):
        xb = x.astype(jnp.bfloat16)
        qkv = jnp.dot(xb, params["qkv_w"][l],
                      preferred_element_type=jnp.float32) + params["qkv_b"][l]
        qkv16 = qkv.astype(jnp.bfloat16)
        q = qkv16[:, 0 * HIDDEN:1 * HIDDEN].reshape(B, S, HIDDEN)
        k = qkv16[:, 1 * HIDDEN:2 * HIDDEN].reshape(B, S, HIDDEN)
        v = qkv16[:, 2 * HIDDEN:3 * HIDDEN].reshape(B, S, HIDDEN)
        heads = []
        for h in range(NUM_HEADS):
            sl = slice(h * HEAD_DIM, (h + 1) * HEAD_DIM)
            s = jnp.einsum("bqd,bkd->bqk", q[:, :, sl], k[:, :, sl],
                           preferred_element_type=jnp.float32) + bias
            p = jax.nn.softmax(s, axis=-1)
            heads.append(jnp.einsum("bqk,bkd->bqd", p.astype(jnp.bfloat16), v[:, :, sl],
                                    preferred_element_type=jnp.float32))
        ctx = jnp.concatenate(heads, axis=-1).reshape(B * S, HIDDEN).astype(jnp.bfloat16)
        attn_out = jnp.dot(ctx, params["ao_w"][l],
                           preferred_element_type=jnp.float32) + params["ao_b"][l]
        x = _layernorm(attn_out + x, params["attn_ln_g"][l], params["attn_ln_b"][l])
        inter = jnp.dot(x.astype(jnp.bfloat16), params["i_w"][l],
                        preferred_element_type=jnp.float32) + params["i_b"][l]
        inter = jax.nn.gelu(inter, approximate=True)
        ffn = jnp.dot(inter.astype(jnp.bfloat16), params["o_w"][l],
                      preferred_element_type=jnp.float32) + params["o_b"][l]
        x = _layernorm(ffn + x, params["out_ln_g"][l], params["out_ln_b"][l])
    sequence_output = x.reshape(B, S, HIDDEN)
    return sequence_output, _pooler(params, sequence_output)


# ----------------------------- driver -------------------------------------------
if __name__ == "__main__":
    key = jax.random.PRNGKey(0)
    pkey, ikey = jax.random.split(key, 2)
    params = init_params(pkey)

    input_ids = jax.random.randint(ikey, (BATCH, SEQ), 0, VOCAB, dtype=jnp.int32)
    # simple padding mask: last token of batch element 1 is padding
    attention_mask = jnp.ones((BATCH, SEQ), jnp.float32).at[1, -1].set(0.0)
    token_type_ids = jnp.zeros((BATCH, SEQ), jnp.int32)

    fwd = jax.jit(bert_warper_forward)
    seq_out, pooled = fwd(params, input_ids, attention_mask, token_type_ids)
    jax.block_until_ready((seq_out, pooled))

    assert seq_out.shape == (BATCH, SEQ, HIDDEN)
    assert pooled.shape == (BATCH, HIDDEN)
    assert bool(jnp.all(jnp.isfinite(seq_out))) and bool(jnp.all(jnp.isfinite(pooled)))

    # tolerance check against the pure-JAX reference (identical precision choices;
    # remaining delta ~ approx-reciprocal softmax and accumulation order)
    ref_seq, ref_pooled = jax.jit(bert_reference)(params, input_ids, attention_mask,
                                                  token_type_ids)
    jax.block_until_ready((ref_seq, ref_pooled))
    seq_err = float(jnp.max(jnp.abs(seq_out - ref_seq)))
    pool_err = float(jnp.max(jnp.abs(pooled - ref_pooled)))
    assert seq_err < 5e-2, f"sequence output mismatch: max abs err {seq_err}"
    assert pool_err < 5e-2, f"pooled output mismatch: max abs err {pool_err}"

    print("KERNEL_OK")
</pallas_src>

<mosaic_0001>
module attributes {stable_mosaic.version = 11 : i64} {
  func.func @_bert_kernel(%arg0: memref<16x128xf32, #tpu.memory_space<vmem>>, %arg1: memref<2x1x8xf32, #tpu.memory_space<vmem>>, %arg2: memref<1x128xf32, #tpu.memory_space<vmem>>, %arg3: memref<1x128xf32, #tpu.memory_space<vmem>>, %arg4: memref<2x128x384xbf16, #tpu.memory_space<vmem>>, %arg5: memref<2x1x384xf32, #tpu.memory_space<vmem>>, %arg6: memref<2x128x128xbf16, #tpu.memory_space<vmem>>, %arg7: memref<2x1x128xf32, #tpu.memory_space<vmem>>, %arg8: memref<2x1x128xf32, #tpu.memory_space<vmem>>, %arg9: memref<2x1x128xf32, #tpu.memory_space<vmem>>, %arg10: memref<2x128x256xbf16, #tpu.memory_space<vmem>>, %arg11: memref<2x1x256xf32, #tpu.memory_space<vmem>>, %arg12: memref<2x256x128xbf16, #tpu.memory_space<vmem>>, %arg13: memref<2x1x128xf32, #tpu.memory_space<vmem>>, %arg14: memref<2x1x128xf32, #tpu.memory_space<vmem>>, %arg15: memref<2x1x128xf32, #tpu.memory_space<vmem>>, %arg16: memref<16x128xf32, #tpu.memory_space<vmem>>, %arg17: memref<16x128xbf16, #tpu.memory_space<vmem>>) attributes {dimension_semantics = [], scalar_prefetch = 0 : i64, scratch_operands = 1 : i64, tpu.core_type = #tpu.core_type<tc>} {
    %c0 = arith.constant 0 : index
    %c0_0 = arith.constant 0 : index
    %c0_1 = arith.constant 0 : index
    %0 = vector.load %arg1[%c0, %c0_0, %c0_1] : memref<2x1x8xf32, #tpu.memory_space<vmem>>, vector<2x1x8xf32>
    %c0_2 = arith.constant 0 : index
    %c0_3 = arith.constant 0 : index
    %1 = vector.load %arg0[%c0_2, %c0_3] : memref<16x128xf32, #tpu.memory_space<vmem>>, vector<16x128xf32>
    %c0_4 = arith.constant 0 : index
    %c0_5 = arith.constant 0 : index
    %2 = vector.load %arg2[%c0_4, %c0_5] : memref<1x128xf32, #tpu.memory_space<vmem>>, vector<1x128xf32>
    %c0_6 = arith.constant 0 : index
    %c0_7 = arith.constant 0 : index
    %3 = vector.load %arg3[%c0_6, %c0_7] : memref<1x128xf32, #tpu.memory_space<vmem>>, vector<1x128xf32>
    %cst = arith.constant dense<0.000000e+00> : vector<16xf32>
    %4 = vector.multi_reduction <add>, %1, %cst [1] : vector<16x128xf32> to vector<16xf32>
    %5 = vector.shape_cast %4 : vector<16xf32> to vector<16x1xf32>
    %cst_8 = arith.constant 1.280000e+02 : f32
    %6 = vector.broadcast %cst_8 : f32 to vector<16x1xf32>
    %7 = arith.divf %5, %6 : vector<16x1xf32>
    %8 = vector.broadcast %7 : vector<16x1xf32> to vector<16x128xf32>
    %9 = arith.subf %1, %8 : vector<16x128xf32>
    %10 = arith.mulf %9, %9 : vector<16x128xf32>
    %cst_9 = arith.constant dense<0.000000e+00> : vector<16xf32>
    %11 = vector.multi_reduction <add>, %10, %cst_9 [1] : vector<16x128xf32> to vector<16xf32>
    %12 = vector.shape_cast %11 : vector<16xf32> to vector<16x1xf32>
    %cst_10 = arith.constant 1.280000e+02 : f32
    %13 = vector.broadcast %cst_10 : f32 to vector<16x1xf32>
    %14 = arith.divf %12, %13 : vector<16x1xf32>
    %cst_11 = arith.constant 9.99999996E-13 : f32
    %15 = vector.broadcast %cst_11 : f32 to vector<16x1xf32>
    %16 = arith.addf %14, %15 : vector<16x1xf32>
    %17 = math.rsqrt %16 : vector<16x1xf32>
    %18 = vector.broadcast %17 : vector<16x1xf32> to vector<16x128xf32>
    %19 = arith.mulf %9, %18 : vector<16x128xf32>
    %20 = vector.broadcast %2 : vector<1x128xf32> to vector<16x128xf32>
    %21 = arith.mulf %19, %20 : vector<16x128xf32>
    %22 = vector.broadcast %3 : vector<1x128xf32> to vector<16x128xf32>
    %23 = arith.addf %21, %22 : vector<16x128xf32>
    %24 = arith.truncf %23 : vector<16x128xf32> to vector<16x128xbf16>
    %c0_12 = arith.constant 0 : index
    %c0_13 = arith.constant 0 : index
    %c0_14 = arith.constant 0 : index
    %25 = vector.load %arg4[%c0_12, %c0_13, %c0_14] : memref<2x128x384xbf16, #tpu.memory_space<vmem>>, vector<1x128x384xbf16>
    %26 = vector.shape_cast %25 : vector<1x128x384xbf16> to vector<128x384xbf16>
    %cst_15 = arith.constant dense<0.000000e+00> : vector<16x384xf32>
    %27 = tpu.matmul %24, %26, %cst_15 {dimension_numbers = #tpu.dot_dimension_numbers<[1], [0], [0], [1], [0, 0, 1, 1], [], []>} : vector<16x128xbf16>, vector<128x384xbf16>, vector<16x384xf32> -> vector<16x384xf32>
    %c0_16 = arith.constant 0 : index
    %c0_17 = arith.constant 0 : index
    %c0_18 = arith.constant 0 : index
    %28 = vector.load %arg5[%c0_16, %c0_17, %c0_18] : memref<2x1x384xf32, #tpu.memory_space<vmem>>, vector<1x1x384xf32>
    %29 = vector.shape_cast %28 : vector<1x1x384xf32> to vector<1x384xf32>
    %30 = vector.broadcast %29 : vector<1x384xf32> to vector<16x384xf32>
    %31 = arith.addf %27, %30 : vector<16x384xf32>
    %32 = arith.truncf %31 : vector<16x384xf32> to vector<16x384xbf16>
    %33 = vector.extract_strided_slice %32 {offsets = [0, 0], sizes = [16, 128], strides = [1, 1]} : vector<16x384xbf16> to vector<16x128xbf16>
    %34 = vector.shape_cast %33 : vector<16x128xbf16> to vector<2x8x128xbf16>
    %35 = vector.extract_strided_slice %32 {offsets = [0, 128], sizes = [16, 128], strides = [1, 1]} : vector<16x384xbf16> to vector<16x128xbf16>
    %36 = vector.shape_cast %35 : vector<16x128xbf16> to vector<2x8x128xbf16>
    %37 = vector.extract_strided_slice %32 {offsets = [0, 256], sizes = [16, 128], strides = [1, 1]} : vector<16x384xbf16> to vector<16x128xbf16>
    %38 = vector.shape_cast %37 : vector<16x128xbf16> to vector<2x8x128xbf16>
    %39 = vector.extract_strided_slice %34 {offsets = [0, 0, 0], sizes = [2, 8, 32], strides = [1, 1, 1]} : vector<2x8x128xbf16> to vector<2x8x32xbf16>
    %40 = vector.extract_strided_slice %36 {offsets = [0, 0, 0], sizes = [2, 8, 32], strides = [1, 1, 1]} : vector<2x8x128xbf16> to vector<2x8x32xbf16>
    "tpu.trace_start"() <{level = 10 : i32, message = "bqd,bkd->bqk"}> : () -> ()
    %cst_19 = arith.constant dense<0.000000e+00> : vector<2x8x8xf32>
    %41 = tpu.matmul %39, %40, %cst_19 {dimension_numbers = #tpu.dot_dimension_numbers<[2], [2], [1], [1], [0, 0, 0, 1, 1, 1], [0], [0]>} : vector<2x8x32xbf16>, vector<2x8x32xbf16>, vector<2x8x8xf32> -> vector<2x8x8xf32>
    "tpu.trace_stop"() : () -> ()
    %42 = vector.broadcast %0 : vector<2x1x8xf32> to vector<2x8x8xf32>
    %43 = arith.addf %41, %42 : vector<2x8x8xf32>
    %cst_20 = arith.constant dense<0xFF800000> : vector<2x8xf32>
    %44 = vector.multi_reduction <maximumf>, %43, %cst_20 [2] : vector<2x8x8xf32> to vector<2x8xf32>
    %45 = vector.shape_cast %44 : vector<2x8xf32> to vector<2x8x1xf32>
    %46 = vector.broadcast %45 : vector<2x8x1xf32> to vector<2x8x8xf32>
    %47 = arith.subf %43, %46 : vector<2x8x8xf32>
    %48 = math.exp %47 : vector<2x8x8xf32>
    %cst_21 = arith.constant dense<0.000000e+00> : vector<2x8xf32>
    %49 = vector.multi_reduction <add>, %48, %cst_21 [2] : vector<2x8x8xf32> to vector<2x8xf32>
    %50 = vector.shape_cast %49 : vector<2x8xf32> to vector<2x8x1xf32>
    %51 = tpu.reciprocal %50 {approx = true} : vector<2x8x1xf32> -> vector<2x8x1xf32>
    %52 = vector.broadcast %51 : vector<2x8x1xf32> to vector<2x8x8xf32>
    %53 = arith.mulf %48, %52 : vector<2x8x8xf32>
    %54 = arith.truncf %53 : vector<2x8x8xf32> to vector<2x8x8xbf16>
    %55 = vector.extract_strided_slice %38 {offsets = [0, 0, 0], sizes = [2, 8, 32], strides = [1, 1, 1]} : vector<2x8x128xbf16> to vector<2x8x32xbf16>
    "tpu.trace_start"() <{level = 10 : i32, message = "bqk,bkd->bqd"}> : () -> ()
    %cst_22 = arith.constant dense<0.000000e+00> : vector<2x8x32xf32>
    %56 = tpu.matmul %54, %55, %cst_22 {dimension_numbers = #tpu.dot_dimension_numbers<[2], [1], [1], [2], [0, 0, 0, 1, 1, 2], [0], [0]>} : vector<2x8x8xbf16>, vector<2x8x32xbf16>, vector<2x8x32xf32> -> vector<2x8x32xf32>
    "tpu.trace_stop"() : () -> ()
    %57 = vector.shape_cast %56 : vector<2x8x32xf32> to vector<16x32xf32>
    %58 = arith.truncf %57 : vector<16x32xf32> to vector<16x32xbf16>
    %c0_23 = arith.constant 0 : index
    %c0_24 = arith.constant 0 : index
    %59 = vector.load %arg17[%c0_23, %c0_24] : memref<16x128xbf16, #tpu.memory_space<vmem>>, vector<16x32xbf16>
    tpu.vector_store %arg17[%c0_23, %c0_24], %58 {strides = array<i32>} : memref<16x128xbf16, #tpu.memory_space<vmem>>, vector<16x32xbf16>,
    %60 = vector.extract_strided_slice %34 {offsets = [0, 0, 32], sizes = [2, 8, 32], strides = [1, 1, 1]} : vector<2x8x128xbf16> to vector<2x8x32xbf16>
    %61 = vector.extract_strided_slice %36 {offsets = [0, 0, 32], sizes = [2, 8, 32], strides = [1, 1, 1]} : vector<2x8x128xbf16> to vector<2x8x32xbf16>
    "tpu.trace_start"() <{level = 10 : i32, message = "bqd,bkd->bqk"}> : () -> ()
    %cst_25 = arith.constant dense<0.000000e+00> : vector<2x8x8xf32>
    %62 = tpu.matmul %60, %61, %cst_25 {dimension_numbers = #tpu.dot_dimension_numbers<[2], [2], [1], [1], [0, 0, 0, 1, 1, 1], [0], [0]>} : vector<2x8x32xbf16>, vector<2x8x32xbf16>, vector<2x8x8xf32> -> vector<2x8x8xf32>
    "tpu.trace_stop"() : () -> ()
    %63 = vector.broadcast %0 : vector<2x1x8xf32> to vector<2x8x8xf32>
    %64 = arith.addf %62, %63 : vector<2x8x8xf32>
    %cst_26 = arith.constant dense<0xFF800000> : vector<2x8xf32>
    %65 = vector.multi_reduction <maximumf>, %64, %cst_26 [2] : vector<2x8x8xf32> to vector<2x8xf32>
    %66 = vector.shape_cast %65 : vector<2x8xf32> to vector<2x8x1xf32>
    %67 = vector.broadcast %66 : vector<2x8x1xf32> to vector<2x8x8xf32>
    %68 = arith.subf %64, %67 : vector<2x8x8xf32>
    %69 = math.exp %68 : vector<2x8x8xf32>
    %cst_27 = arith.constant dense<0.000000e+00> : vector<2x8xf32>
    %70 = vector.multi_reduction <add>, %69, %cst_27 [2] : vector<2x8x8xf32> to vector<2x8xf32>
    %71 = vector.shape_cast %70 : vector<2x8xf32> to vector<2x8x1xf32>
    %72 = tpu.reciprocal %71 {approx = true} : vector<2x8x1xf32> -> vector<2x8x1xf32>
    %73 = vector.broadcast %72 : vector<2x8x1xf32> to vector<2x8x8xf32>
    %74 = arith.mulf %69, %73 : vector<2x8x8xf32>
    %75 = arith.truncf %74 : vector<2x8x8xf32> to vector<2x8x8xbf16>
    %76 = vector.extract_strided_slice %38 {offsets = [0, 0, 32], sizes = [2, 8, 32], strides = [1, 1, 1]} : vector<2x8x128xbf16> to vector<2x8x32xbf16>
    "tpu.trace_start"() <{level = 10 : i32, message = "bqk,bkd->bqd"}> : () -> ()
    %cst_28 = arith.constant dense<0.000000e+00> : vector<2x8x32xf32>
    %77 = tpu.matmul %75, %76, %cst_28 {dimension_numbers = #tpu.dot_dimension_numbers<[2], [1], [1], [2], [0, 0, 0, 1, 1, 2], [0], [0]>} : vector<2x8x8xbf16>, vector<2x8x32xbf16>, vector<2x8x32xf32> -> vector<2x8x32xf32>
    "tpu.trace_stop"() : () -> ()
    %78 = vector.shape_cast %77 : vector<2x8x32xf32> to vector<16x32xf32>
    %79 = arith.truncf %78 : vector<16x32xf32> to vector<16x32xbf16>
    %c0_29 = arith.constant 0 : index
    %c32 = arith.constant 32 : index
    %80 = vector.load %arg17[%c0_29, %c32] : memref<16x128xbf16, #tpu.memory_space<vmem>>, vector<16x32xbf16>
    tpu.vector_store %arg17[%c0_29, %c32], %79 {strides = array<i32>} : memref<16x128xbf16, #tpu.memory_space<vmem>>, vector<16x32xbf16>,
    %81 = vector.extract_strided_slice %34 {offsets = [0, 0, 64], sizes = [2, 8, 32], strides = [1, 1, 1]} : vector<2x8x128xbf16> to vector<2x8x32xbf16>
    %82 = vector.extract_strided_slice %36 {offsets = [0, 0, 64], sizes = [2, 8, 32], strides = [1, 1, 1]} : vector<2x8x128xbf16> to vector<2x8x32xbf16>
    "tpu.trace_start"() <{level = 10 : i32, message = "bqd,bkd->bqk"}> : () -> ()
    %cst_30 = arith.constant dense<0.000000e+00> : vector<2x8x8xf32>
    %83 = tpu.matmul %81, %82, %cst_30 {dimension_numbers = #tpu.dot_dimension_numbers<[2], [2], [1], [1], [0, 0, 0, 1, 1, 1], [0], [0]>} : vector<2x8x32xbf16>, vector<2x8x32xbf16>, vector<2x8x8xf32> -> vector<2x8x8xf32>
    "tpu.trace_stop"() : () -> ()
    %84 = vector.broadcast %0 : vector<2x1x8xf32> to vector<2x8x8xf32>
    %85 = arith.addf %83, %84 : vector<2x8x8xf32>
    %cst_31 = arith.constant dense<0xFF800000> : vector<2x8xf32>
    %86 = vector.multi_reduction <maximumf>, %85, %cst_31 [2] : vector<2x8x8xf32> to vector<2x8xf32>
    %87 = vector.shape_cast %86 : vector<2x8xf32> to vector<2x8x1xf32>
    %88 = vector.broadcast %87 : vector<2x8x1xf32> to vector<2x8x8xf32>
    %89 = arith.subf %85, %88 : vector<2x8x8xf32>
    %90 = math.exp %89 : vector<2x8x8xf32>
    %cst_32 = arith.constant dense<0.000000e+00> : vector<2x8xf32>
    %91 = vector.multi_reduction <add>, %90, %cst_32 [2] : vector<2x8x8xf32> to vector<2x8xf32>
    %92 = vector.shape_cast %91 : vector<2x8xf32> to vector<2x8x1xf32>
    %93 = tpu.reciprocal %92 {approx = true} : vector<2x8x1xf32> -> vector<2x8x1xf32>
    %94 = vector.broadcast %93 : vector<2x8x1xf32> to vector<2x8x8xf32>
    %95 = arith.mulf %90, %94 : vector<2x8x8xf32>
    %96 = arith.truncf %95 : vector<2x8x8xf32> to vector<2x8x8xbf16>
    %97 = vector.extract_strided_slice %38 {offsets = [0, 0, 64], sizes = [2, 8, 32], strides = [1, 1, 1]} : vector<2x8x128xbf16> to vector<2x8x32xbf16>
    "tpu.trace_start"() <{level = 10 : i32, message = "bqk,bkd->bqd"}> : () -> ()
    %cst_33 = arith.constant dense<0.000000e+00> : vector<2x8x32xf32>
    %98 = tpu.matmul %96, %97, %cst_33 {dimension_numbers = #tpu.dot_dimension_numbers<[2], [1], [1], [2], [0, 0, 0, 1, 1, 2], [0], [0]>} : vector<2x8x8xbf16>, vector<2x8x32xbf16>, vector<2x8x32xf32> -> vector<2x8x32xf32>
    "tpu.trace_stop"() : () -> ()
    %99 = vector.shape_cast %98 : vector<2x8x32xf32> to vector<16x32xf32>
    %100 = arith.truncf %99 : vector<16x32xf32> to vector<16x32xbf16>
    %c0_34 = arith.constant 0 : index
    %c64 = arith.constant 64 : index
    %101 = vector.load %arg17[%c0_34, %c64] : memref<16x128xbf16, #tpu.memory_space<vmem>>, vector<16x32xbf16>
    tpu.vector_store %arg17[%c0_34, %c64], %100 {strides = array<i32>} : memref<16x128xbf16, #tpu.memory_space<vmem>>, vector<16x32xbf16>,
    %102 = vector.extract_strided_slice %34 {offsets = [0, 0, 96], sizes = [2, 8, 32], strides = [1, 1, 1]} : vector<2x8x128xbf16> to vector<2x8x32xbf16>
    %103 = vector.extract_strided_slice %36 {offsets = [0, 0, 96], sizes = [2, 8, 32], strides = [1, 1, 1]} : vector<2x8x128xbf16> to vector<2x8x32xbf16>
    "tpu.trace_start"() <{level = 10 : i32, message = "bqd,bkd->bqk"}> : () -> ()
    %cst_35 = arith.constant dense<0.000000e+00> : vector<2x8x8xf32>
    %104 = tpu.matmul %102, %103, %cst_35 {dimension_numbers = #tpu.dot_dimension_numbers<[2], [2], [1], [1], [0, 0, 0, 1, 1, 1], [0], [0]>} : vector<2x8x32xbf16>, vector<2x8x32xbf16>, vector<2x8x8xf32> -> vector<2x8x8xf32>
    "tpu.trace_stop"() : () -> ()
    %105 = vector.broadcast %0 : vector<2x1x8xf32> to vector<2x8x8xf32>
    %106 = arith.addf %104, %105 : vector<2x8x8xf32>
    %cst_36 = arith.constant dense<0xFF800000> : vector<2x8xf32>
    %107 = vector.multi_reduction <maximumf>, %106, %cst_36 [2] : vector<2x8x8xf32> to vector<2x8xf32>
    %108 = vector.shape_cast %107 : vector<2x8xf32> to vector<2x8x1xf32>
    %109 = vector.broadcast %108 : vector<2x8x1xf32> to vector<2x8x8xf32>
    %110 = arith.subf %106, %109 : vector<2x8x8xf32>
    %111 = math.exp %110 : vector<2x8x8xf32>
    %cst_37 = arith.constant dense<0.000000e+00> : vector<2x8xf32>
    %112 = vector.multi_reduction <add>, %111, %cst_37 [2] : vector<2x8x8xf32> to vector<2x8xf32>
    %113 = vector.shape_cast %112 : vector<2x8xf32> to vector<2x8x1xf32>
    %114 = tpu.reciprocal %113 {approx = true} : vector<2x8x1xf32> -> vector<2x8x1xf32>
    %115 = vector.broadcast %114 : vector<2x8x1xf32> to vector<2x8x8xf32>
    %116 = arith.mulf %111, %115 : vector<2x8x8xf32>
    %117 = arith.truncf %116 : vector<2x8x8xf32> to vector<2x8x8xbf16>
    %118 = vector.extract_strided_slice %38 {offsets = [0, 0, 96], sizes = [2, 8, 32], strides = [1, 1, 1]} : vector<2x8x128xbf16> to vector<2x8x32xbf16>
    "tpu.trace_start"() <{level = 10 : i32, message = "bqk,bkd->bqd"}> : () -> ()
    %cst_38 = arith.constant dense<0.000000e+00> : vector<2x8x32xf32>
    %119 = tpu.matmul %117, %118, %cst_38 {dimension_numbers = #tpu.dot_dimension_numbers<[2], [1], [1], [2], [0, 0, 0, 1, 1, 2], [0], [0]>} : vector<2x8x8xbf16>, vector<2x8x32xbf16>, vector<2x8x32xf32> -> vector<2x8x32xf32>
    "tpu.trace_stop"() : () -> ()
    %120 = vector.shape_cast %119 : vector<2x8x32xf32> to vector<16x32xf32>
    %121 = arith.truncf %120 : vector<16x32xf32> to vector<16x32xbf16>
    %c0_39 = arith.constant 0 : index
    %c96 = arith.constant 96 : index
    %122 = vector.load %arg17[%c0_39, %c96] : memref<16x128xbf16, #tpu.memory_space<vmem>>, vector<16x32xbf16>
    tpu.vector_store %arg17[%c0_39, %c96], %121 {strides = array<i32>} : memref<16x128xbf16, #tpu.memory_space<vmem>>, vector<16x32xbf16>,
    %c0_40 = arith.constant 0 : index
    %c0_41 = arith.constant 0 : index
    %123 = vector.load %arg17[%c0_40, %c0_41] : memref<16x128xbf16, #tpu.memory_space<vmem>>, vector<16x128xbf16>
    %c0_42 = arith.constant 0 : index
    %c0_43 = arith.constant 0 : index
    %c0_44 = arith.constant 0 : index
    %124 = vector.load %arg6[%c0_42, %c0_43, %c0_44] : memref<2x128x128xbf16, #tpu.memory_space<vmem>>, vector<1x128x128xbf16>
    %125 = vector.shape_cast %124 : vector<1x128x128xbf16> to vector<128x128xbf16>
    %cst_45 = arith.constant dense<0.000000e+00> : vector<16x128xf32>
    %126 = tpu.matmul %123, %125, %cst_45 {dimension_numbers = #tpu.dot_dimension_numbers<[1], [0], [0], [1], [0, 0, 1, 1], [], []>} : vector<16x128xbf16>, vector<128x128xbf16>, vector<16x128xf32> -> vector<16x128xf32>
    %c0_46 = arith.constant 0 : index
    %c0_47 = arith.constant 0 : index
    %c0_48 = arith.constant 0 : index
    %127 = vector.load %arg7[%c0_46, %c0_47, %c0_48] : memref<2x1x128xf32, #tpu.memory_space<vmem>>, vector<1x1x128xf32>
    %128 = vector.shape_cast %127 : vector<1x1x128xf32> to vector<1x128xf32>
    %129 = vector.broadcast %128 : vector<1x128xf32> to vector<16x128xf32>
    %130 = arith.addf %126, %129 : vector<16x128xf32>
    %131 = arith.addf %130, %23 : vector<16x128xf32>
    %c0_49 = arith.constant 0 : index
    %c0_50 = arith.constant 0 : index
    %c0_51 = arith.constant 0 : index
    %132 = vector.load %arg8[%c0_49, %c0_50, %c0_51] : memref<2x1x128xf32, #tpu.memory_space<vmem>>, vector<1x1x128xf32>
    %133 = vector.shape_cast %132 : vector<1x1x128xf32> to vector<1x128xf32>
    %c0_52 = arith.constant 0 : index
    %c0_53 = arith.constant 0 : index
    %c0_54 = arith.constant 0 : index
    %134 = vector.load %arg9[%c0_52, %c0_53, %c0_54] : memref<2x1x128xf32, #tpu.memory_space<vmem>>, vector<1x1x128xf32>
    %135 = vector.shape_cast %134 : vector<1x1x128xf32> to vector<1x128xf32>
    %cst_55 = arith.constant dense<0.000000e+00> : vector<16xf32>
    %136 = vector.multi_reduction <add>, %131, %cst_55 [1] : vector<16x128xf32> to vector<16xf32>
    %137 = vector.shape_cast %136 : vector<16xf32> to vector<16x1xf32>
    %cst_56 = arith.constant 1.280000e+02 : f32
    %138 = vector.broadcast %cst_56 : f32 to vector<16x1xf32>
    %139 = arith.divf %137, %138 : vector<16x1xf32>
    %140 = vector.broadcast %139 : vector<16x1xf32> to vector<16x128xf32>
    %141 = arith.subf %131, %140 : vector<16x128xf32>
    %142 = arith.mulf %141, %141 : vector<16x128xf32>
    %cst_57 = arith.constant dense<0.000000e+00> : vector<16xf32>
    %143 = vector.multi_reduction <add>, %142, %cst_57 [1] : vector<16x128xf32> to vector<16xf32>
    %144 = vector.shape_cast %143 : vector<16xf32> to vector<16x1xf32>
    %cst_58 = arith.constant 1.280000e+02 : f32
    %145 = vector.broadcast %cst_58 : f32 to vector<16x1xf32>
    %146 = arith.divf %144, %145 : vector<16x1xf32>
    %cst_59 = arith.constant 9.99999996E-13 : f32
    %147 = vector.broadcast %cst_59 : f32 to vector<16x1xf32>
    %148 = arith.addf %146, %147 : vector<16x1xf32>
    %149 = math.rsqrt %148 : vector<16x1xf32>
    %150 = vector.broadcast %149 : vector<16x1xf32> to vector<16x128xf32>
    %151 = arith.mulf %141, %150 : vector<16x128xf32>
    %152 = vector.broadcast %133 : vector<1x128xf32> to vector<16x128xf32>
    %153 = arith.mulf %151, %152 : vector<16x128xf32>
    %154 = vector.broadcast %135 : vector<1x128xf32> to vector<16x128xf32>
    %155 = arith.addf %153, %154 : vector<16x128xf32>
    %156 = arith.truncf %155 : vector<16x128xf32> to vector<16x128xbf16>
    %c0_60 = arith.constant 0 : index
    %c0_61 = arith.constant 0 : index
    %c0_62 = arith.constant 0 : index
    %157 = vector.load %arg10[%c0_60, %c0_61, %c0_62] : memref<2x128x256xbf16, #tpu.memory_space<vmem>>, vector<1x128x256xbf16>
    %158 = vector.shape_cast %157 : vector<1x128x256xbf16> to vector<128x256xbf16>
    %cst_63 = arith.constant dense<0.000000e+00> : vector<16x256xf32>
    %159 = tpu.matmul %156, %158, %cst_63 {dimension_numbers = #tpu.dot_dimension_numbers<[1], [0], [0], [1], [0, 0, 1, 1], [], []>} : vector<16x128xbf16>, vector<128x256xbf16>, vector<16x256xf32> -> vector<16x256xf32>
    %c0_64 = arith.constant 0 : index
    %c0_65 = arith.constant 0 : index
    %c0_66 = arith.constant 0 : index
    %160 = vector.load %arg11[%c0_64, %c0_65, %c0_66] : memref<2x1x256xf32, #tpu.memory_space<vmem>>, vector<1x1x256xf32>
    %161 = vector.shape_cast %160 : vector<1x1x256xf32> to vector<1x256xf32>
    %162 = vector.broadcast %161 : vector<1x256xf32> to vector<16x256xf32>
    %163 = arith.addf %159, %162 : vector<16x256xf32>
    %164 = arith.mulf %163, %163 : vector<16x256xf32>
    %165 = arith.mulf %163, %164 : vector<16x256xf32>
    %cst_67 = arith.constant 4.471500e-02 : f32
    %166 = vector.broadcast %cst_67 : f32 to vector<16x256xf32>
    %167 = arith.mulf %166, %165 : vector<16x256xf32>
    %168 = arith.addf %163, %167 : vector<16x256xf32>
    %cst_68 = arith.constant 0.797884583 : f32
    %169 = vector.broadcast %cst_68 : f32 to vector<16x256xf32>
    %170 = arith.mulf %169, %168 : vector<16x256xf32>
    %171 = math.tanh %170 : vector<16x256xf32>
    %cst_69 = arith.constant 1.000000e+00 : f32
    %172 = vector.broadcast %cst_69 : f32 to vector<16x256xf32>
    %173 = arith.addf %172, %171 : vector<16x256xf32>
    %cst_70 = arith.constant 5.000000e-01 : f32
    %174 = vector.broadcast %cst_70 : f32 to vector<16x256xf32>
    %175 = arith.mulf %174, %173 : vector<16x256xf32>
    %176 = arith.mulf %163, %175 : vector<16x256xf32>
    %177 = arith.truncf %176 : vector<16x256xf32> to vector<16x256xbf16>
    %c0_71 = arith.constant 0 : index
    %c0_72 = arith.constant 0 : index
    %c0_73 = arith.constant 0 : index
    %178 = vector.load %arg12[%c0_71, %c0_72, %c0_73] : memref<2x256x128xbf16, #tpu.memory_space<vmem>>, vector<1x256x128xbf16>
    %179 = vector.shape_cast %178 : vector<1x256x128xbf16> to vector<256x128xbf16>
    %cst_74 = arith.constant dense<0.000000e+00> : vector<16x128xf32>
    %180 = tpu.matmul %177, %179, %cst_74 {dimension_numbers = #tpu.dot_dimension_numbers<[1], [0], [0], [1], [0, 0, 1, 1], [], []>} : vector<16x256xbf16>, vector<256x128xbf16>, vector<16x128xf32> -> vector<16x128xf32>
    %c0_75 = arith.constant 0 : index
    %c0_76 = arith.constant 0 : index
    %c0_77 = arith.constant 0 : index
    %181 = vector.load %arg13[%c0_75, %c0_76, %c0_77] : memref<2x1x128xf32, #tpu.memory_space<vmem>>, vector<1x1x128xf32>
    %182 = vector.shape_cast %181 : vector<1x1x128xf32> to vector<1x128xf32>
    %183 = vector.broadcast %182 : vector<1x128xf32> to vector<16x128xf32>
    %184 = arith.addf %180, %183 : vector<16x128xf32>
    %185 = arith.addf %184, %155 : vector<16x128xf32>
    %c0_78 = arith.constant 0 : index
    %c0_79 = arith.constant 0 : index
    %c0_80 = arith.constant 0 : index
    %186 = vector.load %arg14[%c0_78, %c0_79, %c0_80] : memref<2x1x128xf32, #tpu.memory_space<vmem>>, vector<1x1x128xf32>
    %187 = vector.shape_cast %186 : vector<1x1x128xf32> to vector<1x128xf32>
    %c0_81 = arith.constant 0 : index
    %c0_82 = arith.constant 0 : index
    %c0_83 = arith.constant 0 : index
    %188 = vector.load %arg15[%c0_81, %c0_82, %c0_83] : memref<2x1x128xf32, #tpu.memory_space<vmem>>, vector<1x1x128xf32>
    %189 = vector.shape_cast %188 : vector<1x1x128xf32> to vector<1x128xf32>
    %cst_84 = arith.constant dense<0.000000e+00> : vector<16xf32>
    %190 = vector.multi_reduction <add>, %185, %cst_84 [1] : vector<16x128xf32> to vector<16xf32>
    %191 = vector.shape_cast %190 : vector<16xf32> to vector<16x1xf32>
    %cst_85 = arith.constant 1.280000e+02 : f32
    %192 = vector.broadcast %cst_85 : f32 to vector<16x1xf32>
    %193 = arith.divf %191, %192 : vector<16x1xf32>
    %194 = vector.broadcast %193 : vector<16x1xf32> to vector<16x128xf32>
    %195 = arith.subf %185, %194 : vector<16x128xf32>
    %196 = arith.mulf %195, %195 : vector<16x128xf32>
    %cst_86 = arith.constant dense<0.000000e+00> : vector<16xf32>
    %197 = vector.multi_reduction <add>, %196, %cst_86 [1] : vector<16x128xf32> to vector<16xf32>
    %198 = vector.shape_cast %197 : vector<16xf32> to vector<16x1xf32>
    %cst_87 = arith.constant 1.280000e+02 : f32
    %199 = vector.broadcast %cst_87 : f32 to vector<16x1xf32>
    %200 = arith.divf %198, %199 : vector<16x1xf32>
    %cst_88 = arith.constant 9.99999996E-13 : f32
    %201 = vector.broadcast %cst_88 : f32 to vector<16x1xf32>
    %202 = arith.addf %200, %201 : vector<16x1xf32>
    %203 = math.rsqrt %202 : vector<16x1xf32>
    %204 = vector.broadcast %203 : vector<16x1xf32> to vector<16x128xf32>
    %205 = arith.mulf %195, %204 : vector<16x128xf32>
    %206 = vector.broadcast %187 : vector<1x128xf32> to vector<16x128xf32>
    %207 = arith.mulf %205, %206 : vector<16x128xf32>
    %208 = vector.broadcast %189 : vector<1x128xf32> to vector<16x128xf32>
    %209 = arith.addf %207, %208 : vector<16x128xf32>
    %210 = arith.truncf %209 : vector<16x128xf32> to vector<16x128xbf16>
    %c1 = arith.constant 1 : index
    %c0_89 = arith.constant 0 : index
    %c0_90 = arith.constant 0 : index
    %211 = vector.load %arg4[%c1, %c0_89, %c0_90] : memref<2x128x384xbf16, #tpu.memory_space<vmem>>, vector<1x128x384xbf16>
    %212 = vector.shape_cast %211 : vector<1x128x384xbf16> to vector<128x384xbf16>
    %cst_91 = arith.constant dense<0.000000e+00> : vector<16x384xf32>
    %213 = tpu.matmul %210, %212, %cst_91 {dimension_numbers = #tpu.dot_dimension_numbers<[1], [0], [0], [1], [0, 0, 1, 1], [], []>} : vector<16x128xbf16>, vector<128x384xbf16>, vector<16x384xf32> -> vector<16x384xf32>
    %c1_92 = arith.constant 1 : index
    %c0_93 = arith.constant 0 : index
    %c0_94 = arith.constant 0 : index
    %214 = vector.load %arg5[%c1_92, %c0_93, %c0_94] : memref<2x1x384xf32, #tpu.memory_space<vmem>>, vector<1x1x384xf32>
    %215 = vector.shape_cast %214 : vector<1x1x384xf32> to vector<1x384xf32>
    %216 = vector.broadcast %215 : vector<1x384xf32> to vector<16x384xf32>
    %217 = arith.addf %213, %216 : vector<16x384xf32>
    %218 = arith.truncf %217 : vector<16x384xf32> to vector<16x384xbf16>
    %219 = vector.extract_strided_slice %218 {offsets = [0, 0], sizes = [16, 128], strides = [1, 1]} : vector<16x384xbf16> to vector<16x128xbf16>
    %220 = vector.shape_cast %219 : vector<16x128xbf16> to vector<2x8x128xbf16>
    %221 = vector.extract_strided_slice %218 {offsets = [0, 128], sizes = [16, 128], strides = [1, 1]} : vector<16x384xbf16> to vector<16x128xbf16>
    %222 = vector.shape_cast %221 : vector<16x128xbf16> to vector<2x8x128xbf16>
    %223 = vector.extract_strided_slice %218 {offsets = [0, 256], sizes = [16, 128], strides = [1, 1]} : vector<16x384xbf16> to vector<16x128xbf16>
    %224 = vector.shape_cast %223 : vector<16x128xbf16> to vector<2x8x128xbf16>
    %225 = vector.extract_strided_slice %220 {offsets = [0, 0, 0], sizes = [2, 8, 32], strides = [1, 1, 1]} : vector<2x8x128xbf16> to vector<2x8x32xbf16>
    %226 = vector.extract_strided_slice %222 {offsets = [0, 0, 0], sizes = [2, 8, 32], strides = [1, 1, 1]} : vector<2x8x128xbf16> to vector<2x8x32xbf16>
    "tpu.trace_start"() <{level = 10 : i32, message = "bqd,bkd->bqk"}> : () -> ()
    %cst_95 = arith.constant dense<0.000000e+00> : vector<2x8x8xf32>
    %227 = tpu.matmul %225, %226, %cst_95 {dimension_numbers = #tpu.dot_dimension_numbers<[2], [2], [1], [1], [0, 0, 0, 1, 1, 1], [0], [0]>} : vector<2x8x32xbf16>, vector<2x8x32xbf16>, vector<2x8x8xf32> -> vector<2x8x8xf32>
    "tpu.trace_stop"() : () -> ()
    %228 = vector.broadcast %0 : vector<2x1x8xf32> to vector<2x8x8xf32>
    %229 = arith.addf %227, %228 : vector<2x8x8xf32>
    %cst_96 = arith.constant dense<0xFF800000> : vector<2x8xf32>
    %230 = vector.multi_reduction <maximumf>, %229, %cst_96 [2] : vector<2x8x8xf32> to vector<2x8xf32>
    %231 = vector.shape_cast %230 : vector<2x8xf32> to vector<2x8x1xf32>
    %232 = vector.broadcast %231 : vector<2x8x1xf32> to vector<2x8x8xf32>
    %233 = arith.subf %229, %232 : vector<2x8x8xf32>
    %234 = math.exp %233 : vector<2x8x8xf32>
    %cst_97 = arith.constant dense<0.000000e+00> : vector<2x8xf32>
    %235 = vector.multi_reduction <add>, %234, %cst_97 [2] : vector<2x8x8xf32> to vector<2x8xf32>
    %236 = vector.shape_cast %235 : vector<2x8xf32> to vector<2x8x1xf32>
    %237 = tpu.reciprocal %236 {approx = true} : vector<2x8x1xf32> -> vector<2x8x1xf32>
    %238 = vector.broadcast %237 : vector<2x8x1xf32> to vector<2x8x8xf32>
    %239 = arith.mulf %234, %238 : vector<2x8x8xf32>
    %240 = arith.truncf %239 : vector<2x8x8xf32> to vector<2x8x8xbf16>
    %241 = vector.extract_strided_slice %224 {offsets = [0, 0, 0], sizes = [2, 8, 32], strides = [1, 1, 1]} : vector<2x8x128xbf16> to vector<2x8x32xbf16>
    "tpu.trace_start"() <{level = 10 : i32, message = "bqk,bkd->bqd"}> : () -> ()
    %cst_98 = arith.constant dense<0.000000e+00> : vector<2x8x32xf32>
    %242 = tpu.matmul %240, %241, %cst_98 {dimension_numbers = #tpu.dot_dimension_numbers<[2], [1], [1], [2], [0, 0, 0, 1, 1, 2], [0], [0]>} : vector<2x8x8xbf16>, vector<2x8x32xbf16>, vector<2x8x32xf32> -> vector<2x8x32xf32>
    "tpu.trace_stop"() : () -> ()
    %243 = vector.shape_cast %242 : vector<2x8x32xf32> to vector<16x32xf32>
    %244 = arith.truncf %243 : vector<16x32xf32> to vector<16x32xbf16>
    %c0_99 = arith.constant 0 : index
    %c0_100 = arith.constant 0 : index
    %245 = vector.load %arg17[%c0_99, %c0_100] : memref<16x128xbf16, #tpu.memory_space<vmem>>, vector<16x32xbf16>
    tpu.vector_store %arg17[%c0_99, %c0_100], %244 {strides = array<i32>} : memref<16x128xbf16, #tpu.memory_space<vmem>>, vector<16x32xbf16>,
    %246 = vector.extract_strided_slice %220 {offsets = [0, 0, 32], sizes = [2, 8, 32], strides = [1, 1, 1]} : vector<2x8x128xbf16> to vector<2x8x32xbf16>
    %247 = vector.extract_strided_slice %222 {offsets = [0, 0, 32], sizes = [2, 8, 32], strides = [1, 1, 1]} : vector<2x8x128xbf16> to vector<2x8x32xbf16>
    "tpu.trace_start"() <{level = 10 : i32, message = "bqd,bkd->bqk"}> : () -> ()
    %cst_101 = arith.constant dense<0.000000e+00> : vector<2x8x8xf32>
    %248 = tpu.matmul %246, %247, %cst_101 {dimension_numbers = #tpu.dot_dimension_numbers<[2], [2], [1], [1], [0, 0, 0, 1, 1, 1], [0], [0]>} : vector<2x8x32xbf16>, vector<2x8x32xbf16>, vector<2x8x8xf32> -> vector<2x8x8xf32>
    "tpu.trace_stop"() : () -> ()
    %249 = vector.broadcast %0 : vector<2x1x8xf32> to vector<2x8x8xf32>
    %250 = arith.addf %248, %249 : vector<2x8x8xf32>
    %cst_102 = arith.constant dense<0xFF800000> : vector<2x8xf32>
    %251 = vector.multi_reduction <maximumf>, %250, %cst_102 [2] : vector<2x8x8xf32> to vector<2x8xf32>
    %252 = vector.shape_cast %251 : vector<2x8xf32> to vector<2x8x1xf32>
    %253 = vector.broadcast %252 : vector<2x8x1xf32> to vector<2x8x8xf32>
    %254 = arith.subf %250, %253 : vector<2x8x8xf32>
    %255 = math.exp %254 : vector<2x8x8xf32>
    %cst_103 = arith.constant dense<0.000000e+00> : vector<2x8xf32>
    %256 = vector.multi_reduction <add>, %255, %cst_103 [2] : vector<2x8x8xf32> to vector<2x8xf32>
    %257 = vector.shape_cast %256 : vector<2x8xf32> to vector<2x8x1xf32>
    %258 = tpu.reciprocal %257 {approx = true} : vector<2x8x1xf32> -> vector<2x8x1xf32>
    %259 = vector.broadcast %258 : vector<2x8x1xf32> to vector<2x8x8xf32>
    %260 = arith.mulf %255, %259 : vector<2x8x8xf32>
    %261 = arith.truncf %260 : vector<2x8x8xf32> to vector<2x8x8xbf16>
    %262 = vector.extract_strided_slice %224 {offsets = [0, 0, 32], sizes = [2, 8, 32], strides = [1, 1, 1]} : vector<2x8x128xbf16> to vector<2x8x32xbf16>
    "tpu.trace_start"() <{level = 10 : i32, message = "bqk,bkd->bqd"}> : () -> ()
    %cst_104 = arith.constant dense<0.000000e+00> : vector<2x8x32xf32>
    %263 = tpu.matmul %261, %262, %cst_104 {dimension_numbers = #tpu.dot_dimension_numbers<[2], [1], [1], [2], [0, 0, 0, 1, 1, 2], [0], [0]>} : vector<2x8x8xbf16>, vector<2x8x32xbf16>, vector<2x8x32xf32> -> vector<2x8x32xf32>
    "tpu.trace_stop"() : () -> ()
    %264 = vector.shape_cast %263 : vector<2x8x32xf32> to vector<16x32xf32>
    %265 = arith.truncf %264 : vector<16x32xf32> to vector<16x32xbf16>
    %c0_105 = arith.constant 0 : index
    %c32_106 = arith.constant 32 : index
    %266 = vector.load %arg17[%c0_105, %c32_106] : memref<16x128xbf16, #tpu.memory_space<vmem>>, vector<16x32xbf16>
    tpu.vector_store %arg17[%c0_105, %c32_106], %265 {strides = array<i32>} : memref<16x128xbf16, #tpu.memory_space<vmem>>, vector<16x32xbf16>,
    %267 = vector.extract_strided_slice %220 {offsets = [0, 0, 64], sizes = [2, 8, 32], strides = [1, 1, 1]} : vector<2x8x128xbf16> to vector<2x8x32xbf16>
    %268 = vector.extract_strided_slice %222 {offsets = [0, 0, 64], sizes = [2, 8, 32], strides = [1, 1, 1]} : vector<2x8x128xbf16> to vector<2x8x32xbf16>
    "tpu.trace_start"() <{level = 10 : i32, message = "bqd,bkd->bqk"}> : () -> ()
    %cst_107 = arith.constant dense<0.000000e+00> : vector<2x8x8xf32>
    %269 = tpu.matmul %267, %268, %cst_107 {dimension_numbers = #tpu.dot_dimension_numbers<[2], [2], [1], [1], [0, 0, 0, 1, 1, 1], [0], [0]>} : vector<2x8x32xbf16>, vector<2x8x32xbf16>, vector<2x8x8xf32> -> vector<2x8x8xf32>
    "tpu.trace_stop"() : () -> ()
    %270 = vector.broadcast %0 : vector<2x1x8xf32> to vector<2x8x8xf32>
    %271 = arith.addf %269, %270 : vector<2x8x8xf32>
    %cst_108 = arith.constant dense<0xFF800000> : vector<2x8xf32>
    %272 = vector.multi_reduction <maximumf>, %271, %cst_108 [2] : vector<2x8x8xf32> to vector<2x8xf32>
    %273 = vector.shape_cast %272 : vector<2x8xf32> to vector<2x8x1xf32>
    %274 = vector.broadcast %273 : vector<2x8x1xf32> to vector<2x8x8xf32>
    %275 = arith.subf %271, %274 : vector<2x8x8xf32>
    %276 = math.exp %275 : vector<2x8x8xf32>
    %cst_109 = arith.constant dense<0.000000e+00> : vector<2x8xf32>
    %277 = vector.multi_reduction <add>, %276, %cst_109 [2] : vector<2x8x8xf32> to vector<2x8xf32>
    %278 = vector.shape_cast %277 : vector<2x8xf32> to vector<2x8x1xf32>
    %279 = tpu.reciprocal %278 {approx = true} : vector<2x8x1xf32> -> vector<2x8x1xf32>
    %280 = vector.broadcast %279 : vector<2x8x1xf32> to vector<2x8x8xf32>
    %281 = arith.mulf %276, %280 : vector<2x8x8xf32>
    %282 = arith.truncf %281 : vector<2x8x8xf32> to vector<2x8x8xbf16>
    %283 = vector.extract_strided_slice %224 {offsets = [0, 0, 64], sizes = [2, 8, 32], strides = [1, 1, 1]} : vector<2x8x128xbf16> to vector<2x8x32xbf16>
    "tpu.trace_start"() <{level = 10 : i32, message = "bqk,bkd->bqd"}> : () -> ()
    %cst_110 = arith.constant dense<0.000000e+00> : vector<2x8x32xf32>
    %284 = tpu.matmul %282, %283, %cst_110 {dimension_numbers = #tpu.dot_dimension_numbers<[2], [1], [1], [2], [0, 0, 0, 1, 1, 2], [0], [0]>} : vector<2x8x8xbf16>, vector<2x8x32xbf16>, vector<2x8x32xf32> -> vector<2x8x32xf32>
    "tpu.trace_stop"() : () -> ()
    %285 = vector.shape_cast %284 : vector<2x8x32xf32> to vector<16x32xf32>
    %286 = arith.truncf %285 : vector<16x32xf32> to vector<16x32xbf16>
    %c0_111 = arith.constant 0 : index
    %c64_112 = arith.constant 64 : index
    %287 = vector.load %arg17[%c0_111, %c64_112] : memref<16x128xbf16, #tpu.memory_space<vmem>>, vector<16x32xbf16>
    tpu.vector_store %arg17[%c0_111, %c64_112], %286 {strides = array<i32>} : memref<16x128xbf16, #tpu.memory_space<vmem>>, vector<16x32xbf16>,
    %288 = vector.extract_strided_slice %220 {offsets = [0, 0, 96], sizes = [2, 8, 32], strides = [1, 1, 1]} : vector<2x8x128xbf16> to vector<2x8x32xbf16>
    %289 = vector.extract_strided_slice %222 {offsets = [0, 0, 96], sizes = [2, 8, 32], strides = [1, 1, 1]} : vector<2x8x128xbf16> to vector<2x8x32xbf16>
    "tpu.trace_start"() <{level = 10 : i32, message = "bqd,bkd->bqk"}> : () -> ()
    %cst_113 = arith.constant dense<0.000000e+00> : vector<2x8x8xf32>
    %290 = tpu.matmul %288, %289, %cst_113 {dimension_numbers = #tpu.dot_dimension_numbers<[2], [2], [1], [1], [0, 0, 0, 1, 1, 1], [0], [0]>} : vector<2x8x32xbf16>, vector<2x8x32xbf16>, vector<2x8x8xf32> -> vector<2x8x8xf32>
    "tpu.trace_stop"() : () -> ()
    %291 = vector.broadcast %0 : vector<2x1x8xf32> to vector<2x8x8xf32>
    %292 = arith.addf %290, %291 : vector<2x8x8xf32>
    %cst_114 = arith.constant dense<0xFF800000> : vector<2x8xf32>
    %293 = vector.multi_reduction <maximumf>, %292, %cst_114 [2] : vector<2x8x8xf32> to vector<2x8xf32>
    %294 = vector.shape_cast %293 : vector<2x8xf32> to vector<2x8x1xf32>
    %295 = vector.broadcast %294 : vector<2x8x1xf32> to vector<2x8x8xf32>
    %296 = arith.subf %292, %295 : vector<2x8x8xf32>
    %297 = math.exp %296 : vector<2x8x8xf32>
    %cst_115 = arith.constant dense<0.000000e+00> : vector<2x8xf32>
    %298 = vector.multi_reduction <add>, %297, %cst_115 [2] : vector<2x8x8xf32> to vector<2x8xf32>
    %299 = vector.shape_cast %298 : vector<2x8xf32> to vector<2x8x1xf32>
    %300 = tpu.reciprocal %299 {approx = true} : vector<2x8x1xf32> -> vector<2x8x1xf32>
    %301 = vector.broadcast %300 : vector<2x8x1xf32> to vector<2x8x8xf32>
    %302 = arith.mulf %297, %301 : vector<2x8x8xf32>
    %303 = arith.truncf %302 : vector<2x8x8xf32> to vector<2x8x8xbf16>
    %304 = vector.extract_strided_slice %224 {offsets = [0, 0, 96], sizes = [2, 8, 32], strides = [1, 1, 1]} : vector<2x8x128xbf16> to vector<2x8x32xbf16>
    "tpu.trace_start"() <{level = 10 : i32, message = "bqk,bkd->bqd"}> : () -> ()
    %cst_116 = arith.constant dense<0.000000e+00> : vector<2x8x32xf32>
    %305 = tpu.matmul %303, %304, %cst_116 {dimension_numbers = #tpu.dot_dimension_numbers<[2], [1], [1], [2], [0, 0, 0, 1, 1, 2], [0], [0]>} : vector<2x8x8xbf16>, vector<2x8x32xbf16>, vector<2x8x32xf32> -> vector<2x8x32xf32>
    "tpu.trace_stop"() : () -> ()
    %306 = vector.shape_cast %305 : vector<2x8x32xf32> to vector<16x32xf32>
    %307 = arith.truncf %306 : vector<16x32xf32> to vector<16x32xbf16>
    %c0_117 = arith.constant 0 : index
    %c96_118 = arith.constant 96 : index
    %308 = vector.load %arg17[%c0_117, %c96_118] : memref<16x128xbf16, #tpu.memory_space<vmem>>, vector<16x32xbf16>
    tpu.vector_store %arg17[%c0_117, %c96_118], %307 {strides = array<i32>} : memref<16x128xbf16, #tpu.memory_space<vmem>>, vector<16x32xbf16>,
    %c0_119 = arith.constant 0 : index
    %c0_120 = arith.constant 0 : index
    %309 = vector.load %arg17[%c0_119, %c0_120] : memref<16x128xbf16, #tpu.memory_space<vmem>>, vector<16x128xbf16>
    %c1_121 = arith.constant 1 : index
    %c0_122 = arith.constant 0 : index
    %c0_123 = arith.constant 0 : index
    %310 = vector.load %arg6[%c1_121, %c0_122, %c0_123] : memref<2x128x128xbf16, #tpu.memory_space<vmem>>, vector<1x128x128xbf16>
    %311 = vector.shape_cast %310 : vector<1x128x128xbf16> to vector<128x128xbf16>
    %cst_124 = arith.constant dense<0.000000e+00> : vector<16x128xf32>
    %312 = tpu.matmul %309, %311, %cst_124 {dimension_numbers = #tpu.dot_dimension_numbers<[1], [0], [0], [1], [0, 0, 1, 1], [], []>} : vector<16x128xbf16>, vector<128x128xbf16>, vector<16x128xf32> -> vector<16x128xf32>
    %c1_125 = arith.constant 1 : index
    %c0_126 = arith.constant 0 : index
    %c0_127 = arith.constant 0 : index
    %313 = vector.load %arg7[%c1_125, %c0_126, %c0_127] : memref<2x1x128xf32, #tpu.memory_space<vmem>>, vector<1x1x128xf32>
    %314 = vector.shape_cast %313 : vector<1x1x128xf32> to vector<1x128xf32>
    %315 = vector.broadcast %314 : vector<1x128xf32> to vector<16x128xf32>
    %316 = arith.addf %312, %315 : vector<16x128xf32>
    %317 = arith.addf %316, %209 : vector<16x128xf32>
    %c1_128 = arith.constant 1 : index
    %c0_129 = arith.constant 0 : index
    %c0_130 = arith.constant 0 : index
    %318 = vector.load %arg8[%c1_128, %c0_129, %c0_130] : memref<2x1x128xf32, #tpu.memory_space<vmem>>, vector<1x1x128xf32>
    %319 = vector.shape_cast %318 : vector<1x1x128xf32> to vector<1x128xf32>
    %c1_131 = arith.constant 1 : index
    %c0_132 = arith.constant 0 : index
    %c0_133 = arith.constant 0 : index
    %320 = vector.load %arg9[%c1_131, %c0_132, %c0_133] : memref<2x1x128xf32, #tpu.memory_space<vmem>>, vector<1x1x128xf32>
    %321 = vector.shape_cast %320 : vector<1x1x128xf32> to vector<1x128xf32>
    %cst_134 = arith.constant dense<0.000000e+00> : vector<16xf32>
    %322 = vector.multi_reduction <add>, %317, %cst_134 [1] : vector<16x128xf32> to vector<16xf32>
    %323 = vector.shape_cast %322 : vector<16xf32> to vector<16x1xf32>
    %cst_135 = arith.constant 1.280000e+02 : f32
    %324 = vector.broadcast %cst_135 : f32 to vector<16x1xf32>
    %325 = arith.divf %323, %324 : vector<16x1xf32>
    %326 = vector.broadcast %325 : vector<16x1xf32> to vector<16x128xf32>
    %327 = arith.subf %317, %326 : vector<16x128xf32>
    %328 = arith.mulf %327, %327 : vector<16x128xf32>
    %cst_136 = arith.constant dense<0.000000e+00> : vector<16xf32>
    %329 = vector.multi_reduction <add>, %328, %cst_136 [1] : vector<16x128xf32> to vector<16xf32>
    %330 = vector.shape_cast %329 : vector<16xf32> to vector<16x1xf32>
    %cst_137 = arith.constant 1.280000e+02 : f32
    %331 = vector.broadcast %cst_137 : f32 to vector<16x1xf32>
    %332 = arith.divf %330, %331 : vector<16x1xf32>
    %cst_138 = arith.constant 9.99999996E-13 : f32
    %333 = vector.broadcast %cst_138 : f32 to vector<16x1xf32>
    %334 = arith.addf %332, %333 : vector<16x1xf32>
    %335 = math.rsqrt %334 : vector<16x1xf32>
    %336 = vector.broadcast %335 : vector<16x1xf32> to vector<16x128xf32>
    %337 = arith.mulf %327, %336 : vector<16x128xf32>
    %338 = vector.broadcast %319 : vector<1x128xf32> to vector<16x128xf32>
    %339 = arith.mulf %337, %338 : vector<16x128xf32>
    %340 = vector.broadcast %321 : vector<1x128xf32> to vector<16x128xf32>
    %341 = arith.addf %339, %340 : vector<16x128xf32>
    %342 = arith.truncf %341 : vector<16x128xf32> to vector<16x128xbf16>
    %c1_139 = arith.constant 1 : index
    %c0_140 = arith.constant 0 : index
    %c0_141 = arith.constant 0 : index
    %343 = vector.load %arg10[%c1_139, %c0_140, %c0_141] : memref<2x128x256xbf16, #tpu.memory_space<vmem>>, vector<1x128x256xbf16>
    %344 = vector.shape_cast %343 : vector<1x128x256xbf16> to vector<128x256xbf16>
    %cst_142 = arith.constant dense<0.000000e+00> : vector<16x256xf32>
    %345 = tpu.matmul %342, %344, %cst_142 {dimension_numbers = #tpu.dot_dimension_numbers<[1], [0], [0], [1], [0, 0, 1, 1], [], []>} : vector<16x128xbf16>, vector<128x256xbf16>, vector<16x256xf32> -> vector<16x256xf32>
    %c1_143 = arith.constant 1 : index
    %c0_144 = arith.constant 0 : index
    %c0_145 = arith.constant 0 : index
    %346 = vector.load %arg11[%c1_143, %c0_144, %c0_145] : memref<2x1x256xf32, #tpu.memory_space<vmem>>, vector<1x1x256xf32>
    %347 = vector.shape_cast %346 : vector<1x1x256xf32> to vector<1x256xf32>
    %348 = vector.broadcast %347 : vector<1x256xf32> to vector<16x256xf32>
    %349 = arith.addf %345, %348 : vector<16x256xf32>
    %350 = arith.mulf %349, %349 : vector<16x256xf32>
    %351 = arith.mulf %349, %350 : vector<16x256xf32>
    %cst_146 = arith.constant 4.471500e-02 : f32
    %352 = vector.broadcast %cst_146 : f32 to vector<16x256xf32>
    %353 = arith.mulf %352, %351 : vector<16x256xf32>
    %354 = arith.addf %349, %353 : vector<16x256xf32>
    %cst_147 = arith.constant 0.797884583 : f32
    %355 = vector.broadcast %cst_147 : f32 to vector<16x256xf32>
    %356 = arith.mulf %355, %354 : vector<16x256xf32>
    %357 = math.tanh %356 : vector<16x256xf32>
    %cst_148 = arith.constant 1.000000e+00 : f32
    %358 = vector.broadcast %cst_148 : f32 to vector<16x256xf32>
    %359 = arith.addf %358, %357 : vector<16x256xf32>
    %cst_149 = arith.constant 5.000000e-01 : f32
    %360 = vector.broadcast %cst_149 : f32 to vector<16x256xf32>
    %361 = arith.mulf %360, %359 : vector<16x256xf32>
    %362 = arith.mulf %349, %361 : vector<16x256xf32>
    %363 = arith.truncf %362 : vector<16x256xf32> to vector<16x256xbf16>
    %c1_150 = arith.constant 1 : index
    %c0_151 = arith.constant 0 : index
    %c0_152 = arith.constant 0 : index
    %364 = vector.load %arg12[%c1_150, %c0_151, %c0_152] : memref<2x256x128xbf16, #tpu.memory_space<vmem>>, vector<1x256x128xbf16>
    %365 = vector.shape_cast %364 : vector<1x256x128xbf16> to vector<256x128xbf16>
    %cst_153 = arith.constant dense<0.000000e+00> : vector<16x128xf32>
    %366 = tpu.matmul %363, %365, %cst_153 {dimension_numbers = #tpu.dot_dimension_numbers<[1], [0], [0], [1], [0, 0, 1, 1], [], []>} : vector<16x256xbf16>, vector<256x128xbf16>, vector<16x128xf32> -> vector<16x128xf32>
    %c1_154 = arith.constant 1 : index
    %c0_155 = arith.constant 0 : index
    %c0_156 = arith.constant 0 : index
    %367 = vector.load %arg13[%c1_154, %c0_155, %c0_156] : memref<2x1x128xf32, #tpu.memory_space<vmem>>, vector<1x1x128xf32>
    %368 = vector.shape_cast %367 : vector<1x1x128xf32> to vector<1x128xf32>
    %369 = vector.broadcast %368 : vector<1x128xf32> to vector<16x128xf32>
    %370 = arith.addf %366, %369 : vector<16x128xf32>
    %371 = arith.addf %370, %341 : vector<16x128xf32>
    %c1_157 = arith.constant 1 : index
    %c0_158 = arith.constant 0 : index
    %c0_159 = arith.constant 0 : index
    %372 = vector.load %arg14[%c1_157, %c0_158, %c0_159] : memref<2x1x128xf32, #tpu.memory_space<vmem>>, vector<1x1x128xf32>
    %373 = vector.shape_cast %372 : vector<1x1x128xf32> to vector<1x128xf32>
    %c1_160 = arith.constant 1 : index
    %c0_161 = arith.constant 0 : index
    %c0_162 = arith.constant 0 : index
    %374 = vector.load %arg15[%c1_160, %c0_161, %c0_162] : memref<2x1x128xf32, #tpu.memory_space<vmem>>, vector<1x1x128xf32>
    %375 = vector.shape_cast %374 : vector<1x1x128xf32> to vector<1x128xf32>
    %cst_163 = arith.constant dense<0.000000e+00> : vector<16xf32>
    %376 = vector.multi_reduction <add>, %371, %cst_163 [1] : vector<16x128xf32> to vector<16xf32>
    %377 = vector.shape_cast %376 : vector<16xf32> to vector<16x1xf32>
    %cst_164 = arith.constant 1.280000e+02 : f32
    %378 = vector.broadcast %cst_164 : f32 to vector<16x1xf32>
    %379 = arith.divf %377, %378 : vector<16x1xf32>
    %380 = vector.broadcast %379 : vector<16x1xf32> to vector<16x128xf32>
    %381 = arith.subf %371, %380 : vector<16x128xf32>
    %382 = arith.mulf %381, %381 : vector<16x128xf32>
    %cst_165 = arith.constant dense<0.000000e+00> : vector<16xf32>
    %383 = vector.multi_reduction <add>, %382, %cst_165 [1] : vector<16x128xf32> to vector<16xf32>
    %384 = vector.shape_cast %383 : vector<16xf32> to vector<16x1xf32>
    %cst_166 = arith.constant 1.280000e+02 : f32
    %385 = vector.broadcast %cst_166 : f32 to vector<16x1xf32>
    %386 = arith.divf %384, %385 : vector<16x1xf32>
    %cst_167 = arith.constant 9.99999996E-13 : f32
    %387 = vector.broadcast %cst_167 : f32 to vector<16x1xf32>
    %388 = arith.addf %386, %387 : vector<16x1xf32>
    %389 = math.rsqrt %388 : vector<16x1xf32>
    %390 = vector.broadcast %389 : vector<16x1xf32> to vector<16x128xf32>
    %391 = arith.mulf %381, %390 : vector<16x128xf32>
    %392 = vector.broadcast %373 : vector<1x128xf32> to vector<16x128xf32>
    %393 = arith.mulf %391, %392 : vector<16x128xf32>
    %394 = vector.broadcast %375 : vector<1x128xf32> to vector<16x128xf32>
    %395 = arith.addf %393, %394 : vector<16x128xf32>
    %c0_168 = arith.constant 0 : index
    %c0_169 = arith.constant 0 : index
    %396 = vector.load %arg16[%c0_168, %c0_169] : memref<16x128xf32, #tpu.memory_space<vmem>>, vector<16x128xf32>
    tpu.vector_store %arg16[%c0_168, %c0_169], %395 {strides = array<i32>} : memref<16x128xf32, #tpu.memory_space<vmem>>, vector<16x128xf32>,
    return
  }
}

</mosaic_0001>

<bundles_post_ra>
// kernel: bert_warper_forward.1
= control target key start
LH: loop header
LB: loop body
LE: loop exit
PB: predicated region body
PF: predicated region fallthrough
CT: control target
= control target key end

     0   :  { %s5419_s0 = inlined_call_operand.vmem [shape: f32[16,128], index: 0, kind: input, shape index: {}]   ;;  %s5420_s1 = inlined_call_operand.vmem [shape: f32[2,1,8], index: 1, kind: input, shape index: {}]   ;;  %s5421_s2 = inlined_call_operand.vmem [shape: f32[1,128], index: 2, kind: input, shape index: {}]   ;;  %s5422_s3 = inlined_call_operand.vmem [shape: f32[1,128], index: 3, kind: input, shape index: {}]   ;;  %s5423_s4 = inlined_call_operand.hbm [shape: bf16[2,128,384], index: 4, kind: input, shape index: {}]   ;;  %s5424_s5 = inlined_call_operand.vmem [shape: f32[2,1,384], index: 5, kind: input, shape index: {}]   ;;  %s5425_s6 = inlined_call_operand.vmem [shape: bf16[2,128,128], index: 6, kind: input, shape index: {}]   ;;  %s5426_s7 = inlined_call_operand.vmem [shape: f32[2,1,128], index: 7, kind: input, shape index: {}]   ;;  %s5427_s8 = inlined_call_operand.vmem [shape: f32[2,1,128], index: 8, kind: input, shape index: {}]   ;;  %s5428_s9 = inlined_call_operand.vmem [shape: f32[2,1,128], index: 9, kind: input, shape index: {}]   ;;  %s5429_s10 = inlined_call_operand.vmem [shape: bf16[2,128,256], index: 10, kind: input, shape index: {}]   ;;  %s5430_s11 = inlined_call_operand.vmem [shape: f32[2,1,256], index: 11, kind: input, shape index: {}]   ;;  %s5431_s12 = inlined_call_operand.hbm [shape: bf16[2,256,128], index: 12, kind: input, shape index: {}]   ;;  %s5432_s13 = inlined_call_operand.vmem [shape: f32[2,1,128], index: 13, kind: input, shape index: {}]   ;;  %s5433_s14 = inlined_call_operand.vmem [shape: f32[2,1,128], index: 14, kind: input, shape index: {}]   ;;  %s5434_s15 = inlined_call_operand.vmem [shape: f32[2,1,128], index: 15, kind: input, shape index: {}]   ;;  %s5435_s16 = inlined_call_operand.vmem [shape: f32[16,128], index: 16, kind: output, shape index: {}]  }
   0x1   :  { %5437 = sst [smem:[#allocation9_spill]] %s5419_s0 }
   0x2   :  { %21 = vsyncpa [#allocation4], 0 }
   0x3   :  { %22 = vsyncpa [#allocation6], 0  ;;  %s4604_s21 = smov [#allocation3]   ;;  %s4556_s25 = scalar_lea.hbm %s5423_s4, 6144 }
   0x4   :  { %s36_s22 = sshll.u32 %s4604_s21, 4  ;;  %p4557_p0 = scmp.ne.s32.totalorder %s5423_s4, %s4556_s25  ;;  %s37_s22 = int_to_ptr.vmem [resolvable:$true] %s36_s22 }
   0x5   :  { %p4560_p1 = scmp.lt.u32.totalorder %s4556_s25, %s5423_s4 }
   0x7   :  { %p4562_p2 = pnand %p4560_p1, %p4557_p0 }
   0x9   :  { %4565 = shalt.err (!%p4562_p2)
}
   0xa   :  { %s4566_s30 = scalar_lea.vmem %s37_s22, 6144  ;;  %p4571_p4 = scmp.lt.s32.totalorder %s37_s22, %s37_s22 }
   0xb   :  { %p4567_p3 = scmp.ne.s32.totalorder %s37_s22, %s4566_s30  ;;  %p4572_p5 = scmp.lt.s32.totalorder %s4566_s30, %s4566_s30 }
   0xd   :  { %p4573_p6 = por %p4572_p5, %p4571_p4 }
   0xf   :  { %p4574_p7 = pnand %p4573_p6, %p4567_p3 }
  0x11   :  { %4577 = shalt.err (!%p4574_p7)
}
  0x12   :  { %s4605_s0 = smov 192   ;;  %s4606_s17 = smov 12  }
  0x13   :  { %42 = dma.hbm_to_vmem [thread:$0]  %s5423_s4, 6144, %s37_s22, [#allocation4], %s4605_s0, %s4605_s0, %s4606_s17  }
  0x14   :  { %s4607_s20 = smov [#allocation5]   ;;  %s4578_s25 = scalar_lea.hbm %s5431_s12, 4096 }
  0x15   :  { %s62_s21 = sshll.u32 %s4607_s20, 4  ;;  %p4579_p8 = scmp.ne.s32.totalorder %s5431_s12, %s4578_s25  ;;  %s63_s21 = int_to_ptr.vmem [resolvable:$true] %s62_s21 }
  0x16   :  { %p4582_p9 = scmp.lt.u32.totalorder %s4578_s25, %s5431_s12 }
  0x18   :  { %p4584_p10 = pnand %p4582_p9, %p4579_p8 }
  0x1a   :  { %4587 = shalt.err (!%p4584_p10)
}
  0x1b   :  { %s4588_s30 = scalar_lea.vmem %s63_s21, 4096  ;;  %p4593_p12 = scmp.lt.s32.totalorder %s63_s21, %s63_s21 }
  0x1c   :  { %p4589_p11 = scmp.ne.s32.totalorder %s63_s21, %s4588_s30  ;;  %p4594_p13 = scmp.lt.s32.totalorder %s4588_s30, %s4588_s30 }
  0x1e   :  { %p4595_p0 = por %p4594_p13, %p4593_p12 }
  0x20   :  { %p4596_p1 = pnand %p4595_p0, %p4589_p11 }
  0x22   :  { %4599 = shalt.err (!%p4596_p1)
}
  0x23   :  { %s4608_s4 = smov 64   ;;  %s4609_s22 = smov 4  }
  0x24   :  { %68 = dma.hbm_to_vmem [thread:$0]  %s5431_s12, 4096, %s63_s21, [#allocation6], %s4608_s4, %s4608_s4, %s4609_s22  }
  0x25   :  { %4600 = dma.done.wait [#allocation4], 6144  }
  0x26   :  { %4601 = vsyncadd [#allocation4], 4294961152 }
  0x27   :  { %4602 = dma.done.wait [#allocation6], 4096  }
  0x28   :  { %4603 = vsyncadd [#allocation6], 4294963200  ;;  %s5438_s20 = sld [smem:[#allocation9_spill]]  ;;  %v4294_v2 = vld [vmem:[#allocation3 + $0x4] ss:$12 sps:$4 sm:$0xff]   ;;  %v4610_v4 = vmov 0.0   ;;  %v162_v53 = vlaneseq }
  0x29   :  { %v4296_v3 = vld [vmem:[#allocation3] ss:$12 sps:$4 sm:$0xff]   ;;  %4011 = vmatprep.subr.bf16.mxu1 %v4610_v4  ;;  %v4297_v5 = vld [vmem:[#allocation3 + $0x8] ss:$12 sps:$4 sm:$0xff]   ;;  %305 = vmatprep.subr.bf16.mxu0 %v4294_v2  ;;  %v4300_v15 = vld [vmem:[#allocation3 + $0x18] ss:$12 sps:$4 sm:$0xff]  }
  0x2a   :  { %v4298_v6 = vld [vmem:[#allocation3 + $0x1c] ss:$12 sps:$4 sm:$0xff]   ;;  %306 = vmatpush1.bf16.msra.mxu0 %v4296_v3  ;;  %4012 = vmatpush3.bf16.msra.mxu1 %v4297_v5  ;;  %v4301_v16 = vld [vmem:[#allocation3 + $0x20] ss:$12 sps:$4 sm:$0xff]   ;;  %v4305_v19 = vld [vmem:[#allocation3 + $0x38] ss:$12 sps:$4 sm:$0xff]  }
  0x2b   :  { %307 = vmatprep.subr.bf16.mxu0 %v4298_v6  ;;  %4013 = vmatprep.subr.bf16.mxu1 %v4610_v4  ;;  %v4302_v17 = vld [vmem:[#allocation3 + $0x34] ss:$12 sps:$4 sm:$0xff]   ;;  %v4304_v18 = vld [vmem:[#allocation3 + $0x30] ss:$12 sps:$4 sm:$0xff]   ;;  %v4306_v20 = vld [vmem:[#allocation3 + $0x4c] ss:$12 sps:$4 sm:$0xff]  }
  0x2c   :  { %v4308_v21 = vld [vmem:[#allocation3 + $0x48] ss:$12 sps:$4 sm:$0xff]   ;;  %v4309_v22 = vld [vmem:[#allocation3 + $0x50] ss:$12 sps:$4 sm:$0xff]   ;;  %v4312_v24 = vld [vmem:[#allocation3 + $0x60] ss:$12 sps:$4 sm:$0xff]  }
  0x2d   :  { %v4310_v23 = vld [vmem:[#allocation3 + $0x64] ss:$12 sps:$4 sm:$0xff]   ;;  %v4313_v25 = vld [vmem:[#allocation3 + $0x68] ss:$12 sps:$4 sm:$0xff]   ;;  %v4317_v28 = vld [vmem:[#allocation3 + $0x80] ss:$12 sps:$4 sm:$0xff]  }
  0x2e   :  { %v84_v0 = vld [vmem:[%s5438_s20] sm:$0xff]  ;;  %v85_v1 = vld [vmem:[%s5438_s20 + $0x8] sm:$0xff]  ;;  %308 = vmatpush1.bf16.msra.mxu0 %v4300_v15  ;;  %4014 = vmatpush3.bf16.msra.mxu1 %v4301_v16  ;;  %v4611_v30 = vmov 0   ;;  %vm4612_vm0 = vmmov 0   ;;  %v4324_v34 = vld [vmem:[#allocation3 + $0xa8] ss:$12 sps:$4 sm:$0xff]  }
  0x2f   :  { %88 = vadd.xlane.f32.xlu0 %v84_v0  ;;  %4015 = vmatprep.subr.bf16.mxu1 %v4610_v4  ;;  %v4314_v26 = vld [vmem:[#allocation3 + $0x7c] ss:$12 sps:$4 sm:$0xff]   ;;  %v4316_v27 = vld [vmem:[#allocation3 + $0x78] ss:$12 sps:$4 sm:$0xff]   ;;  %v4318_v29 = vld [vmem:[#allocation3 + $0x94] ss:$12 sps:$4 sm:$0xff]  }
  0x30   :  { %309 = vmatprep.subr.bf16.mxu0 %v4302_v17  ;;  %337 = vmatprep.mubr.bf16.mxu0 %v4611_v30  ;;  %v4320_v31 = vld [vmem:[#allocation3 + $0x90] ss:$12 sps:$4 sm:$0xff]   ;;  %v4321_v32 = vld [vmem:[#allocation3 + $0x98] ss:$12 sps:$4 sm:$0xff]   ;;  %v4771_v54 = vshrl.u32 %v162_v53, 7  ;;  %vm419_vm1 = vcmask 261120  }
  0x31   :  { %4027 = vmatprep.mubr.msk.bf16.mxu1 %vm4612_vm0, %v4610_v4  ;;  %v4322_v33 = vld [vmem:[#allocation3 + $0xac] ss:$12 sps:$4 sm:$0xff]   ;;  %v4325_v35 = vld [vmem:[#allocation3 + $0xb0] ss:$12 sps:$4 sm:$0xff]   ;;  %vm540_vm2 = vcmask 1043456   ;;  %vm512_vm3 = vcmask 64512  }
  0x32   :  { %310 = vmatpush1.bf16.msra.mxu0 %v4304_v18  ;;  %4016 = vmatpush3.bf16.msra.mxu1 %v4305_v19  ;;  %v3627_v44 = vld [vmem:[%s5421_s2] ss:$0 sm:$0xff]  ;;  %v4774_v55 = vsub.s32 1, %v4771_v54  ;;  %v172_v57 = vsub.s32 2, %v4771_v54  ;;  %v4782_v59 = vsub.s32 0, %v4771_v54  ;;  %s4613_s22 = smov 96  }
  0x33   :  { %90 = vadd.xlane.f32.xlu0 %v85_v1  ;;  %4017 = vmatprep.subr.bf16.mxu1 %v4610_v4  ;;  %v3628_v48 = vld [vmem:[%s5422_s3] ss:$0 sm:$0xff]  ;;  %s4614_s0 = smov 32   ;;  %vm857_vm4 = vcmask 523520   ;;  %vm1084_vm5 = vcmask 785920   ;;  %vm1311_vm6 = vcmask 1048320  }
  0x34   :  { %311 = vmatprep.subr.bf16.mxu0 %v4306_v20  ;;  %v160_v56 = vld [vmem:[%s5424_s5] sm:$0x7] }
  0x35   :  { %v169_v58 = vrot.slane %v160_v56, %v4774_v55  ;;  %v173_v62 = vrot.slane %v160_v56, %v172_v57 }
  0x36   :  { %312 = vmatpush1.bf16.msra.mxu0 %v4308_v21  ;;  %4018 = vmatpush3.bf16.msra.mxu1 %v4309_v22  ;;  %v4819_v21 = vld [vmem:[%s5420_s1] ss:$0 sm:$0xff] }
  0x37   :  { %4019 = vmatprep.subr.bf16.mxu1 %v4610_v4  ;;  %313 = vmatprep.subr.bf16.mxu0 %v4310_v23 }
  0x3a   :  { %314 = vmatpush1.bf16.msra.mxu0 %v4312_v24  ;;  %4020 = vmatpush3.bf16.msra.mxu1 %v4313_v25 }
  0x3b   :  { %315 = vmatprep.subr.bf16.mxu0 %v4314_v26  ;;  %4021 = vmatprep.subr.bf16.mxu1 %v4610_v4 }
  0x3e   :  { %316 = vmatpush1.bf16.msra.mxu0 %v4316_v27  ;;  %4022 = vmatpush3.bf16.msra.mxu1 %v4317_v28  ;;  %v4826_v28 = vld [vmem:[%s5420_s1 + $0x1] ss:$0 sm:$0xff] }
  0x3f   :  { %317 = vmatprep.subr.bf16.mxu0 %v4318_v29  ;;  %4023 = vmatprep.subr.bf16.mxu1 %v4610_v4 }
  0x42   :  { %318 = vmatpush1.bf16.msra.mxu0 %v4320_v31  ;;  %4024 = vmatpush3.bf16.msra.mxu1 %v4321_v32 }
  0x43   :  { %319 = vmatprep.subr.bf16.mxu0 %v4322_v33  ;;  %4025 = vmatprep.subr.bf16.mxu1 %v4610_v4 }
  0x46   :  { %320 = vmatpush1.bf16.msra.mxu0 %v4324_v34  ;;  %4026 = vmatpush3.bf16.msra.mxu1 %v4325_v35 }
  0x47   :  { %4031 = vmatprep.subr.bf16.mxu1 %v4610_v4  ;;  %4055 = vmatprep.subr.bf16.mxu0 %v4610_v4 }
  0xbc   :  { %v89_v7 = vpop.xlane.xlu0 %88 }
  0xbd   :  { %v93_v8 = vmul.f32 0.0078125, %v89_v7 }
  0xbf   :  { %v4734_v9 = vsub.f32 %v84_v0, %v93_v8  ;;  %v165_v8 = vrot.slane %v160_v56, %v4782_v59 }
  0xc0   :  { %v91_v10 = vpop.xlane.xlu0 %90 }
  0xc1   :  { %v94_v11 = vmul.f32 0.0078125, %v91_v10  ;;  %v97_v12 = vmul.f32 %v4734_v9, %v4734_v9 }
  0xc3   :  { %v4738_v13 = vsub.f32 %v85_v1, %v94_v11  ;;  %99 = vadd.xlane.f32.xlu1 %v97_v12 }
  0xc5   :  { %v98_v14 = vmul.f32 %v4738_v13, %v4738_v13 }
  0xc7   :  { %101 = vadd.xlane.f32.xlu1 %v98_v14 }
 0x150   :  { %v100_v36 = vpop.xlane.xlu1 %99 }
 0x151   :  { %v103_v37 = vmul.f32 0.0078125, %v100_v36 }
 0x153   :  { %v105_v38 = vadd.f32 1e-12, %v103_v37 }
 0x154   :  { %v102_v39 = vpop.xlane.xlu1 %101 }
 0x155   :  { %4454 = vrsqrt.f32 %v105_v38  ;;  %v104_v40 = vmul.f32 0.0078125, %v102_v39 }
 0x157   :  { %v106_v41 = vadd.f32 1e-12, %v104_v40 }
 0x159   :  { %4456 = vrsqrt.f32 %v106_v41 }
 0x15f   :  { %v4455_v42 = vpop.eup %4454 }
 0x160   :  { %v109_v43 = vmul.f32 %v4455_v42, %v4734_v9 }
 0x162   :  { %v117_v47 = vmul.f32 %v3627_v44, %v109_v43 }
 0x163   :  { %v4457_v45 = vpop.eup %4456 }
 0x164   :  { %v110_v46 = vmul.f32 %v4457_v45, %v4738_v13  ;;  %v4761_v50 = vadd.f32 %v3628_v48, %v117_v47 }
 0x166   :  { %v118_v49 = vmul.f32 %v3627_v44, %v110_v46 }
 0x168   :  { %v4763_v51 = vadd.f32 %v3628_v48, %v118_v49 }
 0x16a   :  { %v127_v52 = vpack.c.bf16 %v4763_v51, %v4761_v50 }
 0x16c   :  { %338 = vmatmul.mubr.bf16.vlgmr.msra.gmra.mrb[0].mxu0 %v127_v52  ;;  %4028 = vmatmul.mubr.bf16.vlgmr.msra.gmra.mrb[0].mxu1 %v127_v52 }
 0x16d   :  { %4033 = vmatprep.mubr.msk.bf16.mxu1 %vm4612_vm0, %v4610_v4  ;;  %4057 = vmatprep.mubr.msk.bf16.mxu0 %vm4612_vm0, %v4610_v4 }
 0x23f   :  { %v339_v60 = vpop.f32.mrb[0].mxu0  ;;  %v382_v61 = vpop.f32.mrb[0].mxu1 }
 0x240   :  { %v341_v63 = vpop.f32.mrb[1].mxu0  ;;  %v4029_v0 = vpop.f32.mrb[1].mxu1  ;;  %v340_v12 = vadd.f32 %v339_v60, %v165_v8  ;;  %v383_v15 = vadd.f32 %v382_v61, %v173_v62 }
 0x241   :  { %v342_v1 = vadd.f32 %v341_v63, %v169_v58  ;;  %v343_v2 = vpop.f32.mrb[2].mxu0  ;;  %v385_v3 = vpop.f32.mrb[2].mxu1 }
 0x242   :  { %v4786_v5 = vadd.f32 %v385_v3, %v173_v62  ;;  %v345_v6 = vpop.f32.mrb[3].mxu0  ;;  %v4030_v7 = vpop.f32.mrb[3].mxu1  ;;  %v4796_v14 = vpack.c.bf16 %v340_v12, %v340_v12  ;;  %v344_v17 = vadd.f32 %v343_v2, %v165_v8  ;;  %v4805_v18 = vpack.c.bf16 %v383_v15, %v383_v15 }
 0x243   :  { %v4789_v9 = vpack.c.bf16 %v342_v1, %v342_v1  ;;  %v346_v10 = vadd.f32 %v345_v6, %v169_v58 }
 0x244   :  { %v4807_v19 = vpack.c.bf16 %v344_v17, %v344_v17  ;;  %v542_v20 = vsel %vm540_vm2, %v4805_v18, 0  ;;  %v4844_v56 = vpack.c.bf16 %v4786_v5, %v4786_v5 }
 0x245   :  { %v424_v11 = vsel %vm419_vm1, %v4789_v9, 0  ;;  %v4794_v13 = vpack.c.bf16 %v346_v10, %v346_v10 }
 0x246   :  { %4032 = vmatpush3.bf16.xpose.msra.mxu1 %v424_v11  ;;  %v588_v62 = vsel %vm540_vm2, %v4844_v56, 0 }
 0x247   :  { %4037 = vmatprep.subr.bf16.mxu1 %v4610_v4  ;;  %v470_v16 = vsel %vm419_vm1, %v4794_v13, 0 }
 0x24d   :  { %4034 = vmatmul.mubr.msk.bf16.vlgmr.msra.gmra.mrb[4].mxu1 %vm419_vm1, %v4796_v14 }
 0x24e   :  { %4038 = vmatpush3.bf16.xpose.msra.mxu1 %v470_v16  ;;  %4039 = vmatprep.mubr.msk.bf16.mxu1 %vm4612_vm0, %v4610_v4 }
 0x24f   :  { %4043 = vmatprep.subr.bf16.mxu1 %v4610_v4 }
 0x255   :  { %4040 = vmatmul.mubr.msk.bf16.vlgmr.msra.gmra.mrb[8].mxu1 %vm419_vm1, %v4807_v19 }
 0x256   :  { %4044 = vmatpush3.bf16.msra.mxu1 %v542_v20  ;;  %4045 = vmatprep.mubr.msk.bf16.mxu1 %vm4612_vm0, %v4610_v4 }
 0x257   :  { %4049 = vmatprep.subr.bf16.mxu1 %v4610_v4 }
 0x320   :  { %v460_v22 = vpop.f32.mrb[4].mxu1 }
 0x321   :  { %v461_v23 = vadd.f32 %v4819_v21, %v460_v22  ;;  %v4035_v24 = vpop.f32.mrb[5].mxu1 }
 0x322   :  { %v463_v25 = vpop.f32.mrb[6].mxu1 }
 0x323   :  { %v4036_v26 = vpop.f32.mrb[7].mxu1  ;;  %v513_v27 = vsel %vm512_vm3, %v461_v23, -inf }
 0x324   :  { %514 = vmax.xlane.f32.xlu0 %v513_v27 }
 0x328   :  { %v506_v29 = vpop.f32.mrb[8].mxu1 }
 0x329   :  { %v507_v31 = vadd.f32 %v4826_v28, %v506_v29  ;;  %v4041_v32 = vpop.f32.mrb[9].mxu1 }
 0x32a   :  { %v509_v33 = vpop.f32.mrb[10].mxu1 }
 0x32b   :  { %v4042_v34 = vpop.f32.mrb[11].mxu1  ;;  %v516_v35 = vsel %vm512_vm3, %v507_v31, -inf }
 0x32c   :  { %517 = vmax.xlane.f32.xlu1 %v516_v35 }
 0x33d   :  { %684 = vrot.lane.b32.xlu1 %v4794_v13, %s4613_s22 }
 0x3b1   :  { %v515_v36 = vpop.xlane.xlu0 %514 }
 0x3b2   :  { %v519_v37 = vsub.f32 %v461_v23, %v515_v36 }
 0x3b4   :  { %v521_v38 = vmul.f32 1.442695, %v519_v37 }
 0x3b6   :  { %4458 = vpow2.f32 %v521_v38 }
 0x3b9   :  { %v518_v39 = vpop.xlane.xlu1 %517 }
 0x3ba   :  { %v520_v40 = vsub.f32 %v507_v31, %v518_v39 }
 0x3bc   :  { %v523_v41 = vmul.f32 1.442695, %v520_v40 }
 0x3bd   :  { %v685_v47 = vpop.permute.xlu1 %684 }
 0x3be   :  { %4460 = vpow2.f32 %v523_v41  ;;  %v690_v2 = vsel %vm419_vm1, %v685_v47, 0 }
 0x3c0   :  { %v4459_v42 = vpop.eup %4458 }
 0x3c1   :  { %v525_v43 = vsel %vm512_vm3, %v4459_v42, 0.0 }
 0x3c2   :  { %526 = vadd.xlane.f32.xlu0 %v525_v43 }
 0x3c8   :  { %v4461_v44 = vpop.eup %4460 }
 0x3c9   :  { %v528_v45 = vsel %vm512_vm3, %v4461_v44, 0.0 }
 0x3ca   :  { %529 = vadd.xlane.f32.xlu1 %v528_v45 }
 0x3d8   :  { %634 = vrot.lane.b32.xlu0 %v4789_v9, %s4613_s22 }
 0x3db   :  { %632 = vrot.lane.b32.xlu1 %v4796_v14, %s4613_s22 }
 0x3df   :  { %682 = vrot.lane.b32.xlu1 %v4807_v19, %s4613_s22 }
 0x44f   :  { %v527_v46 = vpop.xlane.xlu0 %526 }
 0x450   :  { %4462 = vrcp.f32 %v527_v46 }
 0x453   :  { %v635_v48 = vpop.permute.xlu0 %634 }
 0x454   :  { %v640_v49 = vsel %vm419_vm1, %v635_v48, 0 }
 0x455   :  { %4056 = vmatpush3.bf16.xpose.msra.mxu0 %v640_v49 }
 0x456   :  { %4067 = vmatprep.subr.bf16.mxu0 %v4610_v4 }
 0x457   :  { %v530_v52 = vpop.xlane.xlu1 %529 }
 0x458   :  { %4464 = vrcp.f32 %v530_v52 }
 0x45a   :  { %v4463_v53 = vpop.eup %4462 }
 0x45b   :  { %v533_v58 = vmul.f32 %v4463_v53, %v4459_v42  ;;  %v633_v60 = vpop.permute.xlu1 %632 }
 0x45c   :  { %4058 = vmatmul.mubr.msk.bf16.vlgmr.msra.gmra.mrb[4].mxu0 %vm419_vm1, %v633_v60 }
 0x45d   :  { %v535_v61 = vpack.c.bf16 %v533_v58, %v533_v58  ;;  %4069 = vmatprep.mubr.msk.bf16.mxu0 %vm4612_vm0, %v4610_v4 }
 0x45f   :  { %4046 = vmatmul.mubr.msk.bf16.vlgmr.msra.gmra.mrb[12].mxu1 %vm512_vm3, %v535_v61  ;;  %v683_v3 = vpop.permute.xlu1 %682 }
 0x460   :  { %4050 = vmatpush3.bf16.msra.mxu1 %v588_v62  ;;  %4051 = vmatprep.mubr.msk.bf16.mxu1 %vm4612_vm0, %v4610_v4 }
 0x461   :  { %4061 = vmatprep.subr.bf16.mxu1 %v4610_v4 }
 0x462   :  { %v4465_v63 = vpop.eup %4464 }
 0x463   :  { %v534_v0 = vmul.f32 %v4465_v63, %v4461_v44 }
 0x465   :  { %v536_v1 = vpack.c.bf16 %v534_v0, %v534_v0 }
 0x467   :  { %4052 = vmatmul.mubr.msk.bf16.vlgmr.msra.gmra.mrb[16].mxu1 %vm512_vm3, %v536_v1 }
 0x468   :  { %4063 = vmatprep.mubr.msk.bf16.mxu1 %vm4612_vm0, %v4610_v4 }
 0x469   :  { %4062 = vmatpush3.bf16.xpose.msra.mxu1 %v690_v2 }
 0x46a   :  { %4073 = vmatprep.subr.bf16.mxu1 %v4610_v4 }
 0x470   :  { %4064 = vmatmul.mubr.msk.bf16.vlgmr.msra.gmra.mrb[20].mxu1 %vm419_vm1, %v683_v3 }
 0x471   :  { %4075 = vmatprep.mubr.msk.bf16.mxu1 %vm4612_vm0, %v4610_v4 }
 0x52f   :  { %v676_v5 = vpop.f32.mrb[4].mxu0 }
 0x530   :  { %v677_v6 = vadd.f32 %v4819_v21, %v676_v5  ;;  %v4059_v7 = vpop.f32.mrb[5].mxu0 }
 0x531   :  { %v679_v8 = vpop.f32.mrb[6].mxu0 }
 0x532   :  { %v578_v10 = vpop.f32.mrb[12].mxu1  ;;  %v4060_v11 = vpop.f32.mrb[7].mxu0  ;;  %v732_v12 = vsel %vm512_vm3, %v677_v6, -inf }
 0x533   :  { %v4047_v15 = vpop.f32.mrb[13].mxu1  ;;  %733 = vmax.xlane.f32.xlu0 %v732_v12 }
 0x534   :  { %v581_v16 = vpop.f32.mrb[14].mxu1 }
 0x535   :  { %v4048_v17 = vpop.f32.mrb[15].mxu1 }
 0x53a   :  { %v624_v20 = vpop.f32.mrb[16].mxu1 }
 0x53b   :  { %v630_v22 = vpack.c.bf16 %v624_v20, %v578_v10  ;;  %v4053_v23 = vpop.f32.mrb[17].mxu1 }
 0x53c   :  { %v627_v24 = vpop.f32.mrb[18].mxu1 }
 0x53d   :  { %631 = vst.msk [vmem:[#allocation2] sm:$0xff] %vm419_vm1, %v630_v22  ;;  %v4054_v25 = vpop.f32.mrb[19].mxu1 }
 0x543   :  { %v726_v26 = vpop.f32.mrb[20].mxu1 }
 0x544   :  { %v727_v27 = vadd.f32 %v4826_v28, %v726_v26  ;;  %v4065_v29 = vpop.f32.mrb[21].mxu1 }
 0x545   :  { %v729_v31 = vpop.f32.mrb[22].mxu1 }
 0x546   :  { %v4066_v32 = vpop.f32.mrb[23].mxu1  ;;  %v735_v33 = vsel %vm512_vm3, %v727_v27, -inf }
 0x547   :  { %736 = vmax.xlane.f32.xlu1 %v735_v33 }
 0x558   :  { %804 = vrot.lane.b32.xlu1 %v4844_v56, %s4613_s22 }
 0x55c   :  { %861 = vrot.lane.b32.xlu1 %v4789_v9, %s4608_s4 }
 0x560   :  { %911 = vrot.lane.b32.xlu1 %v4794_v13, %s4608_s4 }
 0x564   :  { %909 = vrot.lane.b32.xlu1 %v4807_v19, %s4608_s4 }
 0x5c0   :  { %v734_v34 = vpop.xlane.xlu0 %733 }
 0x5c1   :  { %v738_v35 = vsub.f32 %v677_v6, %v734_v34 }
 0x5c3   :  { %v740_v36 = vmul.f32 1.442695, %v738_v35 }
 0x5c5   :  { %4466 = vpow2.f32 %v740_v36 }
 0x5cf   :  { %v4467_v37 = vpop.eup %4466 }
 0x5d0   :  { %v744_v38 = vsel %vm512_vm3, %v4467_v37, 0.0 }
 0x5d1   :  { %745 = vadd.xlane.f32.xlu0 %v744_v38 }
 0x5d4   :  { %v737_v39 = vpop.xlane.xlu1 %736 }
 0x5d5   :  { %v739_v40 = vsub.f32 %v727_v27, %v737_v39 }
 0x5d7   :  { %v742_v41 = vmul.f32 1.442695, %v739_v40 }
 0x5d8   :  { %v805_v42 = vpop.permute.xlu1 %804 }
 0x5d9   :  { %4468 = vpow2.f32 %v742_v41  ;;  %v810_v43 = vsel %vm540_vm2, %v805_v42, 0 }
 0x5da   :  { %4074 = vmatpush3.bf16.msra.mxu1 %v810_v43 }
 0x5db   :  { %4085 = vmatprep.subr.bf16.mxu1 %v4610_v4 }
 0x5dc   :  { %v862_v58 = vpop.permute.xlu1 %861 }
 0x5dd   :  { %v867_v0 = vsel %vm419_vm1, %v862_v58, 0 }
 0x5e0   :  { %v912_v63 = vpop.permute.xlu1 %911 }
 0x5e1   :  { %v917_v2 = vsel %vm419_vm1, %v912_v63, 0 }
 0x5e3   :  { %v4469_v44 = vpop.eup %4468 }
 0x5e4   :  { %v747_v45 = vsel %vm512_vm3, %v4469_v44, 0.0  ;;  %v910_v5 = vpop.permute.xlu1 %909 }
 0x5e5   :  { %748 = vadd.xlane.f32.xlu0 %v747_v45 }
 0x5fb   :  { %756 = vrot.lane.b32.xlu0 %v4805_v18, %s4613_s22 }
 0x5ff   :  { %859 = vrot.lane.b32.xlu0 %v4796_v14, %s4608_s4 }
 0x65e   :  { %v746_v46 = vpop.xlane.xlu0 %745 }
 0x65f   :  { %4470 = vrcp.f32 %v746_v46 }
 0x669   :  { %v4471_v47 = vpop.eup %4470 }
 0x66a   :  { %v752_v49 = vmul.f32 %v4471_v47, %v4467_v37 }
 0x66c   :  { %v754_v60 = vpack.c.bf16 %v752_v49, %v752_v49 }
 0x672   :  { %v749_v48 = vpop.xlane.xlu0 %748 }
 0x673   :  { %4472 = vrcp.f32 %v749_v48 }
 0x676   :  { %v757_v52 = vpop.permute.xlu0 %756 }
 0x677   :  { %v762_v53 = vsel %vm540_vm2, %v757_v52, 0 }
 0x678   :  { %4068 = vmatpush3.bf16.msra.mxu0 %v762_v53 }
 0x679   :  { %4079 = vmatprep.subr.bf16.mxu0 %v4610_v4 }
 0x67a   :  { %v860_v3 = vpop.permute.xlu0 %859 }
 0x67b   :  { %4070 = vmatmul.mubr.msk.bf16.vlgmr.msra.gmra.mrb[8].mxu0 %vm512_vm3, %v754_v60 }
 0x67c   :  { %4081 = vmatprep.mubr.msk.bf16.mxu0 %vm4612_vm0, %v4610_v4 }
 0x67d   :  { %v4473_v61 = vpop.eup %4472 }
 0x67e   :  { %v753_v62 = vmul.f32 %v4473_v61, %v4469_v44 }
 0x680   :  { %v755_v1 = vpack.c.bf16 %v753_v62, %v753_v62 }
 0x681   :  { %4080 = vmatpush3.bf16.xpose.msra.mxu0 %v867_v0 }
 0x682   :  { %4076 = vmatmul.mubr.msk.bf16.vlgmr.msra.gmra.mrb[24].mxu1 %vm512_vm3, %v755_v1  ;;  %4091 = vmatprep.subr.bf16.mxu0 %v4610_v4 }
 0x683   :  { %4086 = vmatpush3.bf16.xpose.msra.mxu1 %v917_v2  ;;  %4087 = vmatprep.mubr.msk.bf16.mxu1 %vm4612_vm0, %v4610_v4 }
 0x684   :  { %4097 = vmatprep.subr.bf16.mxu1 %v4610_v4 }
 0x688   :  { %4082 = vmatmul.mubr.msk.bf16.vlgmr.msra.gmra.mrb[12].mxu0 %vm419_vm1, %v860_v3 }
 0x689   :  { %4093 = vmatprep.mubr.msk.bf16.mxu0 %vm4612_vm0, %v4610_v4 }
 0x68a   :  { %4088 = vmatmul.mubr.msk.bf16.vlgmr.msra.gmra.mrb[28].mxu1 %vm419_vm1, %v910_v5 }
 0x68b   :  { %4099 = vmatprep.mubr.msk.bf16.mxu1 %vm4612_vm0, %v4610_v4 }
 0x74e   :  { %v4902_v6 = vpop.f32.mrb[8].mxu0 }
 0x74f   :  { %v4071_v7 = vpop.f32.mrb[9].mxu0 }
 0x750   :  { %v801_v8 = vpop.f32.mrb[10].mxu0 }
 0x751   :  { %v4072_v10 = vpop.f32.mrb[11].mxu0 }
 0x755   :  { %v4904_v11 = vpop.f32.mrb[24].mxu1 }
 0x756   :  { %v852_v12 = vpack.c.bf16 %v4904_v11, %v4902_v6  ;;  %v4077_v15 = vpop.f32.mrb[25].mxu1 }
 0x757   :  { %v849_v16 = vpop.f32.mrb[26].mxu1 }
 0x758   :  { %v4078_v17 = vpop.f32.mrb[27].mxu1 }
 0x75b   :  { %v903_v20 = vpop.f32.mrb[12].mxu0 }
 0x75c   :  { %v904_v22 = vadd.f32 %v4819_v21, %v903_v20  ;;  %v4083_v23 = vpop.f32.mrb[13].mxu0 }
 0x75d   :  { %v906_v24 = vpop.f32.mrb[14].mxu0  ;;  %v953_v25 = vpop.f32.mrb[28].mxu1 }
 0x75e   :  { %v954_v26 = vadd.f32 %v4826_v28, %v953_v25  ;;  %v4084_v27 = vpop.f32.mrb[15].mxu0  ;;  %v4089_v29 = vpop.f32.mrb[29].mxu1  ;;  %v959_v31 = vsel %vm512_vm3, %v904_v22, -inf }
 0x75f   :  { %v956_v32 = vpop.f32.mrb[30].mxu1  ;;  %960 = vmax.xlane.f32.xlu0 %v959_v31 }
 0x760   :  { %v4090_v33 = vpop.f32.mrb[31].mxu1  ;;  %v962_v34 = vsel %vm512_vm3, %v954_v26, -inf }
 0x761   :  { %963 = vmax.xlane.f32.xlu1 %v962_v34 }
 0x772   :  { %1031 = vrot.lane.b32.xlu1 %v4844_v56, %s4608_s4 }
 0x776   :  { %1088 = vrot.lane.b32.xlu1 %v4789_v9, %s4614_s0 }
 0x77a   :  { %1138 = vrot.lane.b32.xlu1 %v4794_v13, %s4614_s0 }
 0x77e   :  { %1136 = vrot.lane.b32.xlu1 %v4807_v19, %s4614_s0 }
 0x7ec   :  { %v961_v35 = vpop.xlane.xlu0 %960 }
 0x7ed   :  { %v965_v36 = vsub.f32 %v904_v22, %v961_v35 }
 0x7ee   :  { %v964_v37 = vpop.xlane.xlu1 %963 }
 0x7ef   :  { %v967_v38 = vmul.f32 1.442695, %v965_v36  ;;  %v966_v39 = vsub.f32 %v954_v26, %v964_v37 }
 0x7f1   :  { %4474 = vpow2.f32 %v967_v38  ;;  %v969_v40 = vmul.f32 1.442695, %v966_v39 }
 0x7f2   :  { %v1032_v41 = vpop.permute.xlu1 %1031 }
 0x7f3   :  { %4476 = vpow2.f32 %v969_v40  ;;  %v1037_v42 = vsel %vm540_vm2, %v1032_v41, 0 }
 0x7f4   :  { %4098 = vmatpush3.bf16.msra.mxu1 %v1037_v42 }
 0x7f5   :  { %4109 = vmatprep.subr.bf16.mxu1 %v4610_v4 }
 0x7f6   :  { %v1089_v49 = vpop.permute.xlu1 %1088 }
 0x7fa   :  { %v1139_v61 = vpop.permute.xlu1 %1138 }
 0x7fb   :  { %v4475_v9 = vpop.eup %4474  ;;  %v1144_v63 = vsel %vm419_vm1, %v1139_v61, 0  ;;  %v4331_v61 = vld [vmem:[%s5425_s6 + $0x28] sm:$0xff]  }
 0x7fc   :  { %v971_v13 = vsel %vm512_vm3, %v4475_v9, 0.0 }
 0x7fd   :  { %v4477_v43 = vpop.eup %4476  ;;  %972 = vadd.xlane.f32.xlu0 %v971_v13 }
 0x7fe   :  { %v974_v19 = vsel %vm512_vm3, %v4477_v43, 0.0  ;;  %v1137_v1 = vpop.permute.xlu1 %1136 }
 0x801   :  { %975 = vadd.xlane.f32.xlu0 %v974_v19 }
 0x817   :  { %983 = vrot.lane.b32.xlu0 %v4805_v18, %s4608_s4 }
 0x81b   :  { %1086 = vrot.lane.b32.xlu0 %v4796_v14, %s4614_s0  ;;  %v1094_v14 = vsel %vm419_vm1, %v1089_v49, 0  ;;  %v4326_v49 = vld [vmem:[%s5425_s6] sm:$0xff]  }
 0x88a   :  { %v973_v44 = vpop.xlane.xlu0 %972 }
 0x88b   :  { %4478 = vrcp.f32 %v973_v44 }
 0x88e   :  { %v976_v45 = vpop.xlane.xlu0 %975 }
 0x88f   :  { %4480 = vrcp.f32 %v976_v45 }
 0x892   :  { %v984_v46 = vpop.permute.xlu0 %983 }
 0x893   :  { %v989_v47 = vsel %vm540_vm2, %v984_v46, 0 }
 0x894   :  { %4092 = vmatpush3.bf16.msra.mxu0 %v989_v47 }
 0x895   :  { %v4479_v48 = vpop.eup %4478  ;;  %4103 = vmatprep.subr.bf16.mxu0 %v4610_v4 }
 0x896   :  { %v979_v52 = vmul.f32 %v4479_v48, %v4475_v9  ;;  %v1087_v0 = vpop.permute.xlu0 %1086 }
 0x898   :  { %v981_v53 = vpack.c.bf16 %v979_v52, %v979_v52  ;;  %v4327_v52 = vld [vmem:[%s5425_s6 + $0x8] sm:$0xff]  }
 0x899   :  { %v4481_v58 = vpop.eup %4480 }
 0x89a   :  { %v980_v60 = vmul.f32 %v4481_v58, %v4477_v43  ;;  %4094 = vmatmul.mubr.msk.bf16.vlgmr.msra.gmra.mrb[16].mxu0 %vm512_vm3, %v981_v53  ;;  %v4328_v53 = vld [vmem:[%s5425_s6 + $0x10] sm:$0xff]   ;;  %v4329_v58 = vld [vmem:[%s5425_s6 + $0x18] sm:$0xff]  }
 0x89b   :  { %4105 = vmatprep.mubr.msk.bf16.mxu0 %vm4612_vm0, %v4610_v4 }
 0x89c   :  { %v982_v62 = vpack.c.bf16 %v980_v60, %v980_v60  ;;  %v4330_v60 = vld [vmem:[%s5425_s6 + $0x20] sm:$0xff]  }
 0x89d   :  { %4104 = vmatpush3.bf16.xpose.msra.mxu0 %v1094_v14  ;;  %v4332_v14 = vld [vmem:[%s5425_s6 + $0x30] sm:$0xff]  }
 0x89e   :  { %4100 = vmatmul.mubr.msk.bf16.vlgmr.msra.gmra.mrb[32].mxu1 %vm512_vm3, %v982_v62  ;;  %4115 = vmatprep.subr.bf16.mxu0 %v4610_v4  ;;  %v4333_v62 = vld [vmem:[%s5425_s6 + $0x38] sm:$0xff]  }
 0x89f   :  { %4110 = vmatpush3.bf16.xpose.msra.mxu1 %v1144_v63  ;;  %4111 = vmatprep.mubr.msk.bf16.mxu1 %vm4612_vm0, %v4610_v4 }
 0x8a0   :  { %4121 = vmatprep.subr.bf16.mxu1 %v4610_v4 }
 0x8a4   :  { %4106 = vmatmul.mubr.msk.bf16.vlgmr.msra.gmra.mrb[20].mxu0 %vm419_vm1, %v1087_v0 }
 0x8a5   :  { %4117 = vmatprep.mubr.msk.bf16.mxu0 %vm4612_vm0, %v4610_v4 }
 0x8a6   :  { %4112 = vmatmul.mubr.msk.bf16.vlgmr.msra.gmra.mrb[36].mxu1 %vm419_vm1, %v1137_v1 }
 0x8a7   :  { %4123 = vmatprep.mubr.msk.bf16.mxu1 %vm4612_vm0, %v4610_v4 }
 0x96d   :  { %v1025_v2 = vpop.f32.mrb[16].mxu0 }
 0x96e   :  { %v4095_v3 = vpop.f32.mrb[17].mxu0 }
 0x96f   :  { %v1028_v5 = vpop.f32.mrb[18].mxu0 }
 0x970   :  { %v4096_v7 = vpop.f32.mrb[19].mxu0 }
 0x971   :  { %v1073_v8 = vpop.f32.mrb[32].mxu1 }
 0x972   :  { %v1079_v10 = vpack.c.bf16 %v1073_v8, %v1025_v2  ;;  %v4101_v15 = vpop.f32.mrb[33].mxu1 }
 0x973   :  { %v1076_v16 = vpop.f32.mrb[34].mxu1 }
 0x974   :  { %v4102_v17 = vpop.f32.mrb[35].mxu1 }
 0x975   :  { %v3677_v17 = vld [vmem:[%s5426_s7] ss:$0 sm:$0xff] }
 0x977   :  { %v1130_v20 = vpop.f32.mrb[20].mxu0 }
 0x978   :  { %v1131_v22 = vadd.f32 %v4819_v21, %v1130_v20  ;;  %v4107_v23 = vpop.f32.mrb[21].mxu0 }
 0x979   :  { %v1133_v24 = vpop.f32.mrb[22].mxu0  ;;  %v1180_v25 = vpop.f32.mrb[36].mxu1 }
 0x97a   :  { %v1181_v26 = vadd.f32 %v4826_v28, %v1180_v25  ;;  %v4108_v27 = vpop.f32.mrb[23].mxu0  ;;  %v4113_v29 = vpop.f32.mrb[37].mxu1  ;;  %v1186_v31 = vsel %vm512_vm3, %v1131_v22, -inf }
 0x97b   :  { %v1183_v32 = vpop.f32.mrb[38].mxu1  ;;  %1187 = vmax.xlane.f32.xlu0 %v1186_v31  ;;  %v4334_v31 = vld [vmem:[%s5429_s10] ss:$8 sps:$4 sm:$0xff]  }
 0x97c   :  { %v4114_v33 = vpop.f32.mrb[39].mxu1  ;;  %v1189_v34 = vsel %vm512_vm3, %v1181_v26, -inf  ;;  %v4336_v32 = vld [vmem:[%s5429_s10 + $0x4] ss:$8 sps:$4 sm:$0xff]  }
 0x97d   :  { %1190 = vmax.xlane.f32.xlu1 %v1189_v34  ;;  %v4339_v33 = vld [vmem:[%s5429_s10 + $0x14] ss:$8 sps:$4 sm:$0xff]  }
 0x98e   :  { %1258 = vrot.lane.b32.xlu1 %v4844_v56, %s4614_s0 }
 0x992   :  { %854 = vrot.lane.b32.xlu1 %v852_v12, %s4614_s0 }
 0x996   :  { %1081 = vrot.lane.b32.xlu1 %v1079_v10, %s4608_s4 }
 0xa08   :  { %v1188_v21 = vpop.xlane.xlu0 %1187 }
 0xa09   :  { %v1192_v28 = vsub.f32 %v1131_v22, %v1188_v21 }
 0xa0a   :  { %v1191_v35 = vpop.xlane.xlu1 %1190 }
 0xa0b   :  { %v1194_v36 = vmul.f32 1.442695, %v1192_v28  ;;  %v1193_v37 = vsub.f32 %v1181_v26, %v1191_v35 }
 0xa0d   :  { %4482 = vpow2.f32 %v1194_v36  ;;  %v1196_v38 = vmul.f32 1.442695, %v1193_v37 }
 0xa0e   :  { %v1259_v39 = vpop.permute.xlu1 %1258 }
 0xa0f   :  { %4484 = vpow2.f32 %v1196_v38  ;;  %v1264_v40 = vsel %vm540_vm2, %v1259_v39, 0  ;;  %v4342_v39 = vld [vmem:[%s5429_s10 + $0x24] ss:$8 sps:$4 sm:$0xff]  }
 0xa10   :  { %4122 = vmatpush3.bf16.msra.mxu1 %v1264_v40  ;;  %v4340_v40 = vld [vmem:[%s5429_s10 + $0x20] ss:$8 sps:$4 sm:$0xff]  }
 0xa11   :  { %1577 = vmatprep.subr.bf16.mxu1 %v4336_v32 }
 0xa12   :  { %v855_v56 = vpop.permute.xlu1 %854 }
 0xa13   :  { %858 = vst.msk [vmem:[#allocation2] sm:$0xff] %vm857_vm4, %v855_v56  ;;  %v4345_v56 = vld [vmem:[%s5429_s10 + $0x34] ss:$8 sps:$4 sm:$0xff]  }
 0xa16   :  { %v1082_v6 = vpop.permute.xlu1 %1081 }
 0xa17   :  { %v4483_v11 = vpop.eup %4482  ;;  %1085 = vst.msk [vmem:[#allocation2] sm:$0xff] %vm1084_vm5, %v1082_v6  ;;  %v4343_v6 = vld [vmem:[%s5429_s10 + $0x30] ss:$8 sps:$4 sm:$0xff]  }
 0xa18   :  { %v1198_v12 = vsel %vm512_vm3, %v4483_v11, 0.0 }
 0xa19   :  { %v4485_v41 = vpop.eup %4484  ;;  %1199 = vadd.xlane.f32.xlu0 %v1198_v12  ;;  %v4346_v12 = vld [vmem:[%s5429_s10 + $0x40] ss:$8 sps:$4 sm:$0xff]  }
 0xa1a   :  { %v1201_v42 = vsel %vm512_vm3, %v4485_v41, 0.0 }
 0xa1d   :  { %1202 = vadd.xlane.f32.xlu0 %v1201_v42  ;;  %v4349_v42 = vld [vmem:[%s5429_s10 + $0x50] ss:$8 sps:$4 sm:$0xff]  }
 0xa33   :  { %1210 = vrot.lane.b32.xlu0 %v4805_v18, %s4614_s0 }
 0xaa6   :  { %v1200_v9 = vpop.xlane.xlu0 %1199 }
 0xaa7   :  { %4486 = vrcp.f32 %v1200_v9  ;;  %v4354_v9 = vld [vmem:[%s5429_s10 + $0x64] ss:$8 sps:$4 sm:$0xff]  }
 0xaaa   :  { %v1203_v13 = vpop.xlane.xlu0 %1202 }
 0xaab   :  { %4488 = vrcp.f32 %v1203_v13  ;;  %v4352_v13 = vld [vmem:[%s5429_s10 + $0x60] ss:$8 sps:$4 sm:$0xff]  }
 0xaae   :  { %v1211_v43 = vpop.permute.xlu0 %1210 }
 0xaaf   :  { %v1216_v19 = vsel %vm540_vm2, %v1211_v43, 0  ;;  %v4357_v43 = vld [vmem:[%s5429_s10 + $0x74] ss:$8 sps:$4 sm:$0xff]  }
 0xab0   :  { %4116 = vmatpush3.bf16.msra.mxu0 %v1216_v19  ;;  %v4355_v19 = vld [vmem:[%s5429_s10 + $0x70] ss:$8 sps:$4 sm:$0xff]  }
 0xab1   :  { %v4487_v44 = vpop.eup %4486  ;;  %4127 = vmatprep.subr.bf16.mxu0 %v4610_v4 }
 0xab2   :  { %v1206_v45 = vmul.f32 %v4487_v44, %v4483_v11  ;;  %v4348_v11 = vld [vmem:[%s5429_s10 + $0x44] ss:$8 sps:$4 sm:$0xff]  }
 0xab4   :  { %v1208_v46 = vpack.c.bf16 %v1206_v45, %v1206_v45 }
 0xab5   :  { %v4489_v47 = vpop.eup %4488 }
 0xab6   :  { %v1207_v48 = vmul.f32 %v4489_v47, %v4485_v41  ;;  %4118 = vmatmul.mubr.msk.bf16.vlgmr.msra.gmra.mrb[24].mxu0 %vm512_vm3, %v1208_v46  ;;  %v4351_v41 = vld [vmem:[%s5429_s10 + $0x54] ss:$8 sps:$4 sm:$0xff]  }
 0xab7   :  { %4143 = vmatprep.mubr.msk.bf16.mxu0 %vm4612_vm0, %v4610_v4  ;;  %4128 = vmatpush3.bf16.msra.mxu0 %v4326_v49 }
 0xab8   :  { %v1209_v18 = vpack.c.bf16 %v1207_v48, %v1207_v48  ;;  %4129 = vmatprep.subr.bf16.mxu0 %v4610_v4 }
 0xaba   :  { %4124 = vmatmul.mubr.msk.bf16.vlgmr.msra.gmra.mrb[40].mxu1 %vm512_vm3, %v1209_v18 }
 0xabb   :  { %1609 = vmatprep.mubr.bf16.mxu1 %v4611_v30  ;;  %4130 = vmatpush3.bf16.msra.mxu0 %v4327_v52 }
 0xabc   :  { %4131 = vmatprep.subr.bf16.mxu0 %v4610_v4  ;;  %1578 = vmatpush1.bf16.msra.mxu1 %v4334_v31 }
 0xabd   :  { %1579 = vmatprep.subr.bf16.mxu1 %v4339_v33 }
 0xabf   :  { %4132 = vmatpush3.bf16.msra.mxu0 %v4328_v53  ;;  %v3686_v53 = vld [vmem:[%s5427_s8] ss:$0 sm:$0xff] }
 0xac0   :  { %4133 = vmatprep.subr.bf16.mxu0 %v4610_v4 }
 0xac3   :  { %4134 = vmatpush3.bf16.msra.mxu0 %v4329_v58 }
 0xac4   :  { %4135 = vmatprep.subr.bf16.mxu0 %v4610_v4 }
 0xac7   :  { %4136 = vmatpush3.bf16.msra.mxu0 %v4330_v60 }
 0xac8   :  { %4137 = vmatprep.subr.bf16.mxu0 %v4610_v4 }
 0xacb   :  { %4138 = vmatpush3.bf16.msra.mxu0 %v4331_v61 }
 0xacc   :  { %4139 = vmatprep.subr.bf16.mxu0 %v4610_v4 }
 0xacf   :  { %4140 = vmatpush3.bf16.msra.mxu0 %v4332_v14  ;;  %v3687_v14 = vld [vmem:[%s5428_s9] ss:$0 sm:$0xff] }
 0xad0   :  { %4141 = vmatprep.subr.bf16.mxu0 %v4610_v4 }
 0xad3   :  { %4142 = vmatpush3.bf16.msra.mxu0 %v4333_v62 }
 0xb89   :  { %v1252_v63 = vpop.f32.mrb[24].mxu0 }
 0xb8a   :  { %v4119_v0 = vpop.f32.mrb[25].mxu0 }
 0xb8b   :  { %v1255_v1 = vpop.f32.mrb[26].mxu0 }
 0xb8c   :  { %v4120_v2 = vpop.f32.mrb[27].mxu0 }
 0xb8d   :  { %v1300_v3 = vpop.f32.mrb[40].mxu1  ;;  %v4358_v2 = vld [vmem:[#allocation5 + $0x40] sm:$0xff]  }
 0xb8e   :  { %v1306_v5 = vpack.c.bf16 %v1300_v3, %v1252_v63  ;;  %v4125_v7 = vpop.f32.mrb[41].mxu1  ;;  %v4359_v3 = vld [vmem:[#allocation5] sm:$0xff]   ;;  %3917 = vmatprep.subr.bf16.mxu0 %v4358_v2 }
 0xb8f   :  { %v1303_v8 = vpop.f32.mrb[42].mxu1  ;;  %v4361_v7 = vld [vmem:[#allocation5 + $0x8] sm:$0xff]  }
 0xb90   :  { %v4126_v10 = vpop.f32.mrb[43].mxu1  ;;  %1308 = vrot.lane.b32.xlu0 %v1306_v5, %s4613_s22  ;;  %v4360_v5 = vld [vmem:[#allocation5 + $0x48] sm:$0xff]   ;;  %v4362_v8 = vld [vmem:[#allocation5 + $0x50] sm:$0xff]  }
 0xb91   :  { %v4363_v10 = vld [vmem:[#allocation5 + $0x10] sm:$0xff]  }
 0xc02   :  { %v1309_v15 = vpop.permute.xlu0 %1308 }
 0xc03   :  { %1312 = vst.msk [vmem:[#allocation2] sm:$0xff] %vm1311_vm6, %v1309_v15  ;;  %v4364_v15 = vld [vmem:[#allocation5 + $0x58] sm:$0xff]  }
 0xc0a   :  { %v1313_v16 = vld [vmem:[#allocation2] sm:$0xff] }
 0xc0b   :  { %4144 = vmatmul.mubr.bf16.vlgmr.msra.gmra.mrb[28].mxu0 %v1313_v16  ;;  %v4365_v16 = vld [vmem:[#allocation5 + $0x18] sm:$0xff]  }
 0xc0c   :  { %3918 = vmatpush3.bf16.msra.mxu0 %v4359_v3 }
 0xc0d   :  { %3919 = vmatprep.subr.bf16.mxu0 %v4360_v5 }
 0xc10   :  { %3920 = vmatpush3.bf16.msra.mxu0 %v4361_v7 }
 0xc11   :  { %3921 = vmatprep.subr.bf16.mxu0 %v4362_v8 }
 0xc14   :  { %3922 = vmatpush3.bf16.msra.mxu0 %v4363_v10 }
 0xc15   :  { %3923 = vmatprep.subr.bf16.mxu0 %v4364_v15 }
 0xc18   :  { %3924 = vmatpush3.bf16.msra.mxu0 %v4365_v16 }
 0xcde   :  { %v1419_v20 = vpop.f32.mrb[28].mxu0 }
 0xcdf   :  { %v1420_v22 = vadd.f32 %v3677_v17, %v1419_v20  ;;  %v4145_v23 = vpop.f32.mrb[29].mxu0  ;;  %v4367_v20 = vld [vmem:[#allocation5 + $0x20] sm:$0xff]  }
 0xce0   :  { %v1422_v24 = vpop.f32.mrb[30].mxu0  ;;  %v4369_v23 = vld [vmem:[#allocation5 + $0x28] sm:$0xff]  }
 0xce1   :  { %v1423_v25 = vadd.f32 %v3677_v17, %v1422_v24  ;;  %v4146_v26 = vpop.f32.mrb[31].mxu0  ;;  %v1426_v27 = vadd.f32 %v1420_v22, %v4761_v50  ;;  %v4337_v50 = vld [vmem:[%s5429_s10 + $0x10] ss:$8 sps:$4 sm:$0xff]   ;;  %v4366_v17 = vld [vmem:[#allocation5 + $0x60] sm:$0xff]  }
 0xce2   :  { %1580 = vmatpush1.bf16.msra.mxu1 %v4337_v50  ;;  %3925 = vmatprep.subr.bf16.mxu0 %v4366_v17  ;;  %v4368_v22 = vld [vmem:[#allocation5 + $0x68] sm:$0xff]   ;;  %v4370_v24 = vld [vmem:[#allocation5 + $0x70] sm:$0xff]   ;;  %v4372_v26 = vld [vmem:[#allocation5 + $0x78] sm:$0xff]  }
 0xce3   :  { %1430 = vadd.xlane.f32.xlu1 %v1426_v27  ;;  %v1427_v29 = vadd.f32 %v1423_v25, %v4763_v51  ;;  %1581 = vmatprep.subr.bf16.mxu1 %v4342_v39  ;;  %v4371_v25 = vld [vmem:[#allocation5 + $0x30] sm:$0xff]  }
 0xce4   :  { %3926 = vmatpush3.bf16.msra.mxu0 %v4367_v20 }
 0xce5   :  { %1432 = vadd.xlane.f32.xlu0 %v1427_v29  ;;  %3927 = vmatprep.subr.bf16.mxu0 %v4368_v22  ;;  %v3704_v22 = vld [vmem:[%s5432_s13] ss:$0 sm:$0xff] }
 0xce6   :  { %1582 = vmatpush1.bf16.msra.mxu1 %v4340_v40 }
 0xce7   :  { %1583 = vmatprep.subr.bf16.mxu1 %v4345_v56 }
 0xce8   :  { %3928 = vmatpush3.bf16.msra.mxu0 %v4369_v23 }
 0xce9   :  { %3929 = vmatprep.subr.bf16.mxu0 %v4370_v24 }
 0xcea   :  { %1584 = vmatpush1.bf16.msra.mxu1 %v4343_v6 }
 0xceb   :  { %1585 = vmatprep.subr.bf16.mxu1 %v4348_v11 }
 0xcec   :  { %3930 = vmatpush3.bf16.msra.mxu0 %v4371_v25 }
 0xced   :  { %3931 = vmatprep.subr.bf16.mxu0 %v4372_v26 }
 0xcee   :  { %1586 = vmatpush1.bf16.msra.mxu1 %v4346_v12 }
 0xcef   :  { %1587 = vmatprep.subr.bf16.mxu1 %v4351_v41 }
 0xcf2   :  { %1588 = vmatpush1.bf16.msra.mxu1 %v4349_v42 }
 0xcf3   :  { %1589 = vmatprep.subr.bf16.mxu1 %v4354_v9 }
 0xcf6   :  { %1590 = vmatpush1.bf16.msra.mxu1 %v4352_v13 }
 0xcf7   :  { %1591 = vmatprep.subr.bf16.mxu1 %v4357_v43 }
 0xcfa   :  { %1592 = vmatpush1.bf16.msra.mxu1 %v4355_v19 }
 0xd70   :  { %v1431_v51 = vpop.xlane.xlu1 %1430 }
 0xd71   :  { %v1434_v34 = vmul.f32 0.0078125, %v1431_v51 }
 0xd72   :  { %v1433_v21 = vpop.xlane.xlu0 %1432 }
 0xd73   :  { %v1436_v28 = vsub.f32 %v1426_v27, %v1434_v34  ;;  %v1435_v35 = vmul.f32 0.0078125, %v1433_v21  ;;  %v4373_v27 = vld [vmem:[#allocation5 + $0x38] sm:$0xff]  }
 0xd74   :  { %3932 = vmatpush3.bf16.msra.mxu0 %v4373_v27 }
 0xd75   :  { %v1437_v36 = vsub.f32 %v1427_v29, %v1435_v35  ;;  %v1438_v37 = vmul.f32 %v1436_v28, %v1436_v28  ;;  %4147 = vmatprep.subr.bf16.mxu0 %v4610_v4  ;;  %v1485_v29 = vld [vmem:[%s5430_s11] sm:$0x3] }
 0xd76   :  { %v1490_v31 = vrot.slane %v1485_v29, %v4782_v59  ;;  %v1494_v32 = vrot.slane %v1485_v29, %v4774_v55 }
 0xd77   :  { %1440 = vadd.xlane.f32.xlu0 %v1438_v37  ;;  %v1439_v38 = vmul.f32 %v1437_v36, %v1437_v36 }
 0xd7b   :  { %1442 = vadd.xlane.f32.xlu0 %v1439_v38 }
 0xe04   :  { %v1441_v44 = vpop.xlane.xlu0 %1440 }
 0xe05   :  { %v1444_v45 = vmul.f32 0.0078125, %v1441_v44 }
 0xe07   :  { %v1446_v46 = vadd.f32 1e-12, %v1444_v45 }
 0xe08   :  { %v1443_v47 = vpop.xlane.xlu0 %1442 }
 0xe09   :  { %4490 = vrsqrt.f32 %v1446_v46  ;;  %v1445_v48 = vmul.f32 0.0078125, %v1443_v47 }
 0xe0b   :  { %v1447_v18 = vadd.f32 1e-12, %v1445_v48 }
 0xe0d   :  { %4492 = vrsqrt.f32 %v1447_v18 }
 0xe13   :  { %v4491_v49 = vpop.eup %4490 }
 0xe14   :  { %v1450_v52 = vmul.f32 %v4491_v49, %v1436_v28 }
 0xe16   :  { %v1458_v61 = vmul.f32 %v3686_v53, %v1450_v52 }
 0xe17   :  { %v4493_v58 = vpop.eup %4492 }
 0xe18   :  { %v1451_v60 = vmul.f32 %v4493_v58, %v1437_v36  ;;  %v5063_v63 = vadd.f32 %v3687_v14, %v1458_v61 }
 0xe1a   :  { %v1459_v62 = vmul.f32 %v3686_v53, %v1451_v60 }
 0xe1c   :  { %v5065_v0 = vadd.f32 %v3687_v14, %v1459_v62 }
 0xe1e   :  { %v1468_v1 = vpack.c.bf16 %v5065_v0, %v5063_v63 }
 0xe20   :  { %1610 = vmatmul.mubr.bf16.vlgmr.msra.gmra.mrb[44].mxu1 %v1468_v1 }
 0xe21   :  { %2088 = vmatprep.mubr.bf16.mxu1 %v4611_v30 }
 0xef3   :  { %v1611_v33 = vpop.f32.mrb[44].mxu1 }
 0xef4   :  { %v1612_v50 = vadd.f32 %v1611_v33, %v1490_v31  ;;  %v1613_v51 = vpop.f32.mrb[45].mxu1 }
 0xef5   :  { %v1614_v34 = vadd.f32 %v1613_v51, %v1494_v32  ;;  %v1615_v21 = vpop.f32.mrb[46].mxu1  ;;  %v4376_v51 = vld [vmem:[#allocation3 + $0xc4] ss:$12 sps:$4 sm:$0xff]  }
 0xef6   :  { %v1620_v28 = vmul.f32 %v1612_v50, %v1612_v50  ;;  %v1616_v35 = vadd.f32 %v1615_v21, %v1490_v31  ;;  %v1617_v36 = vpop.f32.mrb[47].mxu1  ;;  %v4380_v21 = vld [vmem:[#allocation3 + $0xdc] ss:$12 sps:$4 sm:$0xff]   ;;  %2056 = vmatprep.subr.bf16.mxu1 %v4376_v51 }
 0xef7   :  { %v1621_v37 = vmul.f32 %v1614_v34, %v1614_v34  ;;  %v1618_v38 = vadd.f32 %v1617_v36, %v1494_v32 }
 0xef8   :  { %v1624_v39 = vmul.f32 %v1620_v28, %v1612_v50  ;;  %v1622_v40 = vmul.f32 %v1616_v35, %v1616_v35  ;;  %v4381_v28 = vld [vmem:[#allocation3 + $0xe0] ss:$12 sps:$4 sm:$0xff]  }
 0xef9   :  { %v1625_v56 = vmul.f32 %v1621_v37, %v1614_v34  ;;  %v1623_v6 = vmul.f32 %v1618_v38, %v1618_v38 }
 0xefa   :  { %v1628_v11 = vmul.f32 0.044715, %v1624_v39  ;;  %v1626_v12 = vmul.f32 %v1622_v40, %v1616_v35 }
 0xefb   :  { %v1629_v41 = vmul.f32 0.044715, %v1625_v56  ;;  %v1627_v42 = vmul.f32 %v1623_v6, %v1618_v38  ;;  %v4384_v6 = vld [vmem:[#allocation3 + $0xf4] ss:$12 sps:$4 sm:$0xff]  }
 0xefc   :  { %v1632_v9 = vadd.f32 %v1628_v11, %v1612_v50  ;;  %v1630_v13 = vmul.f32 0.044715, %v1626_v12  ;;  %v4382_v11 = vld [vmem:[#allocation3 + $0xf0] ss:$12 sps:$4 sm:$0xff]   ;;  %v4385_v12 = vld [vmem:[#allocation3 + $0xf8] ss:$12 sps:$4 sm:$0xff]  }
 0xefd   :  { %v1633_v43 = vadd.f32 %v1629_v41, %v1614_v34  ;;  %v1631_v19 = vmul.f32 0.044715, %v1627_v42  ;;  %v4388_v41 = vld [vmem:[#allocation3 + $0x10c] ss:$12 sps:$4 sm:$0xff]   ;;  %v4386_v42 = vld [vmem:[#allocation3 + $0x108] ss:$12 sps:$4 sm:$0xff]  }
 0xefe   :  { %v1636_v44 = vmul.f32 0.7978846, %v1632_v9  ;;  %v1634_v45 = vadd.f32 %v1630_v13, %v1616_v35  ;;  %v4389_v9 = vld [vmem:[#allocation3 + $0x110] ss:$12 sps:$4 sm:$0xff]  }
 0xeff   :  { %v1637_v46 = vmul.f32 0.7978846, %v1633_v43  ;;  %v1635_v47 = vadd.f32 %v1631_v19, %v1618_v38  ;;  %v4392_v13 = vld [vmem:[#allocation3 + $0x124] ss:$12 sps:$4 sm:$0xff]   ;;  %v4390_v43 = vld [vmem:[#allocation3 + $0x120] ss:$12 sps:$4 sm:$0xff]  }
 0xf00   :  { %4494 = vtanh.f32 %v1636_v44  ;;  %v1638_v48 = vmul.f32 0.7978846, %v1634_v45  ;;  %v4393_v19 = vld [vmem:[#allocation3 + $0x128] ss:$12 sps:$4 sm:$0xff]   ;;  %v4394_v45 = vld [vmem:[#allocation3 + $0x138] ss:$12 sps:$4 sm:$0xff]  }
 0xf01   :  { %4496 = vtanh.f32 %v1637_v46  ;;  %v1639_v18 = vmul.f32 0.7978846, %v1635_v47  ;;  %v4396_v44 = vld [vmem:[#allocation3 + $0x13c] ss:$12 sps:$4 sm:$0xff]   ;;  %v4397_v46 = vld [vmem:[#allocation3 + $0x140] ss:$12 sps:$4 sm:$0xff]  }
 0xf02   :  { %4498 = vtanh.f32 %v1638_v48  ;;  %v4400_v47 = vld [vmem:[#allocation3 + $0x154] ss:$12 sps:$4 sm:$0xff]   ;;  %v4398_v48 = vld [vmem:[#allocation3 + $0x150] ss:$12 sps:$4 sm:$0xff]  }
 0xf03   :  { %4500 = vtanh.f32 %v1639_v18  ;;  %v4401_v18 = vld [vmem:[#allocation3 + $0x158] ss:$12 sps:$4 sm:$0xff]  }
 0xf0a   :  { %v4495_v49 = vpop.eup %4494 }
 0xf0b   :  { %v4497_v52 = vpop.eup %4496  ;;  %v1644_v53 = vadd.f32 1.0, %v4495_v49  ;;  %v4404_v49 = vld [vmem:[#allocation3 + $0x16c] ss:$12 sps:$4 sm:$0xff]  }
 0xf0c   :  { %v4499_v58 = vpop.eup %4498  ;;  %v1645_v60 = vadd.f32 1.0, %v4497_v52  ;;  %v4402_v52 = vld [vmem:[#allocation3 + $0x168] ss:$12 sps:$4 sm:$0xff]  }
 0xf0d   :  { %v4501_v61 = vpop.eup %4500  ;;  %v1648_v14 = vmul.f32 0.5, %v1644_v53  ;;  %v1646_v62 = vadd.f32 1.0, %v4499_v58  ;;  %v4405_v53 = vld [vmem:[#allocation3 + $0x170] ss:$12 sps:$4 sm:$0xff]  }
 0xf0e   :  { %v1647_v1 = vadd.f32 1.0, %v4501_v61  ;;  %v1649_v2 = vmul.f32 0.5, %v1645_v60 }
 0xf0f   :  { %v1650_v3 = vmul.f32 0.5, %v1646_v62  ;;  %v1652_v7 = vmul.f32 %v1648_v14, %v1612_v50  ;;  %v4374_v50 = vld [vmem:[#allocation3 + $0xc0] ss:$12 sps:$4 sm:$0xff]  }
 0xf10   :  { %v1651_v5 = vmul.f32 0.5, %v1647_v1  ;;  %v1653_v10 = vmul.f32 %v1649_v2, %v1614_v34  ;;  %v4377_v34 = vld [vmem:[#allocation3 + $0xc8] ss:$12 sps:$4 sm:$0xff]   ;;  %2057 = vmatpush1.bf16.msra.mxu1 %v4374_v50 }
 0xf11   :  { %v1654_v8 = vmul.f32 %v1650_v3, %v1616_v35  ;;  %v4378_v35 = vld [vmem:[#allocation3 + $0xd8] ss:$12 sps:$4 sm:$0xff]   ;;  %2058 = vmatprep.subr.bf16.mxu1 %v4380_v21 }
 0xf12   :  { %v1655_v15 = vmul.f32 %v1651_v5, %v1618_v38  ;;  %v3721_v3 = vld [vmem:[%s5433_s14] ss:$0 sm:$0xff] }
 0xf13   :  { %v1656_v16 = vpack.c.bf16 %v1654_v8, %v1652_v7 }
 0xf14   :  { %v1657_v17 = vpack.c.bf16 %v1655_v15, %v1653_v10  ;;  %2059 = vmatpush1.bf16.msra.mxu1 %v4378_v35  ;;  %v3722_v15 = vld [vmem:[%s5434_s15] ss:$0 sm:$0xff] }
 0xf15   :  { %2060 = vmatprep.subr.bf16.mxu1 %v4384_v6 }
 0xf16   :  { %1825 = vmatprep.mubr.bf16.mxu0 %v1657_v17 }
 0xf17   :  { %1826 = vmatmul.mubr.bf16.vlgmr.msra.gmra.mrb[32].mxu0 %v1656_v16 }
 0xf18   :  { %4163 = vmatprep.mubr.msk.bf16.mxu0 %vm4612_vm0, %v4610_v4  ;;  %4148 = vmatpush3.bf16.msra.mxu0 %v4377_v34 }
 0xf19   :  { %4149 = vmatprep.subr.bf16.mxu0 %v4610_v4  ;;  %2061 = vmatpush1.bf16.msra.mxu1 %v4382_v11 }
 0xf1a   :  { %2062 = vmatprep.subr.bf16.mxu1 %v4388_v41 }
 0xf1c   :  { %4150 = vmatpush3.bf16.msra.mxu0 %v4381_v28 }
 0xf1d   :  { %4151 = vmatprep.subr.bf16.mxu0 %v4610_v4  ;;  %2063 = vmatpush1.bf16.msra.mxu1 %v4386_v42 }
 0xf1e   :  { %2064 = vmatprep.subr.bf16.mxu1 %v4392_v13 }
 0xf20   :  { %4152 = vmatpush3.bf16.msra.mxu0 %v4385_v12  ;;  %v5147_v12 = vld [vmem:[%s5420_s1] ss:$0 sm:$0xff] }
 0xf21   :  { %4153 = vmatprep.subr.bf16.mxu0 %v4610_v4  ;;  %2065 = vmatpush1.bf16.msra.mxu1 %v4390_v43 }
 0xf22   :  { %2066 = vmatprep.subr.bf16.mxu1 %v4396_v44  ;;  %v5154_v44 = vld [vmem:[%s5420_s1 + $0x1] ss:$0 sm:$0xff] }
 0xf24   :  { %4154 = vmatpush3.bf16.msra.mxu0 %v4389_v9 }
 0xf25   :  { %4155 = vmatprep.subr.bf16.mxu0 %v4610_v4  ;;  %2067 = vmatpush1.bf16.msra.mxu1 %v4394_v45 }
 0xf26   :  { %2068 = vmatprep.subr.bf16.mxu1 %v4400_v47 }
 0xf28   :  { %4156 = vmatpush3.bf16.msra.mxu0 %v4393_v19 }
 0xf29   :  { %4157 = vmatprep.subr.bf16.mxu0 %v4610_v4  ;;  %2069 = vmatpush1.bf16.msra.mxu1 %v4398_v48 }
 0xf2a   :  { %2070 = vmatprep.subr.bf16.mxu1 %v4404_v49 }
 0xf2c   :  { %4158 = vmatpush3.bf16.msra.mxu0 %v4397_v46 }
 0xf2d   :  { %4159 = vmatprep.subr.bf16.mxu0 %v4610_v4  ;;  %2071 = vmatpush1.bf16.msra.mxu1 %v4402_v52 }
 0xf2e   :  { %4167 = vmatprep.subr.bf16.mxu1 %v4610_v4 }
 0xf30   :  { %4160 = vmatpush3.bf16.msra.mxu0 %v4401_v18 }
 0xf31   :  { %4161 = vmatprep.subr.bf16.mxu0 %v4610_v4 }
 0xf34   :  { %4162 = vmatpush3.bf16.msra.mxu0 %v4405_v53 }
 0xf35   :  { %4191 = vmatprep.subr.bf16.mxu0 %v4610_v4 }
 0xfea   :  { %v3933_v20 = vpop.f32.mrb[32].mxu0 }
 0xfeb   :  { %v3934_v23 = vpop.f32.mrb[33].mxu0 }
 0xfec   :  { %v3935_v24 = vadd.f32 %v3934_v23, %v3933_v20  ;;  %v3936_v25 = vpop.f32.mrb[34].mxu0  ;;  %v3723_v23 = vld [vmem:[%s5424_s5 + $0x3] sm:$0x7] }
 0xfed   :  { %v3937_v26 = vpop.f32.mrb[35].mxu0  ;;  %v1916_v28 = vrot.slane %v3723_v23, %v4782_v59 }
 0xfee   :  { %v1828_v27 = vadd.f32 %v3935_v24, %v3704_v22  ;;  %v3938_v29 = vadd.f32 %v3937_v26, %v3936_v25  ;;  %v1920_v24 = vrot.slane %v3723_v23, %v4774_v55 }
 0xff0   :  { %v1831_v31 = vadd.f32 %v3938_v29, %v3704_v22  ;;  %v1834_v32 = vadd.f32 %v1828_v27, %v5063_v63  ;;  %v1924_v27 = vrot.slane %v3723_v23, %v172_v57 }
 0xff2   :  { %1838 = vadd.xlane.f32.xlu1 %v1834_v32  ;;  %v1835_v33 = vadd.f32 %v1831_v31, %v5065_v0 }
 0xff4   :  { %1840 = vadd.xlane.f32.xlu0 %v1835_v33 }
0x107f   :  { %v1839_v63 = vpop.xlane.xlu1 %1838 }
0x1080   :  { %v1842_v36 = vmul.f32 0.0078125, %v1839_v63 }
0x1081   :  { %v1841_v0 = vpop.xlane.xlu0 %1840 }
0x1082   :  { %v1844_v37 = vsub.f32 %v1834_v32, %v1842_v36  ;;  %v1843_v38 = vmul.f32 0.0078125, %v1841_v0 }
0x1084   :  { %v1845_v39 = vsub.f32 %v1835_v33, %v1843_v38  ;;  %v1846_v40 = vmul.f32 %v1844_v37, %v1844_v37 }
0x1086   :  { %1848 = vadd.xlane.f32.xlu1 %v1846_v40  ;;  %v1847_v56 = vmul.f32 %v1845_v39, %v1845_v39 }
0x1088   :  { %1850 = vadd.xlane.f32.xlu0 %v1847_v56 }
0x1113   :  { %v1849_v58 = vpop.xlane.xlu1 %1848 }
0x1114   :  { %v1852_v60 = vmul.f32 0.0078125, %v1849_v58 }
0x1115   :  { %v1851_v61 = vpop.xlane.xlu0 %1850 }
0x1116   :  { %v1854_v14 = vadd.f32 1e-12, %v1852_v60  ;;  %v1853_v62 = vmul.f32 0.0078125, %v1851_v61 }
0x1118   :  { %4502 = vrsqrt.f32 %v1854_v14  ;;  %v1855_v1 = vadd.f32 1e-12, %v1853_v62 }
0x111a   :  { %4504 = vrsqrt.f32 %v1855_v1 }
0x1122   :  { %v4503_v2 = vpop.eup %4502 }
0x1123   :  { %v1858_v5 = vmul.f32 %v4503_v2, %v1844_v37 }
0x1124   :  { %v4505_v7 = vpop.eup %4504 }
0x1125   :  { %v1859_v8 = vmul.f32 %v4505_v7, %v1845_v39  ;;  %v1866_v10 = vmul.f32 %v3721_v3, %v1858_v5 }
0x1127   :  { %v1867_v16 = vmul.f32 %v3721_v3, %v1859_v8  ;;  %v5098_v17 = vadd.f32 %v3722_v15, %v1866_v10 }
0x1129   :  { %v5100_v20 = vadd.f32 %v3722_v15, %v1867_v16 }
0x112b   :  { %v1876_v22 = vpack.c.bf16 %v5100_v20, %v5098_v17 }
0x112d   :  { %2089 = vmatmul.mubr.bf16.vlgmr.msra.gmra.mrb[48].mxu1 %v1876_v22  ;;  %4164 = vmatmul.mubr.bf16.vlgmr.msra.gmra.mrb[36].mxu0 %v1876_v22 }
0x112e   :  { %4169 = vmatprep.mubr.msk.bf16.mxu1 %vm4612_vm0, %v4610_v4  ;;  %4193 = vmatprep.mubr.msk.bf16.mxu0 %vm4612_vm0, %v4610_v4 }
0x1200   :  { %v2090_v25 = vpop.f32.mrb[48].mxu1  ;;  %v2133_v26 = vpop.f32.mrb[36].mxu0 }
0x1201   :  { %v2092_v29 = vpop.f32.mrb[49].mxu1  ;;  %v4165_v31 = vpop.f32.mrb[37].mxu0  ;;  %v2091_v54 = vadd.f32 %v2090_v25, %v1916_v28  ;;  %v2134_v37 = vadd.f32 %v2133_v26, %v1924_v27 }
0x1202   :  { %v2093_v32 = vadd.f32 %v2092_v29, %v1920_v24  ;;  %v2094_v33 = vpop.f32.mrb[50].mxu1  ;;  %v2136_v50 = vpop.f32.mrb[38].mxu0 }
0x1203   :  { %v5114_v51 = vadd.f32 %v2136_v50, %v1924_v27  ;;  %v2096_v34 = vpop.f32.mrb[51].mxu1  ;;  %v4166_v21 = vpop.f32.mrb[39].mxu0  ;;  %v5124_v0 = vpack.c.bf16 %v2091_v54, %v2091_v54  ;;  %v2095_v39 = vadd.f32 %v2094_v33, %v1916_v28  ;;  %v5133_v40 = vpack.c.bf16 %v2134_v37, %v2134_v37 }
0x1204   :  { %v5117_v35 = vpack.c.bf16 %v2093_v32, %v2093_v32  ;;  %v2097_v63 = vadd.f32 %v2096_v34, %v1920_v24 }
0x1205   :  { %v5135_v56 = vpack.c.bf16 %v2095_v39, %v2095_v39  ;;  %v2278_v6 = vsel %vm540_vm2, %v5133_v40, 0  ;;  %v5172_v15 = vpack.c.bf16 %v5114_v51, %v5114_v51 }
0x1206   :  { %v2162_v36 = vsel %vm419_vm1, %v5117_v35, 0  ;;  %v5122_v57 = vpack.c.bf16 %v2097_v63, %v2097_v63 }
0x1207   :  { %4168 = vmatpush3.bf16.xpose.msra.mxu1 %v2162_v36  ;;  %v2324_v24 = vsel %vm540_vm2, %v5172_v15, 0 }
0x1208   :  { %4173 = vmatprep.subr.bf16.mxu1 %v4610_v4  ;;  %v2208_v38 = vsel %vm419_vm1, %v5122_v57, 0 }
0x120e   :  { %4170 = vmatmul.mubr.msk.bf16.vlgmr.msra.gmra.mrb[52].mxu1 %vm419_vm1, %v5124_v0 }
0x120f   :  { %4174 = vmatpush3.bf16.xpose.msra.mxu1 %v2208_v38  ;;  %4175 = vmatprep.mubr.msk.bf16.mxu1 %vm4612_vm0, %v4610_v4 }
0x1210   :  { %4179 = vmatprep.subr.bf16.mxu1 %v4610_v4 }
0x1216   :  { %4176 = vmatmul.mubr.msk.bf16.vlgmr.msra.gmra.mrb[56].mxu1 %vm419_vm1, %v5135_v56 }
0x1217   :  { %4180 = vmatpush3.bf16.msra.mxu1 %v2278_v6  ;;  %4181 = vmatprep.mubr.msk.bf16.mxu1 %vm4612_vm0, %v4610_v4 }
0x1218   :  { %4185 = vmatprep.subr.bf16.mxu1 %v4610_v4 }
0x12e1   :  { %v2198_v11 = vpop.f32.mrb[52].mxu1 }
0x12e2   :  { %v2199_v41 = vadd.f32 %v5147_v12, %v2198_v11  ;;  %v4171_v42 = vpop.f32.mrb[53].mxu1 }
0x12e3   :  { %v2201_v9 = vpop.f32.mrb[54].mxu1 }
0x12e4   :  { %v4172_v13 = vpop.f32.mrb[55].mxu1  ;;  %v2250_v43 = vsel %vm512_vm3, %v2199_v41, -inf }
0x12e5   :  { %2251 = vmax.xlane.f32.xlu1 %v2250_v43 }
0x12e9   :  { %v2244_v19 = vpop.f32.mrb[56].mxu1 }
0x12ea   :  { %v2245_v45 = vadd.f32 %v5154_v44, %v2244_v19  ;;  %v4177_v46 = vpop.f32.mrb[57].mxu1 }
0x12eb   :  { %v2247_v47 = vpop.f32.mrb[58].mxu1 }
0x12ec   :  { %v4178_v48 = vpop.f32.mrb[59].mxu1  ;;  %v2253_v18 = vsel %vm512_vm3, %v2245_v45, -inf }
0x12ed   :  { %2254 = vmax.xlane.f32.xlu0 %v2253_v18 }
0x1372   :  { %v2252_v49 = vpop.xlane.xlu1 %2251 }
0x1373   :  { %v2256_v52 = vsub.f32 %v2199_v41, %v2252_v49 }
0x1375   :  { %v2258_v53 = vmul.f32 1.442695, %v2256_v52 }
0x1377   :  { %4506 = vpow2.f32 %v2258_v53 }
0x137a   :  { %v2255_v58 = vpop.xlane.xlu0 %2254 }
0x137b   :  { %v2257_v60 = vsub.f32 %v2245_v45, %v2255_v58 }
0x137d   :  { %v2260_v61 = vmul.f32 1.442695, %v2257_v60 }
0x137f   :  { %4508 = vpow2.f32 %v2260_v61 }
0x1381   :  { %v4507_v14 = vpop.eup %4506 }
0x1382   :  { %v2262_v62 = vsel %vm512_vm3, %v4507_v14, 0.0 }
0x1383   :  { %2263 = vadd.xlane.f32.xlu1 %v2262_v62 }
0x1389   :  { %v4509_v1 = vpop.eup %4508 }
0x138a   :  { %v2265_v2 = vsel %vm512_vm3, %v4509_v1, 0.0 }
0x138b   :  { %2266 = vadd.xlane.f32.xlu0 %v2265_v2 }
0x1394   :  { %2370 = vrot.lane.b32.xlu1 %v5117_v35, %s4613_s22 }
0x1398   :  { %2368 = vrot.lane.b32.xlu1 %v5124_v0, %s4613_s22 }
0x139c   :  { %2418 = vrot.lane.b32.xlu1 %v5135_v56, %s4613_s22 }
0x13a1   :  { %2420 = vrot.lane.b32.xlu0 %v5122_v57, %s4613_s22 }
0x1410   :  { %v2264_v3 = vpop.xlane.xlu1 %2263 }
0x1411   :  { %4510 = vrcp.f32 %v2264_v3 }
0x1414   :  { %v2371_v5 = vpop.permute.xlu1 %2370 }
0x1415   :  { %v2376_v7 = vsel %vm419_vm1, %v2371_v5, 0 }
0x1416   :  { %4192 = vmatpush3.bf16.xpose.msra.mxu0 %v2376_v7 }
0x1417   :  { %4203 = vmatprep.subr.bf16.mxu0 %v4610_v4 }
0x1418   :  { %v2267_v8 = vpop.xlane.xlu0 %2266  ;;  %v2369_v22 = vpop.permute.xlu1 %2368 }
0x1419   :  { %4512 = vrcp.f32 %v2267_v8 }
0x141b   :  { %v4511_v10 = vpop.eup %4510 }
0x141c   :  { %v2270_v16 = vmul.f32 %v4511_v10, %v4507_v14  ;;  %v2421_v27 = vpop.permute.xlu0 %2420  ;;  %v2419_v32 = vpop.permute.xlu1 %2418 }
0x141d   :  { %4194 = vmatmul.mubr.msk.bf16.vlgmr.msra.gmra.mrb[40].mxu0 %vm419_vm1, %v2369_v22  ;;  %v2426_v31 = vsel %vm419_vm1, %v2421_v27, 0 }
0x141e   :  { %v2272_v23 = vpack.c.bf16 %v2270_v16, %v2270_v16  ;;  %4205 = vmatprep.mubr.msk.bf16.mxu0 %vm4612_vm0, %v4610_v4 }
0x1420   :  { %4182 = vmatmul.mubr.msk.bf16.vlgmr.msra.gmra.mrb[60].mxu1 %vm512_vm3, %v2272_v23 }
0x1421   :  { %4186 = vmatpush3.bf16.msra.mxu1 %v2324_v24  ;;  %4187 = vmatprep.mubr.msk.bf16.mxu1 %vm4612_vm0, %v4610_v4 }
0x1422   :  { %4197 = vmatprep.subr.bf16.mxu1 %v4610_v4 }
0x1423   :  { %v4513_v25 = vpop.eup %4512 }
0x1424   :  { %v2271_v26 = vmul.f32 %v4513_v25, %v4509_v1 }
0x1426   :  { %v2273_v29 = vpack.c.bf16 %v2271_v26, %v2271_v26 }
0x1428   :  { %4188 = vmatmul.mubr.msk.bf16.vlgmr.msra.gmra.mrb[64].mxu1 %vm512_vm3, %v2273_v29 }
0x1429   :  { %4199 = vmatprep.mubr.msk.bf16.mxu1 %vm4612_vm0, %v4610_v4 }
0x142a   :  { %4198 = vmatpush3.bf16.xpose.msra.mxu1 %v2426_v31 }
0x142b   :  { %4209 = vmatprep.subr.bf16.mxu1 %v4610_v4 }
0x1431   :  { %4200 = vmatmul.mubr.msk.bf16.vlgmr.msra.gmra.mrb[68].mxu1 %vm419_vm1, %v2419_v32 }
0x1432   :  { %4211 = vmatprep.mubr.msk.bf16.mxu1 %vm4612_vm0, %v4610_v4 }
0x14f0   :  { %v2412_v33 = vpop.f32.mrb[40].mxu0 }
0x14f1   :  { %v2413_v50 = vadd.f32 %v5147_v12, %v2412_v33  ;;  %v4195_v51 = vpop.f32.mrb[41].mxu0 }
0x14f2   :  { %v2415_v34 = vpop.f32.mrb[42].mxu0 }
0x14f3   :  { %v2314_v21 = vpop.f32.mrb[60].mxu1  ;;  %v4196_v28 = vpop.f32.mrb[43].mxu0  ;;  %v2468_v63 = vsel %vm512_vm3, %v2413_v50, -inf }
0x14f4   :  { %2469 = vmax.xlane.f32.xlu1 %v2468_v63  ;;  %v4183_v36 = vpop.f32.mrb[61].mxu1 }
0x14f5   :  { %v2317_v54 = vpop.f32.mrb[62].mxu1 }
0x14f6   :  { %v4184_v37 = vpop.f32.mrb[63].mxu1 }
0x14fb   :  { %v2360_v38 = vpop.f32.mrb[64].mxu1 }
0x14fc   :  { %v2366_v39 = vpack.c.bf16 %v2360_v38, %v2314_v21  ;;  %v4189_v6 = vpop.f32.mrb[65].mxu1 }
0x14fd   :  { %v2363_v11 = vpop.f32.mrb[66].mxu1 }
0x14fe   :  { %2367 = vst.msk [vmem:[#allocation2] sm:$0xff] %vm419_vm1, %v2366_v39  ;;  %v4190_v41 = vpop.f32.mrb[67].mxu1 }
0x1504   :  { %v2462_v42 = vpop.f32.mrb[68].mxu1 }
0x1505   :  { %v2463_v9 = vadd.f32 %v5154_v44, %v2462_v42  ;;  %v4201_v13 = vpop.f32.mrb[69].mxu1  ;;  %2492 = vrot.lane.b32.xlu1 %v5133_v40, %s4613_s22 }
0x1506   :  { %v2465_v43 = vpop.f32.mrb[70].mxu1 }
0x1507   :  { %v4202_v19 = vpop.f32.mrb[71].mxu1  ;;  %v2471_v45 = vsel %vm512_vm3, %v2463_v9, -inf }
0x1508   :  { %2472 = vmax.xlane.f32.xlu0 %v2471_v45 }
0x1509   :  { %2596 = vrot.lane.b32.xlu1 %v5117_v35, %s4608_s4 }
0x150d   :  { %2646 = vrot.lane.b32.xlu1 %v5122_v57, %s4608_s4 }
0x1511   :  { %2594 = vrot.lane.b32.xlu1 %v5124_v0, %s4608_s4 }
0x1581   :  { %v2470_v46 = vpop.xlane.xlu1 %2469 }
0x1582   :  { %v2474_v47 = vsub.f32 %v2413_v50, %v2470_v46 }
0x1584   :  { %v2476_v48 = vmul.f32 1.442695, %v2474_v47 }
0x1585   :  { %v2493_v18 = vpop.permute.xlu1 %2492 }
0x1586   :  { %4514 = vpow2.f32 %v2476_v48  ;;  %v2498_v49 = vsel %vm540_vm2, %v2493_v18, 0 }
0x1587   :  { %4204 = vmatpush3.bf16.msra.mxu0 %v2498_v49 }
0x1588   :  { %4215 = vmatprep.subr.bf16.mxu0 %v4610_v4 }
0x1589   :  { %v2597_v3 = vpop.permute.xlu1 %2596 }
0x158a   :  { %v2602_v8 = vsel %vm419_vm1, %v2597_v3, 0 }
0x158d   :  { %v2647_v10 = vpop.permute.xlu1 %2646 }
0x158e   :  { %v2652_v29 = vsel %vm419_vm1, %v2647_v10, 0 }
0x1590   :  { %v4515_v52 = vpop.eup %4514 }
0x1591   :  { %v2480_v53 = vsel %vm512_vm3, %v4515_v52, 0.0  ;;  %v2595_v22 = vpop.permute.xlu1 %2594 }
0x1592   :  { %2481 = vadd.xlane.f32.xlu0 %v2480_v53 }
0x1595   :  { %v2473_v58 = vpop.xlane.xlu0 %2472 }
0x1596   :  { %v2475_v60 = vsub.f32 %v2463_v9, %v2473_v58 }
0x1598   :  { %v2478_v61 = vmul.f32 1.442695, %v2475_v60 }
0x159a   :  { %4516 = vpow2.f32 %v2478_v61 }
0x15a4   :  { %v4517_v14 = vpop.eup %4516 }
0x15a5   :  { %v2483_v62 = vsel %vm512_vm3, %v4517_v14, 0.0 }
0x15a6   :  { %2484 = vadd.xlane.f32.xlu0 %v2483_v62 }
0x15bc   :  { %2540 = vrot.lane.b32.xlu0 %v5172_v15, %s4613_s22 }
0x15c0   :  { %2644 = vrot.lane.b32.xlu0 %v5135_v56, %s4608_s4 }
0x161f   :  { %v2482_v1 = vpop.xlane.xlu0 %2481 }
0x1620   :  { %4518 = vrcp.f32 %v2482_v1 }
0x162a   :  { %v4519_v2 = vpop.eup %4518 }
0x162b   :  { %v2488_v5 = vmul.f32 %v4519_v2, %v4515_v52 }
0x162d   :  { %v2490_v7 = vpack.c.bf16 %v2488_v5, %v2488_v5 }
0x162f   :  { %4206 = vmatmul.mubr.msk.bf16.vlgmr.msra.gmra.mrb[44].mxu0 %vm512_vm3, %v2490_v7 }
0x1630   :  { %4216 = vmatpush3.bf16.xpose.msra.mxu0 %v2602_v8  ;;  %4217 = vmatprep.mubr.msk.bf16.mxu0 %vm4612_vm0, %v4610_v4 }
0x1631   :  { %4227 = vmatprep.subr.bf16.mxu0 %v4610_v4 }
0x1633   :  { %v2485_v16 = vpop.xlane.xlu0 %2484 }
0x1634   :  { %4520 = vrcp.f32 %v2485_v16 }
0x1637   :  { %v2541_v23 = vpop.permute.xlu0 %2540  ;;  %4218 = vmatmul.mubr.msk.bf16.vlgmr.msra.gmra.mrb[48].mxu0 %vm419_vm1, %v2595_v22 }
0x1638   :  { %v2546_v24 = vsel %vm540_vm2, %v2541_v23, 0  ;;  %4229 = vmatprep.mubr.msk.bf16.mxu0 %vm4612_vm0, %v4610_v4 }
0x1639   :  { %4210 = vmatpush3.bf16.msra.mxu1 %v2546_v24 }
0x163a   :  { %4221 = vmatprep.subr.bf16.mxu1 %v4610_v4 }
0x163b   :  { %v2645_v31 = vpop.permute.xlu0 %2644 }
0x163e   :  { %v4521_v25 = vpop.eup %4520 }
0x163f   :  { %v2489_v26 = vmul.f32 %v4521_v25, %v4517_v14 }
0x1641   :  { %v2491_v27 = vpack.c.bf16 %v2489_v26, %v2489_v26 }
0x1643   :  { %4212 = vmatmul.mubr.msk.bf16.vlgmr.msra.gmra.mrb[72].mxu1 %vm512_vm3, %v2491_v27 }
0x1644   :  { %4222 = vmatpush3.bf16.xpose.msra.mxu1 %v2652_v29  ;;  %4223 = vmatprep.mubr.msk.bf16.mxu1 %vm4612_vm0, %v4610_v4 }
0x1645   :  { %4233 = vmatprep.subr.bf16.mxu1 %v4610_v4 }
0x164b   :  { %4224 = vmatmul.mubr.msk.bf16.vlgmr.msra.gmra.mrb[76].mxu1 %vm419_vm1, %v2645_v31 }
0x164c   :  { %4235 = vmatprep.mubr.msk.bf16.mxu1 %vm4612_vm0, %v4610_v4 }
0x1702   :  { %v5230_v32 = vpop.f32.mrb[44].mxu0 }
0x1703   :  { %v4207_v33 = vpop.f32.mrb[45].mxu0 }
0x1704   :  { %v2537_v50 = vpop.f32.mrb[46].mxu0 }
0x1705   :  { %v4208_v51 = vpop.f32.mrb[47].mxu0 }
0x170a   :  { %v2638_v34 = vpop.f32.mrb[48].mxu0 }
0x170b   :  { %v2639_v21 = vadd.f32 %v5147_v12, %v2638_v34  ;;  %v4219_v28 = vpop.f32.mrb[49].mxu0 }
0x170c   :  { %v2641_v63 = vpop.f32.mrb[50].mxu0 }
0x170d   :  { %v4220_v36 = vpop.f32.mrb[51].mxu0  ;;  %v2694_v54 = vsel %vm512_vm3, %v2639_v21, -inf }
0x170e   :  { %2695 = vmax.xlane.f32.xlu1 %v2694_v54 }
0x1716   :  { %v5234_v37 = vpop.f32.mrb[72].mxu1 }
0x1717   :  { %v2588_v38 = vpack.c.bf16 %v5234_v37, %v5230_v32  ;;  %v4213_v39 = vpop.f32.mrb[73].mxu1 }
0x1718   :  { %v2585_v6 = vpop.f32.mrb[74].mxu1 }
0x1719   :  { %v4214_v11 = vpop.f32.mrb[75].mxu1 }
0x171e   :  { %v2688_v41 = vpop.f32.mrb[76].mxu1 }
0x171f   :  { %v2689_v42 = vadd.f32 %v5154_v44, %v2688_v41  ;;  %v4225_v9 = vpop.f32.mrb[77].mxu1  ;;  %2718 = vrot.lane.b32.xlu1 %v5133_v40, %s4608_s4 }
0x1720   :  { %v2691_v13 = vpop.f32.mrb[78].mxu1 }
0x1721   :  { %v4226_v43 = vpop.f32.mrb[79].mxu1  ;;  %v2697_v19 = vsel %vm512_vm3, %v2689_v42, -inf }
0x1722   :  { %2698 = vmax.xlane.f32.xlu0 %v2697_v19 }
0x1723   :  { %2822 = vrot.lane.b32.xlu1 %v5117_v35, %s4614_s0 }
0x1727   :  { %2872 = vrot.lane.b32.xlu1 %v5122_v57, %s4614_s0 }
0x172b   :  { %2820 = vrot.lane.b32.xlu1 %v5124_v0, %s4614_s0 }
0x179b   :  { %v2696_v45 = vpop.xlane.xlu1 %2695 }
0x179c   :  { %v2700_v46 = vsub.f32 %v2639_v21, %v2696_v45 }
0x179e   :  { %v2702_v47 = vmul.f32 1.442695, %v2700_v46 }
0x179f   :  { %v2719_v48 = vpop.permute.xlu1 %2718 }
0x17a0   :  { %4522 = vpow2.f32 %v2702_v47  ;;  %v2724_v18 = vsel %vm540_vm2, %v2719_v48, 0 }
0x17a1   :  { %4228 = vmatpush3.bf16.msra.mxu0 %v2724_v18 }
0x17a2   :  { %4239 = vmatprep.subr.bf16.mxu0 %v4610_v4 }
0x17a3   :  { %v2823_v14 = vpop.permute.xlu1 %2822 }
0x17a4   :  { %v2828_v2 = vsel %vm419_vm1, %v2823_v14, 0 }
0x17a7   :  { %v2873_v3 = vpop.permute.xlu1 %2872 }
0x17a8   :  { %v2878_v23 = vsel %vm419_vm1, %v2873_v3, 0  ;;  %v4410_v3 = vld [vmem:[%s5425_s6 + $0x60] sm:$0xff]  }
0x17aa   :  { %v4523_v49 = vpop.eup %4522 }
0x17ab   :  { %v2706_v52 = vsel %vm512_vm3, %v4523_v49, 0.0 }
0x17ac   :  { %2707 = vadd.xlane.f32.xlu0 %v2706_v52 }
0x17af   :  { %v2699_v35 = vpop.xlane.xlu0 %2698 }
0x17b0   :  { %v2701_v53 = vsub.f32 %v2689_v42, %v2699_v35 }
0x17b2   :  { %v2704_v57 = vmul.f32 1.442695, %v2701_v53 }
0x17b4   :  { %4524 = vpow2.f32 %v2704_v57 }
0x17be   :  { %v4525_v58 = vpop.eup %4524 }
0x17bf   :  { %v2709_v0 = vsel %vm512_vm3, %v4525_v58, 0.0 }
0x17c0   :  { %2710 = vadd.xlane.f32.xlu0 %v2709_v0 }
0x17d6   :  { %2766 = vrot.lane.b32.xlu0 %v5172_v15, %s4608_s4 }
0x17da   :  { %2870 = vrot.lane.b32.xlu0 %v5135_v56, %s4614_s0  ;;  %v2821_v56 = vpop.permute.xlu1 %2820 }
0x1839   :  { %v2708_v60 = vpop.xlane.xlu0 %2707 }
0x183a   :  { %4526 = vrcp.f32 %v2708_v60 }
0x1844   :  { %v4527_v61 = vpop.eup %4526 }
0x1845   :  { %v2714_v62 = vmul.f32 %v4527_v61, %v4523_v49 }
0x1847   :  { %v2716_v1 = vpack.c.bf16 %v2714_v62, %v2714_v62 }
0x1849   :  { %4230 = vmatmul.mubr.msk.bf16.vlgmr.msra.gmra.mrb[52].mxu0 %vm512_vm3, %v2716_v1  ;;  %v4407_v1 = vld [vmem:[%s5425_s6 + $0x48] sm:$0xff]  }
0x184a   :  { %4240 = vmatpush3.bf16.xpose.msra.mxu0 %v2828_v2  ;;  %4241 = vmatprep.mubr.msk.bf16.mxu0 %vm4612_vm0, %v4610_v4  ;;  %v4408_v2 = vld [vmem:[%s5425_s6 + $0x50] sm:$0xff]  }
0x184b   :  { %4251 = vmatprep.subr.bf16.mxu0 %v4610_v4 }
0x184d   :  { %v2711_v5 = vpop.xlane.xlu0 %2710 }
0x184e   :  { %4528 = vrcp.f32 %v2711_v5  ;;  %v4411_v5 = vld [vmem:[%s5425_s6 + $0x68] sm:$0xff]  }
0x1851   :  { %v2767_v7 = vpop.permute.xlu0 %2766  ;;  %4242 = vmatmul.mubr.msk.bf16.vlgmr.msra.gmra.mrb[56].mxu0 %vm419_vm1, %v2821_v56 }
0x1852   :  { %v2772_v8 = vsel %vm540_vm2, %v2767_v7, 0  ;;  %4253 = vmatprep.mubr.msk.bf16.mxu0 %vm4612_vm0, %v4610_v4 }
0x1853   :  { %4234 = vmatpush3.bf16.msra.mxu1 %v2772_v8 }
0x1854   :  { %4245 = vmatprep.subr.bf16.mxu1 %v4610_v4 }
0x1855   :  { %v2871_v24 = vpop.permute.xlu0 %2870 }
0x1858   :  { %v4529_v10 = vpop.eup %4528 }
0x1859   :  { %v2715_v16 = vmul.f32 %v4529_v10, %v4525_v58 }
0x185b   :  { %v2717_v22 = vpack.c.bf16 %v2715_v16, %v2715_v16  ;;  %v4412_v16 = vld [vmem:[%s5425_s6 + $0x70] sm:$0xff]  }
0x185d   :  { %4236 = vmatmul.mubr.msk.bf16.vlgmr.msra.gmra.mrb[80].mxu1 %vm512_vm3, %v2717_v22  ;;  %v4413_v22 = vld [vmem:[%s5425_s6 + $0x78] sm:$0xff]  }
0x185e   :  { %4246 = vmatpush3.bf16.xpose.msra.mxu1 %v2878_v23  ;;  %4247 = vmatprep.mubr.msk.bf16.mxu1 %vm4612_vm0, %v4610_v4 }
0x185f   :  { %4257 = vmatprep.subr.bf16.mxu1 %v4610_v4 }
0x1865   :  { %4248 = vmatmul.mubr.msk.bf16.vlgmr.msra.gmra.mrb[84].mxu1 %vm419_vm1, %v2871_v24 }
0x1866   :  { %4259 = vmatprep.mubr.msk.bf16.mxu1 %vm4612_vm0, %v4610_v4 }
0x191c   :  { %v2760_v25 = vpop.f32.mrb[52].mxu0 }
0x191d   :  { %v4231_v26 = vpop.f32.mrb[53].mxu0 }
0x191e   :  { %v2763_v27 = vpop.f32.mrb[54].mxu0 }
0x191f   :  { %v4232_v29 = vpop.f32.mrb[55].mxu0 }
0x1924   :  { %v2864_v31 = vpop.f32.mrb[56].mxu0 }
0x1925   :  { %v2865_v33 = vadd.f32 %v5147_v12, %v2864_v31  ;;  %v4243_v50 = vpop.f32.mrb[57].mxu0 }
0x1926   :  { %v2867_v51 = vpop.f32.mrb[58].mxu0 }
0x1927   :  { %v4244_v34 = vpop.f32.mrb[59].mxu0  ;;  %v2920_v21 = vsel %vm512_vm3, %v2865_v33, -inf }
0x1928   :  { %2921 = vmax.xlane.f32.xlu1 %v2920_v21 }
0x1930   :  { %v2808_v28 = vpop.f32.mrb[80].mxu1 }
0x1931   :  { %v2814_v63 = vpack.c.bf16 %v2808_v28, %v2760_v25  ;;  %v4237_v36 = vpop.f32.mrb[81].mxu1 }
0x1932   :  { %v2811_v54 = vpop.f32.mrb[82].mxu1 }
0x1933   :  { %v4238_v39 = vpop.f32.mrb[83].mxu1  ;;  %v4414_v54 = vld [vmem:[%s5429_s10 + $0x80] ss:$8 sps:$4 sm:$0xff]  }
0x1934   :  { %v4416_v39 = vld [vmem:[%s5429_s10 + $0x84] ss:$8 sps:$4 sm:$0xff]  }
0x1938   :  { %v2914_v6 = vpop.f32.mrb[84].mxu1 }
0x1939   :  { %v2915_v11 = vadd.f32 %v5154_v44, %v2914_v6  ;;  %v4249_v41 = vpop.f32.mrb[85].mxu1  ;;  %2944 = vrot.lane.b32.xlu1 %v5133_v40, %s4614_s0  ;;  %v4419_v6 = vld [vmem:[%s5429_s10 + $0x94] ss:$8 sps:$4 sm:$0xff]  }
0x193a   :  { %v2917_v42 = vpop.f32.mrb[86].mxu1 }
0x193b   :  { %v4250_v12 = vpop.f32.mrb[87].mxu1  ;;  %v2923_v9 = vsel %vm512_vm3, %v2915_v11, -inf }
0x193c   :  { %2924 = vmax.xlane.f32.xlu0 %v2923_v9 }
0x193d   :  { %2590 = vrot.lane.b32.xlu1 %v2588_v38, %s4614_s0 }
0x1941   :  { %2816 = vrot.lane.b32.xlu1 %v2814_v63, %s4608_s4 }
0x19b5   :  { %v2922_v13 = vpop.xlane.xlu1 %2921 }
0x19b6   :  { %v2926_v43 = vsub.f32 %v2865_v33, %v2922_v13  ;;  %v3787_v33 = vld [vmem:[%s5426_s7 + $0x1] ss:$0 sm:$0xff] }
0x19b8   :  { %v2928_v19 = vmul.f32 1.442695, %v2926_v43 }
0x19b9   :  { %v2945_v44 = vpop.permute.xlu1 %2944 }
0x19ba   :  { %4530 = vpow2.f32 %v2928_v19  ;;  %v2950_v45 = vsel %vm540_vm2, %v2945_v44, 0  ;;  %v4422_v19 = vld [vmem:[%s5429_s10 + $0xa4] ss:$8 sps:$4 sm:$0xff]   ;;  %v4420_v44 = vld [vmem:[%s5429_s10 + $0xa0] ss:$8 sps:$4 sm:$0xff]  }
0x19bb   :  { %4252 = vmatpush3.bf16.msra.mxu0 %v2950_v45  ;;  %v4425_v45 = vld [vmem:[%s5429_s10 + $0xb4] ss:$8 sps:$4 sm:$0xff]  }
0x19bc   :  { %4263 = vmatprep.subr.bf16.mxu0 %v4610_v4 }
0x19bd   :  { %v2591_v40 = vpop.permute.xlu1 %2590 }
0x19be   :  { %2593 = vst.msk [vmem:[#allocation2] sm:$0xff] %vm857_vm4, %v2591_v40  ;;  %v4423_v40 = vld [vmem:[%s5429_s10 + $0xb0] ss:$8 sps:$4 sm:$0xff]  }
0x19c1   :  { %v2817_v46 = vpop.permute.xlu1 %2816 }
0x19c2   :  { %2819 = vst.msk [vmem:[#allocation2] sm:$0xff] %vm1084_vm5, %v2817_v46  ;;  %v4428_v46 = vld [vmem:[%s5429_s10 + $0xc4] ss:$8 sps:$4 sm:$0xff]  }
0x19c4   :  { %v4531_v32 = vpop.eup %4530 }
0x19c5   :  { %v2932_v37 = vsel %vm512_vm3, %v4531_v32, 0.0 }
0x19c6   :  { %2933 = vadd.xlane.f32.xlu0 %v2932_v37  ;;  %v4431_v37 = vld [vmem:[%s5429_s10 + $0xd4] ss:$8 sps:$4 sm:$0xff]  }
0x19c9   :  { %v2925_v38 = vpop.xlane.xlu0 %2924 }
0x19ca   :  { %v2927_v47 = vsub.f32 %v2915_v11, %v2925_v38  ;;  %v4429_v38 = vld [vmem:[%s5429_s10 + $0xd0] ss:$8 sps:$4 sm:$0xff]  }
0x19cc   :  { %v2930_v48 = vmul.f32 1.442695, %v2927_v47  ;;  %v4434_v47 = vld [vmem:[%s5429_s10 + $0xe4] ss:$8 sps:$4 sm:$0xff]  }
0x19ce   :  { %4532 = vpow2.f32 %v2930_v48  ;;  %v4432_v48 = vld [vmem:[%s5429_s10 + $0xe0] ss:$8 sps:$4 sm:$0xff]  }
0x19d8   :  { %v4533_v18 = vpop.eup %4532 }
0x19d9   :  { %v2935_v49 = vsel %vm512_vm3, %v4533_v18, 0.0 }
0x19da   :  { %2936 = vadd.xlane.f32.xlu0 %v2935_v49  ;;  %v4435_v49 = vld [vmem:[%s5429_s10 + $0xf0] ss:$8 sps:$4 sm:$0xff]  }
0x19f0   :  { %2992 = vrot.lane.b32.xlu0 %v5172_v15, %s4614_s0  ;;  %v4406_v15 = vld [vmem:[%s5425_s6 + $0x40] sm:$0xff]  }
0x1a53   :  { %v2934_v52 = vpop.xlane.xlu0 %2933 }
0x1a54   :  { %4534 = vrcp.f32 %v2934_v52 }
0x1a5e   :  { %v4535_v35 = vpop.eup %4534 }
0x1a5f   :  { %v2940_v53 = vmul.f32 %v4535_v35, %v4531_v32  ;;  %v4426_v32 = vld [vmem:[%s5429_s10 + $0xc0] ss:$8 sps:$4 sm:$0xff]  }
0x1a61   :  { %v2942_v57 = vpack.c.bf16 %v2940_v53, %v2940_v53 }
0x1a63   :  { %4254 = vmatmul.mubr.msk.bf16.vlgmr.msra.gmra.mrb[60].mxu0 %vm512_vm3, %v2942_v57 }
0x1a64   :  { %4279 = vmatprep.mubr.msk.bf16.mxu0 %vm4612_vm0, %v4610_v4  ;;  %4264 = vmatpush3.bf16.msra.mxu0 %v4406_v15 }
0x1a65   :  { %4265 = vmatprep.subr.bf16.mxu0 %v4610_v4 }
0x1a67   :  { %v2937_v58 = vpop.xlane.xlu0 %2936 }
0x1a68   :  { %4536 = vrcp.f32 %v2937_v58  ;;  %4266 = vmatpush3.bf16.msra.mxu0 %v4407_v1 }
0x1a69   :  { %4267 = vmatprep.subr.bf16.mxu0 %v4610_v4 }
0x1a6b   :  { %v2993_v0 = vpop.permute.xlu0 %2992 }
0x1a6c   :  { %v2998_v60 = vsel %vm540_vm2, %v2993_v0, 0  ;;  %4268 = vmatpush3.bf16.msra.mxu0 %v4408_v2  ;;  %v3799_v2 = vld [vmem:[%s5428_s9 + $0x1] ss:$0 sm:$0xff] }
0x1a6d   :  { %4258 = vmatpush3.bf16.msra.mxu1 %v2998_v60  ;;  %4269 = vmatprep.subr.bf16.mxu0 %v4610_v4 }
0x1a6e   :  { %3316 = vmatprep.subr.bf16.mxu1 %v4416_v39 }
0x1a72   :  { %v4537_v61 = vpop.eup %4536 }
0x1a73   :  { %v2941_v14 = vmul.f32 %v4537_v61, %v4533_v18  ;;  %v4437_v18 = vld [vmem:[%s5429_s10 + $0xf4] ss:$8 sps:$4 sm:$0xff]  }
0x1a75   :  { %v2943_v62 = vpack.c.bf16 %v2941_v14, %v2941_v14  ;;  %v3798_v14 = vld [vmem:[%s5427_s8 + $0x1] ss:$0 sm:$0xff] }
0x1a77   :  { %4260 = vmatmul.mubr.msk.bf16.vlgmr.msra.gmra.mrb[88].mxu1 %vm512_vm3, %v2943_v62 }
0x1a78   :  { %3348 = vmatprep.mubr.bf16.mxu1 %v4611_v30  ;;  %v4409_v30 = vld [vmem:[%s5425_s6 + $0x58] sm:$0xff]   ;;  %3317 = vmatpush1.bf16.msra.mxu1 %v4414_v54 }
0x1a79   :  { %4270 = vmatpush3.bf16.msra.mxu0 %v4409_v30  ;;  %3318 = vmatprep.subr.bf16.mxu1 %v4419_v6 }
0x1a7a   :  { %4271 = vmatprep.subr.bf16.mxu0 %v4610_v4 }
0x1a7d   :  { %4272 = vmatpush3.bf16.msra.mxu0 %v4410_v3 }
0x1a7e   :  { %4273 = vmatprep.subr.bf16.mxu0 %v4610_v4 }
0x1a81   :  { %4274 = vmatpush3.bf16.msra.mxu0 %v4411_v5 }
0x1a82   :  { %4275 = vmatprep.subr.bf16.mxu0 %v4610_v4 }
0x1a85   :  { %4276 = vmatpush3.bf16.msra.mxu0 %v4412_v16  ;;  %v4441_v16 = vld [vmem:[#allocation5 + $0x88] sm:$0xff]  }
0x1a86   :  { %4277 = vmatprep.subr.bf16.mxu0 %v4610_v4 }
0x1a89   :  { %4278 = vmatpush3.bf16.msra.mxu0 %v4413_v22  ;;  %v4442_v22 = vld [vmem:[#allocation5 + $0xd0] sm:$0xff]  }
0x1b36   :  { %v2986_v56 = vpop.f32.mrb[60].mxu0 }
0x1b37   :  { %v4255_v7 = vpop.f32.mrb[61].mxu0 }
0x1b38   :  { %v2989_v8 = vpop.f32.mrb[62].mxu0  ;;  %v4438_v7 = vld [vmem:[#allocation5 + $0xc0] sm:$0xff]  }
0x1b39   :  { %v4256_v10 = vpop.f32.mrb[63].mxu0  ;;  %v4439_v8 = vld [vmem:[#allocation5 + $0x80] sm:$0xff]   ;;  %3989 = vmatprep.subr.bf16.mxu0 %v4438_v7 }
0x1b3a   :  { %v4440_v10 = vld [vmem:[#allocation5 + $0xc8] sm:$0xff]  }
0x1b4a   :  { %v3034_v23 = vpop.f32.mrb[88].mxu1 }
0x1b4b   :  { %v3040_v24 = vpack.c.bf16 %v3034_v23, %v2986_v56  ;;  %v4261_v25 = vpop.f32.mrb[89].mxu1  ;;  %v4443_v23 = vld [vmem:[#allocation5 + $0x90] sm:$0xff]  }
0x1b4c   :  { %v3037_v26 = vpop.f32.mrb[90].mxu1  ;;  %v4445_v25 = vld [vmem:[#allocation5 + $0x98] sm:$0xff]  }
0x1b4d   :  { %3042 = vrot.lane.b32.xlu1 %v3040_v24, %s4613_s22  ;;  %v4262_v27 = vpop.f32.mrb[91].mxu1  ;;  %v4444_v24 = vld [vmem:[#allocation5 + $0xd8] sm:$0xff]   ;;  %v4446_v26 = vld [vmem:[#allocation5 + $0xe0] sm:$0xff]  }
0x1b4e   :  { %v4447_v27 = vld [vmem:[#allocation5 + $0xa0] sm:$0xff]  }
0x1bbf   :  { %v3043_v29 = vpop.permute.xlu1 %3042 }
0x1bc0   :  { %3045 = vst.msk [vmem:[#allocation2] sm:$0xff] %vm1311_vm6, %v3043_v29  ;;  %v4448_v29 = vld [vmem:[#allocation5 + $0xe8] sm:$0xff]  }
0x1bc7   :  { %v3046_v31 = vld [vmem:[#allocation2] sm:$0xff] }
0x1bc8   :  { %4280 = vmatmul.mubr.bf16.vlgmr.msra.gmra.mrb[64].mxu0 %v3046_v31  ;;  %v4449_v31 = vld [vmem:[#allocation5 + $0xa8] sm:$0xff]  }
0x1bc9   :  { %3990 = vmatpush3.bf16.msra.mxu0 %v4439_v8 }
0x1bca   :  { %3991 = vmatprep.subr.bf16.mxu0 %v4440_v10 }
0x1bcd   :  { %3992 = vmatpush3.bf16.msra.mxu0 %v4441_v16 }
0x1bce   :  { %3993 = vmatprep.subr.bf16.mxu0 %v4442_v22  ;;  %v3834_v22 = vld [vmem:[%s5432_s13 + $0x1] ss:$0 sm:$0xff] }
0x1bd1   :  { %3994 = vmatpush3.bf16.msra.mxu0 %v4443_v23 }
0x1bd2   :  { %3995 = vmatprep.subr.bf16.mxu0 %v4444_v24 }
0x1bd5   :  { %3996 = vmatpush3.bf16.msra.mxu0 %v4445_v25 }
0x1bd6   :  { %3997 = vmatprep.subr.bf16.mxu0 %v4446_v26 }
0x1bd9   :  { %3998 = vmatpush3.bf16.msra.mxu0 %v4447_v27 }
0x1bda   :  { %3999 = vmatprep.subr.bf16.mxu0 %v4448_v29 }
0x1bdd   :  { %4000 = vmatpush3.bf16.msra.mxu0 %v4449_v31 }
0x1c9b   :  { %v3154_v50 = vpop.f32.mrb[64].mxu0 }
0x1c9c   :  { %v3155_v51 = vadd.f32 %v3787_v33, %v3154_v50  ;;  %v4281_v4 = vpop.f32.mrb[65].mxu0  ;;  %v4451_v50 = vld [vmem:[#allocation5 + $0xb0] sm:$0xff]  }
0x1c9d   :  { %v3157_v34 = vpop.f32.mrb[66].mxu0  ;;  %v4453_v4 = vld [vmem:[#allocation5 + $0xb8] sm:$0xff]  }
0x1c9e   :  { %v3158_v21 = vadd.f32 %v3787_v33, %v3157_v34  ;;  %v4282_v28 = vpop.f32.mrb[67].mxu0  ;;  %v3161_v63 = vadd.f32 %v3155_v51, %v5098_v17  ;;  %v4417_v17 = vld [vmem:[%s5429_s10 + $0x90] ss:$8 sps:$4 sm:$0xff]   ;;  %v4452_v51 = vld [vmem:[#allocation5 + $0xf8] sm:$0xff]  }
0x1c9f   :  { %3319 = vmatpush1.bf16.msra.mxu1 %v4417_v17  ;;  %v4450_v33 = vld [vmem:[#allocation5 + $0xf0] sm:$0xff]   ;;  %v3816_v34 = vld [vmem:[%s5430_s11 + $0x2] sm:$0x3] }
0x1ca0   :  { %3167 = vadd.xlane.f32.xlu0 %v3161_v63  ;;  %v3162_v36 = vadd.f32 %v3158_v21, %v5100_v20  ;;  %3320 = vmatprep.subr.bf16.mxu1 %v4422_v19  ;;  %v3229_v21 = vrot.slane %v3816_v34, %v4782_v59  ;;  %v3233_v28 = vrot.slane %v3816_v34, %v4774_v55 }
0x1ca1   :  { %4001 = vmatprep.subr.bf16.mxu0 %v4450_v33 }
0x1ca2   :  { %3169 = vadd.xlane.f32.xlu1 %v3162_v36  ;;  %4002 = vmatpush3.bf16.msra.mxu0 %v4451_v50 }
0x1ca3   :  { %3321 = vmatpush1.bf16.msra.mxu1 %v4420_v44  ;;  %4003 = vmatprep.subr.bf16.mxu0 %v4452_v51 }
0x1ca4   :  { %3322 = vmatprep.subr.bf16.mxu1 %v4425_v45 }
0x1ca6   :  { %4004 = vmatpush3.bf16.msra.mxu0 %v4453_v4 }
0x1ca7   :  { %3323 = vmatpush1.bf16.msra.mxu1 %v4423_v40 }
0x1ca8   :  { %3324 = vmatprep.subr.bf16.mxu1 %v4428_v46 }
0x1cab   :  { %3325 = vmatpush1.bf16.msra.mxu1 %v4426_v32 }
0x1cac   :  { %3326 = vmatprep.subr.bf16.mxu1 %v4431_v37 }
0x1caf   :  { %3327 = vmatpush1.bf16.msra.mxu1 %v4429_v38 }
0x1cb0   :  { %3328 = vmatprep.subr.bf16.mxu1 %v4434_v47 }
0x1cb3   :  { %3329 = vmatpush1.bf16.msra.mxu1 %v4432_v48 }
0x1cb4   :  { %3330 = vmatprep.subr.bf16.mxu1 %v4437_v18 }
0x1cb7   :  { %3331 = vmatpush1.bf16.msra.mxu1 %v4435_v49 }
0x1d2d   :  { %v3168_v20 = vpop.xlane.xlu0 %3167 }
0x1d2e   :  { %v3171_v11 = vmul.f32 0.0078125, %v3168_v20 }
0x1d2f   :  { %v3170_v41 = vpop.xlane.xlu1 %3169 }
0x1d30   :  { %v3173_v42 = vsub.f32 %v3161_v63, %v3171_v11  ;;  %v3172_v12 = vmul.f32 0.0078125, %v3170_v41 }
0x1d32   :  { %v3174_v9 = vsub.f32 %v3162_v36, %v3172_v12  ;;  %v3175_v13 = vmul.f32 %v3173_v42, %v3173_v42 }
0x1d34   :  { %3177 = vadd.xlane.f32.xlu0 %v3175_v13  ;;  %v3176_v43 = vmul.f32 %v3174_v9, %v3174_v9 }
0x1d38   :  { %3179 = vadd.xlane.f32.xlu0 %v3176_v43 }
0x1dc1   :  { %v3178_v52 = vpop.xlane.xlu0 %3177 }
0x1dc2   :  { %v3181_v35 = vmul.f32 0.0078125, %v3178_v52 }
0x1dc4   :  { %v3183_v53 = vadd.f32 1e-12, %v3181_v35 }
0x1dc5   :  { %v3180_v57 = vpop.xlane.xlu0 %3179 }
0x1dc6   :  { %4538 = vrsqrt.f32 %v3183_v53  ;;  %v3182_v58 = vmul.f32 0.0078125, %v3180_v57 }
0x1dc8   :  { %v3184_v0 = vadd.f32 1e-12, %v3182_v58 }
0x1dca   :  { %4540 = vrsqrt.f32 %v3184_v0 }
0x1dd0   :  { %v4539_v60 = vpop.eup %4538 }
0x1dd1   :  { %v3187_v61 = vmul.f32 %v4539_v60, %v3173_v42 }
0x1dd3   :  { %v3195_v1 = vmul.f32 %v3798_v14, %v3187_v61 }
0x1dd4   :  { %v4541_v62 = vpop.eup %4540 }
0x1dd5   :  { %v3188_v15 = vmul.f32 %v4541_v62, %v3174_v9  ;;  %v5391_v3 = vadd.f32 %v3799_v2, %v3195_v1 }
0x1dd7   :  { %v3196_v30 = vmul.f32 %v3798_v14, %v3188_v15 }
0x1dd9   :  { %v5393_v5 = vadd.f32 %v3799_v2, %v3196_v30 }
0x1ddb   :  { %v3205_v56 = vpack.c.bf16 %v5393_v5, %v5391_v3 }
0x1ddd   :  { %3349 = vmatmul.mubr.bf16.vlgmr.msra.gmra.mrb[92].mxu1 %v3205_v56 }
0x1eb0   :  { %v3350_v63 = vpop.f32.mrb[92].mxu1 }
0x1eb1   :  { %v3351_v36 = vadd.f32 %v3350_v63, %v3229_v21  ;;  %v3352_v54 = vpop.f32.mrb[93].mxu1 }
0x1eb2   :  { %v3353_v39 = vadd.f32 %v3352_v54, %v3233_v28  ;;  %v3354_v6 = vpop.f32.mrb[94].mxu1 }
0x1eb3   :  { %v3359_v17 = vmul.f32 %v3351_v36, %v3351_v36  ;;  %v3355_v20 = vadd.f32 %v3354_v6, %v3229_v21  ;;  %v3356_v11 = vpop.f32.mrb[95].mxu1 }
0x1eb4   :  { %v3360_v41 = vmul.f32 %v3353_v39, %v3353_v39  ;;  %v3357_v42 = vadd.f32 %v3356_v11, %v3233_v28 }
0x1eb5   :  { %v3363_v12 = vmul.f32 %v3359_v17, %v3351_v36  ;;  %v3361_v9 = vmul.f32 %v3355_v20, %v3355_v20 }
0x1eb6   :  { %v3364_v13 = vmul.f32 %v3360_v41, %v3353_v39  ;;  %v3362_v43 = vmul.f32 %v3357_v42, %v3357_v42  ;;  %v3853_v41 = vld [vmem:[%s5433_s14 + $0x1] ss:$0 sm:$0xff] }
0x1eb7   :  { %v3367_v19 = vmul.f32 0.044715, %v3363_v12  ;;  %v3365_v44 = vmul.f32 %v3361_v9, %v3355_v20  ;;  %v3854_v9 = vld [vmem:[%s5434_s15 + $0x1] ss:$0 sm:$0xff] }
0x1eb8   :  { %v3368_v45 = vmul.f32 0.044715, %v3364_v13  ;;  %v3366_v59 = vmul.f32 %v3362_v43, %v3357_v42 }
0x1eb9   :  { %v3371_v40 = vadd.f32 %v3367_v19, %v3351_v36  ;;  %v3369_v55 = vmul.f32 0.044715, %v3365_v44 }
0x1eba   :  { %v3372_v46 = vadd.f32 %v3368_v45, %v3353_v39  ;;  %v3370_v32 = vmul.f32 0.044715, %v3366_v59 }
0x1ebb   :  { %v3375_v37 = vmul.f32 0.7978846, %v3371_v40  ;;  %v3373_v38 = vadd.f32 %v3369_v55, %v3355_v20 }
0x1ebc   :  { %v3376_v47 = vmul.f32 0.7978846, %v3372_v46  ;;  %v3374_v48 = vadd.f32 %v3370_v32, %v3357_v42 }
0x1ebd   :  { %4542 = vtanh.f32 %v3375_v37  ;;  %v3377_v18 = vmul.f32 0.7978846, %v3373_v38 }
0x1ebe   :  { %4544 = vtanh.f32 %v3376_v47  ;;  %v3378_v49 = vmul.f32 0.7978846, %v3374_v48 }
0x1ebf   :  { %4546 = vtanh.f32 %v3377_v18 }
0x1ec0   :  { %4548 = vtanh.f32 %v3378_v49 }
0x1ec7   :  { %v4543_v52 = vpop.eup %4542 }
0x1ec8   :  { %v4545_v35 = vpop.eup %4544  ;;  %v3383_v53 = vadd.f32 1.0, %v4543_v52 }
0x1ec9   :  { %v4547_v57 = vpop.eup %4546  ;;  %v3384_v58 = vadd.f32 1.0, %v4545_v35 }
0x1eca   :  { %v4549_v0 = vpop.eup %4548  ;;  %v3387_v60 = vmul.f32 0.5, %v3383_v53  ;;  %v3385_v61 = vadd.f32 1.0, %v4547_v57 }
0x1ecb   :  { %v3386_v14 = vadd.f32 1.0, %v4549_v0  ;;  %v3388_v62 = vmul.f32 0.5, %v3384_v58 }
0x1ecc   :  { %v3389_v15 = vmul.f32 0.5, %v3385_v61  ;;  %v3391_v2 = vmul.f32 %v3387_v60, %v3351_v36 }
0x1ecd   :  { %v3390_v1 = vmul.f32 0.5, %v3386_v14  ;;  %v3392_v56 = vmul.f32 %v3388_v62, %v3353_v39 }
0x1ece   :  { %v3393_v30 = vmul.f32 %v3389_v15, %v3355_v20 }
0x1ecf   :  { %v3394_v7 = vmul.f32 %v3390_v1, %v3357_v42 }
0x1ed0   :  { %v3395_v8 = vpack.c.bf16 %v3393_v30, %v3391_v2 }
0x1ed1   :  { %v3396_v10 = vpack.c.bf16 %v3394_v7, %v3392_v56 }
0x1ed3   :  { %3566 = vmatprep.mubr.bf16.mxu0 %v3396_v10 }
0x1ed4   :  { %3567 = vmatmul.mubr.bf16.vlgmr.msra.gmra.mrb[68].mxu0 %v3395_v8 }
0x1fa7   :  { %v4005_v16 = vpop.f32.mrb[68].mxu0 }
0x1fa8   :  { %v4006_v23 = vpop.f32.mrb[69].mxu0 }
0x1fa9   :  { %v4007_v24 = vadd.f32 %v4006_v23, %v4005_v16  ;;  %v4008_v25 = vpop.f32.mrb[70].mxu0 }
0x1faa   :  { %v4009_v26 = vpop.f32.mrb[71].mxu0 }
0x1fab   :  { %v3569_v27 = vadd.f32 %v4007_v24, %v3834_v22  ;;  %v4010_v29 = vadd.f32 %v4009_v26, %v4008_v25 }
0x1fad   :  { %v3572_v31 = vadd.f32 %v4010_v29, %v3834_v22  ;;  %v3575_v33 = vadd.f32 %v3569_v27, %v5391_v3 }
0x1faf   :  { %3581 = vadd.xlane.f32.xlu0 %v3575_v33  ;;  %v3576_v50 = vadd.f32 %v3572_v31, %v5393_v5 }
0x1fb1   :  { %3583 = vadd.xlane.f32.xlu1 %v3576_v50 }
0x203c   :  { %v3582_v51 = vpop.xlane.xlu0 %3581 }
0x203d   :  { %v3585_v4 = vmul.f32 0.0078125, %v3582_v51 }
0x203e   :  { %v3584_v34 = vpop.xlane.xlu1 %3583 }
0x203f   :  { %v3587_v21 = vsub.f32 %v3575_v33, %v3585_v4  ;;  %v3586_v28 = vmul.f32 0.0078125, %v3584_v34 }
0x2041   :  { %v3588_v63 = vsub.f32 %v3576_v50, %v3586_v28  ;;  %v3589_v36 = vmul.f32 %v3587_v21, %v3587_v21 }
0x2043   :  { %3591 = vadd.xlane.f32.xlu0 %v3589_v36  ;;  %v3590_v54 = vmul.f32 %v3588_v63, %v3588_v63 }
0x2045   :  { %3593 = vadd.xlane.f32.xlu1 %v3590_v54 }
0x20d0   :  { %v3592_v39 = vpop.xlane.xlu0 %3591 }
0x20d1   :  { %v3595_v6 = vmul.f32 0.0078125, %v3592_v39 }
0x20d2   :  { %v3594_v17 = vpop.xlane.xlu1 %3593 }
0x20d3   :  { %v3597_v20 = vadd.f32 1e-12, %v3595_v6  ;;  %v3596_v11 = vmul.f32 0.0078125, %v3594_v17 }
0x20d5   :  { %4550 = vrsqrt.f32 %v3597_v20  ;;  %v3598_v3 = vadd.f32 1e-12, %v3596_v11 }
0x20d7   :  { %4552 = vrsqrt.f32 %v3598_v3 }
0x20df   :  { %v4551_v5 = vpop.eup %4550 }
0x20e0   :  { %v3601_v42 = vmul.f32 %v4551_v5, %v3587_v21 }
0x20e1   :  { %v4553_v12 = vpop.eup %4552 }
0x20e2   :  { %v3609_v13 = vmul.f32 %v3853_v41, %v3601_v42  ;;  %v3602_v43 = vmul.f32 %v4553_v12, %v3588_v63 }
0x20e4   :  { %v3617_v19 = vadd.f32 %v3854_v9, %v3609_v13  ;;  %v3610_v44 = vmul.f32 %v3853_v41, %v3602_v43 }
0x20e6   :  { %3619 = vst [vmem:[%s5435_s16] sm:$0xff] %v3617_v19  ;;  %v3618_v45 = vadd.f32 %v3854_v9, %v3610_v44 }
0x20e8   :  { %3620 = vst [vmem:[%s5435_s16 + $0x8] sm:$0xff] %v3618_v45 }
0x20e9   :  { %3625 = vsyncpa [#allocation4], 1 }
0x20ea   :  { %3626 = vsyncpa [#allocation6], 1 }

</bundles_post_ra>
